<compile_context>
chip_gen: v7x
topology: tpu7x:2x2x1
jax: 0.10.0
libtpu: 0.0.40
codegen_flags: <defaults>
</compile_context>

<pallas_src>
import functools
import random

import jax
import jax.numpy as jnp
from jax.experimental import pallas as pl
from jax.experimental.pallas import tpu as pltpu

BN_EPS = 1e-5        # torchvision BatchNorm2d eps
MIXSTYLE_EPS = 1e-6  # ResNet_ITTA.eps

_VMEM = pl.BlockSpec(memory_space=pltpu.MemorySpace.VMEM)


# ------------------------------ Pallas kernels ------------------------------

def _conv_bn_relu_kernel(p_ref, w_ref, b_ref, o_ref):
    """relu(patches @ W_folded + b_folded); frozen BN is folded into W, b."""
    acc = jnp.dot(p_ref[...], w_ref[...], preferred_element_type=jnp.float32)
    o_ref[...] = jnp.maximum(acc + b_ref[...], 0.0)


def _conv_bn_add_relu_kernel(p_ref, w_ref, b_ref, s_ref, o_ref):
    """relu(patches @ W_folded + b_folded + skip) — fused BasicBlock tail."""
    acc = jnp.dot(p_ref[...], w_ref[...], preferred_element_type=jnp.float32)
    o_ref[...] = jnp.maximum(acc + b_ref[...] + s_ref[...], 0.0)


def _window_max_kernel(x_ref, o_ref):
    """Max over pre-gathered 3x3 pooling taps: (9, M, C) -> (M, C)."""
    o_ref[...] = jnp.max(x_ref[...], axis=0)


def _spatial_stats_kernel(x_ref, mu_ref, sig_ref, *, eps):
    """MixStyle stats: per-(batch, channel) spatial mean and unbiased std."""
    x = x_ref[...]                                     # (B, H, W, C)
    n = x.shape[1] * x.shape[2]
    s = jnp.sum(jnp.sum(x, axis=2, keepdims=True), axis=1, keepdims=True)
    mu = s / n
    c = x - mu
    v = jnp.sum(jnp.sum(c * c, axis=2, keepdims=True), axis=1, keepdims=True) / (n - 1)
    mu_ref[...] = mu
    sig_ref[...] = jnp.sqrt(v + eps)


def _affine_bc_kernel(x_ref, scale_ref, shift_ref, o_ref):
    """MixStyle application: x * scale + shift with per-(B, 1, 1, C) scale/shift."""
    o_ref[...] = x_ref[...] * scale_ref[...] + shift_ref[...]


# --------------------------- Pallas call wrappers ----------------------------

def _conv_matmul(patches, w, b, skip=None, tm=256):
    """Row-tiled (B*Ho*Wo, K) @ (K, Cout) with fused BN-bias / ReLU / residual."""
    M, K = patches.shape
    N = w.shape[1]
    tm = min(tm, M)
    tm = ((tm + 7) // 8) * 8
    grid_m = pl.cdiv(M, tm)
    Mp = grid_m * tm
    if Mp != M:
        patches = jnp.pad(patches, ((0, Mp - M), (0, 0)))
        if skip is not None:
            skip = jnp.pad(skip, ((0, Mp - M), (0, 0)))

    row_spec = pl.BlockSpec((tm, K), lambda i: (i, 0))
    w_spec = pl.BlockSpec((K, N), lambda i: (0, 0))     # weights stay VMEM-resident
    b_spec = pl.BlockSpec((1, N), lambda i: (0, 0))
    out_spec = pl.BlockSpec((tm, N), lambda i: (i, 0))
    cparams = pltpu.CompilerParams(dimension_semantics=("parallel",))

    if skip is None:
        out = pl.pallas_call(
            _conv_bn_relu_kernel,
            out_shape=jax.ShapeDtypeStruct((Mp, N), jnp.float32),
            grid=(grid_m,),
            in_specs=[row_spec, w_spec, b_spec],
            out_specs=out_spec,
            compiler_params=cparams,
        )(patches, w, b)
    else:
        skip_spec = pl.BlockSpec((tm, N), lambda i: (i, 0))
        out = pl.pallas_call(
            _conv_bn_add_relu_kernel,
            out_shape=jax.ShapeDtypeStruct((Mp, N), jnp.float32),
            grid=(grid_m,),
            in_specs=[row_spec, w_spec, b_spec, skip_spec],
            out_specs=out_spec,
            compiler_params=cparams,
        )(patches, w, b, skip)
    return out[:M]


def _im2col(x_nhwc, kh, kw, stride, pad):
    """Patch extraction (layout plumbing): NHWC -> (B*Ho*Wo, kh*kw*C)."""
    xp = jnp.pad(x_nhwc, ((0, 0), (pad, pad), (pad, pad), (0, 0)))
    B, Hp, Wp, C = xp.shape
    Ho = (Hp - kh) // stride + 1
    Wo = (Wp - kw) // stride + 1
    taps = []
    for i in range(kh):
        for j in range(kw):
            taps.append(xp[:, i:i + stride * Ho:stride, j:j + stride * Wo:stride, :])
    patches = jnp.concatenate(taps, axis=-1)            # (B, Ho, Wo, kh*kw*C)
    return patches.reshape(B * Ho * Wo, kh * kw * C), (B, Ho, Wo)


def _maxpool_3x3_s2(x_nhwc):
    """MaxPool2d(3, stride=2, padding=1): taps gathered in wrapper, max in Pallas."""
    B, H, W, C = x_nhwc.shape
    Ho = (H + 2 - 3) // 2 + 1
    Wo = (W + 2 - 3) // 2 + 1
    xp = jnp.pad(x_nhwc, ((0, 0), (1, 1), (1, 1), (0, 0)), constant_values=-1e30)
    taps = [xp[:, i:i + 2 * Ho:2, j:j + 2 * Wo:2, :].reshape(B * Ho * Wo, C)
            for i in range(3) for j in range(3)]
    stack = jnp.stack(taps, axis=0)                     # (9, B*Ho*Wo, C)
    out = pl.pallas_call(
        _window_max_kernel,
        out_shape=jax.ShapeDtypeStruct((B * Ho * Wo, C), jnp.float32),
        in_specs=[_VMEM],
        out_specs=_VMEM,
    )(stack)
    return out.reshape(B, Ho, Wo, C)


def _mixstyle(x_nhwc, lmda, perm):
    """ResNet_ITTA.mixstyle with Beta sample lmda (B,) and permutation perm (B,)."""
    B, H, W, C = x_nhwc.shape
    mu, sig = pl.pallas_call(
        functools.partial(_spatial_stats_kernel, eps=MIXSTYLE_EPS),
        out_shape=(jax.ShapeDtypeStruct((B, 1, 1, C), jnp.float32),
                   jax.ShapeDtypeStruct((B, 1, 1, C), jnp.float32)),
        in_specs=[_VMEM],
        out_specs=(_VMEM, _VMEM),
    )(x_nhwc)
    # Tiny (B,1,1,C) mixing of the detached stats stays in the wrapper.
    l = lmda.reshape(B, 1, 1, 1)
    mu_mix = mu * l + mu[perm] * (1.0 - l)
    sig_mix = sig * l + sig[perm] * (1.0 - l)
    scale = sig_mix / sig
    shift = mu_mix - mu * scale
    return pl.pallas_call(
        _affine_bc_kernel,
        out_shape=jax.ShapeDtypeStruct((B, H, W, C), jnp.float32),
        in_specs=[_VMEM, _VMEM, _VMEM],
        out_specs=_VMEM,
    )(x_nhwc, scale, shift)


# ------------------------ parameters & full forward --------------------------

def _fold_conv_bn(w_oihw, bn):
    """Fold a frozen (eval-mode) BatchNorm into the preceding bias-free conv."""
    gamma, beta, mean, var = bn
    s = gamma / jnp.sqrt(var + BN_EPS)
    cout, cin, kh, kw = w_oihw.shape
    w_mat = jnp.transpose(w_oihw, (2, 3, 1, 0)).reshape(kh * kw * cin, cout)
    return w_mat * s[None, :], (beta - mean * s).reshape(1, cout)


def prepare_params(raw):
    """One-time weight prep (transpose / reshape / BN fold), hoisted out of the call path."""
    prep = {'conv1': _fold_conv_bn(raw['conv1_w'], raw['bn1'])}
    for bi in range(2):
        prep[f'l1_{bi}_c1'] = _fold_conv_bn(raw[f'l1_{bi}_conv1_w'], raw[f'l1_{bi}_bn1'])
        prep[f'l1_{bi}_c2'] = _fold_conv_bn(raw[f'l1_{bi}_conv2_w'], raw[f'l1_{bi}_bn2'])
    return prep


def _basic_block(x_nhwc, c1, c2):
    B, H, W, C = x_nhwc.shape
    identity = x_nhwc.reshape(B * H * W, C)
    p1, _ = _im2col(x_nhwc, 3, 3, 1, 1)
    h = _conv_matmul(p1, c1[0], c1[1]).reshape(B, H, W, C)
    p2, _ = _im2col(h, 3, 3, 1, 1)
    out = _conv_matmul(p2, c2[0], c2[1], skip=identity)
    return out.reshape(B, H, W, C)


def resnet_itta_forward(x_nchw, prep, lmda, perm, *, isaug):
    """ResNet_ITTA.forward (resnet18 config): stem -> maxpool -> layer1 -> (x, aug_x)."""
    x = jnp.transpose(x_nchw, (0, 2, 3, 1))             # NCHW -> NHWC (channels on lanes)
    B = x.shape[0]
    p, (_, Ho, Wo) = _im2col(x, 7, 7, 2, 3)
    y = _conv_matmul(p, *prep['conv1']).reshape(B, Ho, Wo, 64)
    y = _maxpool_3x3_s2(y)
    for bi in range(2):
        y = _basic_block(y, prep[f'l1_{bi}_c1'], prep[f'l1_{bi}_c2'])
    aug = _mixstyle(y, lmda, perm) if isaug else y
    to_nchw = lambda t: jnp.transpose(t, (0, 3, 1, 2))
    return to_nchw(y), to_nchw(aug)


def init_params(key):
    """Deterministic random params with torch layouts (conv: (Cout,Cin,kh,kw))."""
    def conv_w(k, cout, cin, kh, kw):
        std = (2.0 / (cin * kh * kw)) ** 0.5
        return std * jax.random.normal(k, (cout, cin, kh, kw), jnp.float32)

    def bn_params(k, c):
        kg, kb, km, kv = jax.random.split(k, 4)
        gamma = jax.random.uniform(kg, (c,), jnp.float32, 0.5, 1.5)
        beta = 0.1 * jax.random.normal(kb, (c,), jnp.float32)
        mean = 0.1 * jax.random.normal(km, (c,), jnp.float32)
        var = jax.random.uniform(kv, (c,), jnp.float32, 0.5, 1.5)
        return (gamma, beta, mean, var)

    keys = jax.random.split(key, 10)
    raw = {'conv1_w': conv_w(keys[0], 64, 3, 7, 7), 'bn1': bn_params(keys[1], 64)}
    ki = 2
    for bi in range(2):
        raw[f'l1_{bi}_conv1_w'] = conv_w(keys[ki], 64, 64, 3, 3); ki += 1
        raw[f'l1_{bi}_bn1'] = bn_params(keys[ki], 64); ki += 1
        raw[f'l1_{bi}_conv2_w'] = conv_w(keys[ki], 64, 64, 3, 3); ki += 1
        raw[f'l1_{bi}_bn2'] = bn_params(keys[ki], 64); ki += 1
    return raw


# ------------------------------ pure-JAX reference ---------------------------

def _ref_conv_bn(x, w_oihw, bn, stride, pad):
    gamma, beta, mean, var = bn
    y = jax.lax.conv_general_dilated(
        x, jnp.transpose(w_oihw, (2, 3, 1, 0)),
        window_strides=(stride, stride), padding=((pad, pad), (pad, pad)),
        dimension_numbers=('NHWC', 'HWIO', 'NHWC'),
        precision=jax.lax.Precision.HIGHEST)
    return gamma * (y - mean) / jnp.sqrt(var + BN_EPS) + beta


def _ref_maxpool(x):
    return jax.lax.reduce_window(
        x, -jnp.inf, jax.lax.max, window_dimensions=(1, 3, 3, 1),
        window_strides=(1, 2, 2, 1), padding=((0, 0), (1, 1), (1, 1), (0, 0)))


def _ref_mixstyle(x, lmda, perm):
    mu = jnp.mean(x, axis=(1, 2), keepdims=True)
    var = jnp.var(x, axis=(1, 2), keepdims=True, ddof=1)
    sig = jnp.sqrt(var + MIXSTYLE_EPS)
    xn = (x - mu) / sig
    l = lmda.reshape(-1, 1, 1, 1)
    mu_mix = mu * l + mu[perm] * (1.0 - l)
    sig_mix = sig * l + sig[perm] * (1.0 - l)
    return xn * sig_mix + mu_mix


def reference_forward(x_nchw, raw, lmda, perm, isaug):
    x = jnp.transpose(x_nchw, (0, 2, 3, 1))
    y = jnp.maximum(_ref_conv_bn(x, raw['conv1_w'], raw['bn1'], 2, 3), 0.0)
    y = _ref_maxpool(y)
    for bi in range(2):
        idn = y
        h = jnp.maximum(_ref_conv_bn(y, raw[f'l1_{bi}_conv1_w'], raw[f'l1_{bi}_bn1'], 1, 1), 0.0)
        h = _ref_conv_bn(h, raw[f'l1_{bi}_conv2_w'], raw[f'l1_{bi}_bn2'], 1, 1)
        y = jnp.maximum(h + idn, 0.0)
    aug = _ref_mixstyle(y, lmda, perm) if isaug else y
    to_nchw = lambda t: jnp.transpose(t, (0, 3, 1, 2))
    return to_nchw(y), to_nchw(aug)


# ------------------------------------ main -----------------------------------

if __name__ == "__main__":
    B, C_in, H, W = 2, 3, 32, 32
    key = jax.random.PRNGKey(0)
    k_x, k_p, k_beta, k_perm = jax.random.split(key, 4)
    x = jax.random.normal(k_x, (B, C_in, H, W), jnp.float32)

    raw = init_params(k_p)
    prep = prepare_params(raw)   # one-time weight prep, reused across calls

    # Host-side `random.random() > 0.5` branch from ResNet_ITTA.forward (seeded).
    random.seed(0)
    isaug = random.random() > 0.5
    # MixStyle's Beta(0.1, 0.1) sample and batch permutation, drawn once per call.
    lmda = jax.random.beta(k_beta, 0.1, 0.1, (B,)).astype(jnp.float32)
    perm = jax.random.permutation(k_perm, B)

    fwd = jax.jit(functools.partial(resnet_itta_forward, isaug=isaug))
    out_x, out_aug = fwd(x, prep, lmda, perm)
    out_x, out_aug = jax.block_until_ready((out_x, out_aug))

    ref_x, ref_aug = reference_forward(x, raw, lmda, perm, isaug)

    assert out_x.shape == (B, 64, 8, 8) and out_aug.shape == (B, 64, 8, 8)
    # Tolerance covers MXU f32 multi-pass vs XLA conv accumulation-order differences.
    assert jnp.allclose(out_x, ref_x, atol=1e-2, rtol=1e-2)
    assert jnp.allclose(out_aug, ref_aug, atol=1e-2, rtol=1e-2)

    print("KERNEL_OK")
</pallas_src>

<mosaic_0001>
module attributes {stable_mosaic.version = 11 : i64} {
  func.func @_conv_bn_relu_kernel(%arg0: i32, %arg1: memref<256x147xf32, #tpu.memory_space<vmem>>, %arg2: memref<147x64xf32, #tpu.memory_space<vmem>>, %arg3: memref<1x64xf32, #tpu.memory_space<vmem>>, %arg4: memref<256x64xf32, #tpu.memory_space<vmem>>) attributes {dimension_semantics = [#tpu.dimension_semantics<parallel>], iteration_bounds = array<i64: 2>, scalar_prefetch = 0 : i64, scratch_operands = 0 : i64, tpu.core_type = #tpu.core_type<tc>, window_params = [{transform_indices = @transform_0, window_bounds = array<i64: 256, 147>}, {pipeline_mode = #tpu.pipeline_mode<synchronous>, transform_indices = @transform_1, window_bounds = array<i64: 147, 64>}, {pipeline_mode = #tpu.pipeline_mode<synchronous>, transform_indices = @transform_2, window_bounds = array<i64: 1, 64>}, {transform_indices = @transform_3, window_bounds = array<i64: 256, 64>}]} {
    %c0 = arith.constant 0 : index
    %c0_0 = arith.constant 0 : index
    %0 = vector.load %arg1[%c0, %c0_0] : memref<256x147xf32, #tpu.memory_space<vmem>>, vector<256x147xf32>
    %c0_1 = arith.constant 0 : index
    %c0_2 = arith.constant 0 : index
    %1 = vector.load %arg2[%c0_1, %c0_2] : memref<147x64xf32, #tpu.memory_space<vmem>>, vector<147x64xf32>
    %cst = arith.constant dense<0.000000e+00> : vector<256x64xf32>
    %2 = tpu.matmul %0, %1, %cst {dimension_numbers = #tpu.dot_dimension_numbers<[1], [0], [0], [1], [0, 0, 1, 1], [], []>} : vector<256x147xf32>, vector<147x64xf32>, vector<256x64xf32> -> vector<256x64xf32>
    %c0_3 = arith.constant 0 : index
    %c0_4 = arith.constant 0 : index
    %3 = vector.load %arg3[%c0_3, %c0_4] : memref<1x64xf32, #tpu.memory_space<vmem>>, vector<1x64xf32>
    %4 = vector.broadcast %3 : vector<1x64xf32> to vector<256x64xf32>
    %5 = arith.addf %2, %4 : vector<256x64xf32>
    %cst_5 = arith.constant 0.000000e+00 : f32
    %6 = vector.broadcast %cst_5 : f32 to vector<256x64xf32>
    %7 = arith.maximumf %5, %6 : vector<256x64xf32>
    %c0_6 = arith.constant 0 : index
    %c0_7 = arith.constant 0 : index
    %8 = vector.load %arg4[%c0_6, %c0_7] : memref<256x64xf32, #tpu.memory_space<vmem>>, vector<256x64xf32>
    tpu.vector_store %arg4[%c0_6, %c0_7], %7 {strides = array<i32>} : memref<256x64xf32, #tpu.memory_space<vmem>>, vector<256x64xf32>,
    return
  }
  func.func @transform_0(%arg0: i32) -> (i32, i32) {
    %c0_i32 = arith.constant 0 : i32
    %c0_i32_0 = arith.constant 0 : i32
    return %arg0, %c0_i32 : i32, i32
  }
  func.func @transform_1(%arg0: i32) -> (i32, i32) {
    %c0_i32 = arith.constant 0 : i32
    %c0_i32_0 = arith.constant 0 : i32
    %c0_i32_1 = arith.constant 0 : i32
    return %c0_i32, %c0_i32_0 : i32, i32
  }
  func.func @transform_2(%arg0: i32) -> (i32, i32) {
    %c0_i32 = arith.constant 0 : i32
    %c0_i32_0 = arith.constant 0 : i32
    %c0_i32_1 = arith.constant 0 : i32
    return %c0_i32, %c0_i32_0 : i32, i32
  }
  func.func @transform_3(%arg0: i32) -> (i32, i32) {
    %c0_i32 = arith.constant 0 : i32
    %c0_i32_0 = arith.constant 0 : i32
    return %arg0, %c0_i32 : i32, i32
  }
}

module attributes {stable_mosaic.version = 11 : i64} {
  func.func @_window_max_kernel(%arg0: memref<9x128x64xf32, #tpu.memory_space<vmem>>, %arg1: memref<128x64xf32, #tpu.memory_space<vmem>>) attributes {dimension_semantics = [], scalar_prefetch = 0 : i64, scratch_operands = 0 : i64, tpu.core_type = #tpu.core_type<tc>} {
    %c0 = arith.constant 0 : index
    %c0_0 = arith.constant 0 : index
    %c0_1 = arith.constant 0 : index
    %0 = vector.load %arg0[%c0, %c0_0, %c0_1] : memref<9x128x64xf32, #tpu.memory_space<vmem>>, vector<9x128x64xf32>
    %cst = arith.constant dense<0xFF800000> : vector<128x64xf32>
    %1 = vector.multi_reduction <maximumf>, %0, %cst [0] : vector<9x128x64xf32> to vector<128x64xf32>
    %c0_2 = arith.constant 0 : index
    %c0_3 = arith.constant 0 : index
    %2 = vector.load %arg1[%c0_2, %c0_3] : memref<128x64xf32, #tpu.memory_space<vmem>>, vector<128x64xf32>
    tpu.vector_store %arg1[%c0_2, %c0_3], %1 {strides = array<i32>} : memref<128x64xf32, #tpu.memory_space<vmem>>, vector<128x64xf32>,
    return
  }
}

module attributes {stable_mosaic.version = 11 : i64} {
  func.func @_conv_bn_relu_kernel(%arg0: i32, %arg1: memref<128x576xf32, #tpu.memory_space<vmem>>, %arg2: memref<576x64xf32, #tpu.memory_space<vmem>>, %arg3: memref<1x64xf32, #tpu.memory_space<vmem>>, %arg4: memref<128x64xf32, #tpu.memory_space<vmem>>) attributes {dimension_semantics = [#tpu.dimension_semantics<parallel>], iteration_bounds = array<i64: 1>, scalar_prefetch = 0 : i64, scratch_operands = 0 : i64, tpu.core_type = #tpu.core_type<tc>, window_params = [{transform_indices = @transform_0, window_bounds = array<i64: 128, 576>}, {pipeline_mode = #tpu.pipeline_mode<synchronous>, transform_indices = @transform_1, window_bounds = array<i64: 576, 64>}, {pipeline_mode = #tpu.pipeline_mode<synchronous>, transform_indices = @transform_2, window_bounds = array<i64: 1, 64>}, {transform_indices = @transform_3, window_bounds = array<i64: 128, 64>}]} {
    %c0 = arith.constant 0 : index
    %c0_0 = arith.constant 0 : index
    %0 = vector.load %arg1[%c0, %c0_0] : memref<128x576xf32, #tpu.memory_space<vmem>>, vector<128x576xf32>
    %c0_1 = arith.constant 0 : index
    %c0_2 = arith.constant 0 : index
    %1 = vector.load %arg2[%c0_1, %c0_2] : memref<576x64xf32, #tpu.memory_space<vmem>>, vector<576x64xf32>
    %cst = arith.constant dense<0.000000e+00> : vector<128x64xf32>
    %2 = tpu.matmul %0, %1, %cst {dimension_numbers = #tpu.dot_dimension_numbers<[1], [0], [0], [1], [0, 0, 1, 1], [], []>} : vector<128x576xf32>, vector<576x64xf32>, vector<128x64xf32> -> vector<128x64xf32>
    %c0_3 = arith.constant 0 : index
    %c0_4 = arith.constant 0 : index
    %3 = vector.load %arg3[%c0_3, %c0_4] : memref<1x64xf32, #tpu.memory_space<vmem>>, vector<1x64xf32>
    %4 = vector.broadcast %3 : vector<1x64xf32> to vector<128x64xf32>
    %5 = arith.addf %2, %4 : vector<128x64xf32>
    %cst_5 = arith.constant 0.000000e+00 : f32
    %6 = vector.broadcast %cst_5 : f32 to vector<128x64xf32>
    %7 = arith.maximumf %5, %6 : vector<128x64xf32>
    %c0_6 = arith.constant 0 : index
    %c0_7 = arith.constant 0 : index
    %8 = vector.load %arg4[%c0_6, %c0_7] : memref<128x64xf32, #tpu.memory_space<vmem>>, vector<128x64xf32>
    tpu.vector_store %arg4[%c0_6, %c0_7], %7 {strides = array<i32>} : memref<128x64xf32, #tpu.memory_space<vmem>>, vector<128x64xf32>,
    return
  }
  func.func @transform_0(%arg0: i32) -> (i32, i32) {
    %c0_i32 = arith.constant 0 : i32
    %c0_i32_0 = arith.constant 0 : i32
    return %arg0, %c0_i32 : i32, i32
  }
  func.func @transform_1(%arg0: i32) -> (i32, i32) {
    %c0_i32 = arith.constant 0 : i32
    %c0_i32_0 = arith.constant 0 : i32
    %c0_i32_1 = arith.constant 0 : i32
    return %c0_i32, %c0_i32_0 : i32, i32
  }
  func.func @transform_2(%arg0: i32) -> (i32, i32) {
    %c0_i32 = arith.constant 0 : i32
    %c0_i32_0 = arith.constant 0 : i32
    %c0_i32_1 = arith.constant 0 : i32
    return %c0_i32, %c0_i32_0 : i32, i32
  }
  func.func @transform_3(%arg0: i32) -> (i32, i32) {
    %c0_i32 = arith.constant 0 : i32
    %c0_i32_0 = arith.constant 0 : i32
    return %arg0, %c0_i32 : i32, i32
  }
}

module attributes {stable_mosaic.version = 11 : i64} {
  func.func @_conv_bn_add_relu_kernel(%arg0: i32, %arg1: memref<128x576xf32, #tpu.memory_space<vmem>>, %arg2: memref<576x64xf32, #tpu.memory_space<vmem>>, %arg3: memref<1x64xf32, #tpu.memory_space<vmem>>, %arg4: memref<128x64xf32, #tpu.memory_space<vmem>>, %arg5: memref<128x64xf32, #tpu.memory_space<vmem>>) attributes {dimension_semantics = [#tpu.dimension_semantics<parallel>], iteration_bounds = array<i64: 1>, scalar_prefetch = 0 : i64, scratch_operands = 0 : i64, tpu.core_type = #tpu.core_type<tc>, window_params = [{transform_indices = @transform_0, window_bounds = array<i64: 128, 576>}, {pipeline_mode = #tpu.pipeline_mode<synchronous>, transform_indices = @transform_1, window_bounds = array<i64: 576, 64>}, {pipeline_mode = #tpu.pipeline_mode<synchronous>, transform_indices = @transform_2, window_bounds = array<i64: 1, 64>}, {transform_indices = @transform_3, window_bounds = array<i64: 128, 64>}, {transform_indices = @transform_4, window_bounds = array<i64: 128, 64>}]} {
    %c0 = arith.constant 0 : index
    %c0_0 = arith.constant 0 : index
    %0 = vector.load %arg1[%c0, %c0_0] : memref<128x576xf32, #tpu.memory_space<vmem>>, vector<128x576xf32>
    %c0_1 = arith.constant 0 : index
    %c0_2 = arith.constant 0 : index
    %1 = vector.load %arg2[%c0_1, %c0_2] : memref<576x64xf32, #tpu.memory_space<vmem>>, vector<576x64xf32>
    %cst = arith.constant dense<0.000000e+00> : vector<128x64xf32>
    %2 = tpu.matmul %0, %1, %cst {dimension_numbers = #tpu.dot_dimension_numbers<[1], [0], [0], [1], [0, 0, 1, 1], [], []>} : vector<128x576xf32>, vector<576x64xf32>, vector<128x64xf32> -> vector<128x64xf32>
    %c0_3 = arith.constant 0 : index
    %c0_4 = arith.constant 0 : index
    %3 = vector.load %arg3[%c0_3, %c0_4] : memref<1x64xf32, #tpu.memory_space<vmem>>, vector<1x64xf32>
    %4 = vector.broadcast %3 : vector<1x64xf32> to vector<128x64xf32>
    %5 = arith.addf %2, %4 : vector<128x64xf32>
    %c0_5 = arith.constant 0 : index
    %c0_6 = arith.constant 0 : index
    %6 = vector.load %arg4[%c0_5, %c0_6] : memref<128x64xf32, #tpu.memory_space<vmem>>, vector<128x64xf32>
    %7 = arith.addf %5, %6 : vector<128x64xf32>
    %cst_7 = arith.constant 0.000000e+00 : f32
    %8 = vector.broadcast %cst_7 : f32 to vector<128x64xf32>
    %9 = arith.maximumf %7, %8 : vector<128x64xf32>
    %c0_8 = arith.constant 0 : index
    %c0_9 = arith.constant 0 : index
    %10 = vector.load %arg5[%c0_8, %c0_9] : memref<128x64xf32, #tpu.memory_space<vmem>>, vector<128x64xf32>
    tpu.vector_store %arg5[%c0_8, %c0_9], %9 {strides = array<i32>} : memref<128x64xf32, #tpu.memory_space<vmem>>, vector<128x64xf32>,
    return
  }
  func.func @transform_0(%arg0: i32) -> (i32, i32) {
    %c0_i32 = arith.constant 0 : i32
    %c0_i32_0 = arith.constant 0 : i32
    return %arg0, %c0_i32 : i32, i32
  }
  func.func @transform_1(%arg0: i32) -> (i32, i32) {
    %c0_i32 = arith.constant 0 : i32
    %c0_i32_0 = arith.constant 0 : i32
    %c0_i32_1 = arith.constant 0 : i32
    return %c0_i32, %c0_i32_0 : i32, i32
  }
  func.func @transform_2(%arg0: i32) -> (i32, i32) {
    %c0_i32 = arith.constant 0 : i32
    %c0_i32_0 = arith.constant 0 : i32
    %c0_i32_1 = arith.constant 0 : i32
    return %c0_i32, %c0_i32_0 : i32, i32
  }
  func.func @transform_3(%arg0: i32) -> (i32, i32) {
    %c0_i32 = arith.constant 0 : i32
    %c0_i32_0 = arith.constant 0 : i32
    return %arg0, %c0_i32 : i32, i32
  }
  func.func @transform_4(%arg0: i32) -> (i32, i32) {
    %c0_i32 = arith.constant 0 : i32
    %c0_i32_0 = arith.constant 0 : i32
    return %arg0, %c0_i32 : i32, i32
  }
}

module attributes {stable_mosaic.version = 11 : i64} {
  func.func @_spatial_stats_kernel(%arg0: memref<2x8x8x64xf32, #tpu.memory_space<vmem>>, %arg1: memref<2x1x1x64xf32, #tpu.memory_space<vmem>>, %arg2: memref<2x1x1x64xf32, #tpu.memory_space<vmem>>) attributes {dimension_semantics = [], scalar_prefetch = 0 : i64, scratch_operands = 0 : i64, tpu.core_type = #tpu.core_type<tc>} {
    %c0 = arith.constant 0 : index
    %c0_0 = arith.constant 0 : index
    %c0_1 = arith.constant 0 : index
    %c0_2 = arith.constant 0 : index
    %0 = vector.load %arg0[%c0, %c0_0, %c0_1, %c0_2] : memref<2x8x8x64xf32, #tpu.memory_space<vmem>>, vector<2x8x8x64xf32>
    %cst = arith.constant dense<0.000000e+00> : vector<2x8x64xf32>
    %1 = vector.multi_reduction <add>, %0, %cst [2] : vector<2x8x8x64xf32> to vector<2x8x64xf32>
    %2 = vector.shape_cast %1 : vector<2x8x64xf32> to vector<2x8x1x64xf32>
    %cst_3 = arith.constant dense<0.000000e+00> : vector<2x1x64xf32>
    %3 = vector.multi_reduction <add>, %2, %cst_3 [1] : vector<2x8x1x64xf32> to vector<2x1x64xf32>
    %4 = vector.shape_cast %3 : vector<2x1x64xf32> to vector<2x1x1x64xf32>
    %cst_4 = arith.constant 6.400000e+01 : f32
    %5 = vector.broadcast %cst_4 : f32 to vector<2x1x1x64xf32>
    %6 = arith.divf %4, %5 : vector<2x1x1x64xf32>
    %7 = vector.broadcast %6 : vector<2x1x1x64xf32> to vector<2x8x8x64xf32>
    %8 = arith.subf %0, %7 : vector<2x8x8x64xf32>
    %9 = arith.mulf %8, %8 : vector<2x8x8x64xf32>
    %cst_5 = arith.constant dense<0.000000e+00> : vector<2x8x64xf32>
    %10 = vector.multi_reduction <add>, %9, %cst_5 [2] : vector<2x8x8x64xf32> to vector<2x8x64xf32>
    %11 = vector.shape_cast %10 : vector<2x8x64xf32> to vector<2x8x1x64xf32>
    %cst_6 = arith.constant dense<0.000000e+00> : vector<2x1x64xf32>
    %12 = vector.multi_reduction <add>, %11, %cst_6 [1] : vector<2x8x1x64xf32> to vector<2x1x64xf32>
    %13 = vector.shape_cast %12 : vector<2x1x64xf32> to vector<2x1x1x64xf32>
    %cst_7 = arith.constant 6.300000e+01 : f32
    %14 = vector.broadcast %cst_7 : f32 to vector<2x1x1x64xf32>
    %15 = arith.divf %13, %14 : vector<2x1x1x64xf32>
    %c0_8 = arith.constant 0 : index
    %c0_9 = arith.constant 0 : index
    %c0_10 = arith.constant 0 : index
    %c0_11 = arith.constant 0 : index
    %16 = vector.load %arg1[%c0_8, %c0_9, %c0_10, %c0_11] : memref<2x1x1x64xf32, #tpu.memory_space<vmem>>, vector<2x1x1x64xf32>
    tpu.vector_store %arg1[%c0_8, %c0_9, %c0_10, %c0_11], %6 {strides = array<i32>} : memref<2x1x1x64xf32, #tpu.memory_space<vmem>>, vector<2x1x1x64xf32>,
    %cst_12 = arith.constant 9.99999997E-7 : f32
    %17 = vector.broadcast %cst_12 : f32 to vector<2x1x1x64xf32>
    %18 = arith.addf %15, %17 : vector<2x1x1x64xf32>
    %19 = math.sqrt %18 : vector<2x1x1x64xf32>
    %c0_13 = arith.constant 0 : index
    %c0_14 = arith.constant 0 : index
    %c0_15 = arith.constant 0 : index
    %c0_16 = arith.constant 0 : index
    %20 = vector.load %arg2[%c0_13, %c0_14, %c0_15, %c0_16] : memref<2x1x1x64xf32, #tpu.memory_space<vmem>>, vector<2x1x1x64xf32>
    tpu.vector_store %arg2[%c0_13, %c0_14, %c0_15, %c0_16], %19 {strides = array<i32>} : memref<2x1x1x64xf32, #tpu.memory_space<vmem>>, vector<2x1x1x64xf32>,
    return
  }
}

module attributes {stable_mosaic.version = 11 : i64} {
  func.func @_affine_bc_kernel(%arg0: memref<2x8x8x64xf32, #tpu.memory_space<vmem>>, %arg1: memref<2x1x1x64xf32, #tpu.memory_space<vmem>>, %arg2: memref<2x1x1x64xf32, #tpu.memory_space<vmem>>, %arg3: memref<2x8x8x64xf32, #tpu.memory_space<vmem>>) attributes {dimension_semantics = [], scalar_prefetch = 0 : i64, scratch_operands = 0 : i64, tpu.core_type = #tpu.core_type<tc>} {
    %c0 = arith.constant 0 : index
    %c0_0 = arith.constant 0 : index
    %c0_1 = arith.constant 0 : index
    %c0_2 = arith.constant 0 : index
    %0 = vector.load %arg0[%c0, %c0_0, %c0_1, %c0_2] : memref<2x8x8x64xf32, #tpu.memory_space<vmem>>, vector<2x8x8x64xf32>
    %c0_3 = arith.constant 0 : index
    %c0_4 = arith.constant 0 : index
    %c0_5 = arith.constant 0 : index
    %c0_6 = arith.constant 0 : index
    %1 = vector.load %arg1[%c0_3, %c0_4, %c0_5, %c0_6] : memref<2x1x1x64xf32, #tpu.memory_space<vmem>>, vector<2x1x1x64xf32>
    %2 = vector.broadcast %1 : vector<2x1x1x64xf32> to vector<2x8x8x64xf32>
    %3 = arith.mulf %0, %2 : vector<2x8x8x64xf32>
    %c0_7 = arith.constant 0 : index
    %c0_8 = arith.constant 0 : index
    %c0_9 = arith.constant 0 : index
    %c0_10 = arith.constant 0 : index
    %4 = vector.load %arg2[%c0_7, %c0_8, %c0_9, %c0_10] : memref<2x1x1x64xf32, #tpu.memory_space<vmem>>, vector<2x1x1x64xf32>
    %5 = vector.broadcast %4 : vector<2x1x1x64xf32> to vector<2x8x8x64xf32>
    %6 = arith.addf %3, %5 : vector<2x8x8x64xf32>
    %c0_11 = arith.constant 0 : index
    %c0_12 = arith.constant 0 : index
    %c0_13 = arith.constant 0 : index
    %c0_14 = arith.constant 0 : index
    %7 = vector.load %arg3[%c0_11, %c0_12, %c0_13, %c0_14] : memref<2x8x8x64xf32, #tpu.memory_space<vmem>>, vector<2x8x8x64xf32>
    tpu.vector_store %arg3[%c0_11, %c0_12, %c0_13, %c0_14], %6 {strides = array<i32>} : memref<2x8x8x64xf32, #tpu.memory_space<vmem>>, vector<2x8x8x64xf32>,
    return
  }
}

</mosaic_0001>

<bundles_post_ra>
// kernel: resnet_itta_forward.8
= control target key start
LH: loop header
LB: loop body
LE: loop exit
PB: predicated region body
PF: predicated region fallthrough
CT: control target
= control target key end

     0   :  { %s848_s12 = smov 0   ;;  %s1145_s0 = inlined_call_operand.vmem [shape: f32[512,147], index: 0, kind: input, shape index: {}]   ;;  %s1146_s1 = inlined_call_operand.vmem [shape: f32[147,64], index: 1, kind: input, shape index: {}]   ;;  %s1147_s2 = inlined_call_operand.vmem [shape: f32[1,64], index: 2, kind: input, shape index: {}]   ;;  %s1148_s3 = inlined_call_operand.vmem [shape: f32[512,64], index: 3, kind: output, shape index: {}]  }
   0x1 LB: > { %s714_s13 = sadd.s32 4294967295, %s824_s12   ;;  %p718_p0 = scmp.ge.s32.totalorder %s824_s12, 1  ;;  %s824_s12 = sphi %s848_s12, %s13_s12  }
   0x2   : > { %p139_p1 = scmp.lt.s32.totalorder %s824_s12, 3 }
   0x4   : > { %p140_p2 = pnand %p718_p0, %p139_p1 }
   0x5   : > { %v241_v0 = vld [vmem:[%s1146_s1] sm:$0xff] (!%p140_p2)  ;;  %v242_v1 = vld [vmem:[%s1146_s1 + $0x8] sm:$0xff] (!%p140_p2)  ;;  %v243_v2 = vld [vmem:[%s1146_s1 + $0x10] sm:$0xff] (!%p140_p2)  ;;  %v826_v3 = vmov (!%p140_p2), 0.0|0.0   ;;  %s719_s22 = sshll.u32 (!%p140_p2), %s714_s13, 5  ;;  %vm267_vm0 = vcmask (!%p140_p2), 154624  }
   0x6   : > { %143 = sbr.rel (%p140_p2) target bundleno = 322 (0x142), region = 32  ;;  %761 = vmatprep.subr.bf16.mxu0 (!%p140_p2), %v826_v3  ;;  %788 = vmatprep.subr.bf16.mxu1 (!%p140_p2), %v826_v3  ;;  %v762_v4 = vpack.c.bf16 (!%p140_p2), %v242_v1, %v241_v0  ;;  %v244_v5 = vld [vmem:[%s1146_s1 + $0x18] sm:$0xff] (!%p140_p2)  ;;  %p165_p3 = scmp.lt.s32.totalorder (!%p140_p2), %s719_s22, 63  ;;  %v245_v7 = vld [vmem:[%s1146_s1 + $0x20] sm:$0xff] (!%p140_p2)  ;;  %v246_v8 = vld [vmem:[%s1146_s1 + $0x28] sm:$0xff] (!%p140_p2)  ;;  %v827_v30 = vmov (!%p140_p2), 0.0  }
   0x7   : > { %v765_v6 = vpack.c.bf16 (!%p140_p2), %v244_v5, %v243_v2  ;;  %v768_v9 = vpack.c.bf16 (!%p140_p2), %v246_v8, %v245_v7  ;;  %v247_v10 = vld [vmem:[%s1146_s1 + $0x30] sm:$0xff] (!%p140_p2)  ;;  %v248_v11 = vld [vmem:[%s1146_s1 + $0x38] sm:$0xff] (!%p140_p2)  ;;  %v249_v15 = vld [vmem:[%s1146_s1 + $0x40] sm:$0xff] (!%p140_p2)  ;;  %vm364_vm1 = vcmask (!%p140_p2), 1042432   ;;  %vm625_vm2 = vcmask (!%p140_p2), 523264  }
   0x8   : > { %763 = vmatpush1.bf16.msra.mxu0 (!%p140_p2), %v762_v4  ;;  %798 = vmatpush1.bf16.msra.mxu1 (!%p140_p2), %v762_v4  ;;  %v771_v14 = vpack.c.bf16 (!%p140_p2), %v248_v11, %v247_v10  ;;  %v250_v16 = vld [vmem:[%s1146_s1 + $0x48] sm:$0xff] (!%p140_p2)  ;;  %v251_v18 = vld [vmem:[%s1146_s1 + $0x50] sm:$0xff] (!%p140_p2)  ;;  %v252_v19 = vld [vmem:[%s1146_s1 + $0x58] sm:$0xff] (!%p140_p2) }
   0x9   : > { %764 = vmatprep.subr.bf16.mxu0 (!%p140_p2), %v826_v3  ;;  %789 = vmatprep.subr.bf16.mxu1 (!%p140_p2), %v826_v3  ;;  %v774_v17 = vpack.c.bf16 (!%p140_p2), %v250_v16, %v249_v15  ;;  %v777_v20 = vpack.c.bf16 (!%p140_p2), %v252_v19, %v251_v18  ;;  %v253_v21 = vld [vmem:[%s1146_s1 + $0x60] sm:$0xff] (!%p140_p2)  ;;  %v254_v22 = vld [vmem:[%s1146_s1 + $0x68] sm:$0xff] (!%p140_p2)  ;;  %v255_v24 = vld [vmem:[%s1146_s1 + $0x70] sm:$0xff] (!%p140_p2) }
   0xa   : > { %v780_v23 = vpack.c.bf16 (!%p140_p2), %v254_v22, %v253_v21  ;;  %v256_v25 = vld [vmem:[%s1146_s1 + $0x78] sm:$0xff] (!%p140_p2)  ;;  %v257_v27 = vld [vmem:[%s1146_s1 + $0x80] sm:$0xff] (!%p140_p2)  ;;  %v258_v28 = vld [vmem:[%s1146_s1 + $0x88] sm:$0xff] (!%p140_p2) }
   0xb   : > { %v783_v26 = vpack.c.bf16 (!%p140_p2), %v256_v25, %v255_v24  ;;  %v786_v29 = vpack.c.bf16 (!%p140_p2), %v258_v28, %v257_v27  ;;  %v259_v31 = vld [vmem:[%s1146_s1 + $0x90] sm:$0x7] (!%p140_p2) }
   0xc   : > { %766 = vmatpush1.bf16.msra.mxu0 (!%p140_p2), %v765_v6  ;;  %799 = vmatpush1.bf16.msra.mxu1 (!%p140_p2), %v765_v6 }
   0xd   : > { %s1150_s22 = smov (!%p165_p3, %s719_s22), 63  ;;  %767 = vmatprep.subr.bf16.mxu0 %v826_v3  ;;  %790 = vmatprep.subr.bf16.mxu1 %v826_v3 }
   0xe   : > { %s760_s27 = sshll.u32 %s1150_s22, 4  ;;  %s723_s8 = sshll.u32 %s1150_s22, 3 }
   0xf   : > { %s887_s5 = scalar_lea.vmem %s1145_s0, %s760_s27 }
  0x10   : > { %v178_v12 = vld [vmem:[%s887_s5 + $0x8] sm:$0xff]  ;;  %769 = vmatpush1.bf16.msra.mxu0 %v768_v9  ;;  %800 = vmatpush1.bf16.msra.mxu1 %v768_v9  ;;  %v177_v32 = vld [vmem:[%s887_s5] sm:$0xff]  ;;  %v180_v34 = vld [vmem:[%s887_s5 + $0x18] sm:$0xff] }
  0x11   : > { %v210_v13 = vld [vmem:[%s887_s5 + $0x108] sm:$0xff]  ;;  %726 = vmatprep.mubr.msk.f32.mxu0 %vm267_vm0, %v178_v12  ;;  %770 = vmatprep.subr.bf16.mxu0 %v826_v3  ;;  %v209_v33 = vld [vmem:[%s887_s5 + $0x100] sm:$0xff]  ;;  %v212_v35 = vld [vmem:[%s887_s5 + $0x118] sm:$0xff] }
  0x12   : > { %742 = vmatprep.mubr.msk.f32.mxu1 %vm267_vm0, %v210_v13  ;;  %791 = vmatprep.subr.bf16.mxu1 %v826_v3  ;;  %v179_v36 = vld [vmem:[%s887_s5 + $0x10] sm:$0xff]  ;;  %v182_v38 = vld [vmem:[%s887_s5 + $0x28] sm:$0xff]  ;;  %v181_v40 = vld [vmem:[%s887_s5 + $0x20] sm:$0xff] }
  0x13   : > { %v211_v37 = vld [vmem:[%s887_s5 + $0x110] sm:$0xff]  ;;  %v214_v39 = vld [vmem:[%s887_s5 + $0x128] sm:$0xff]  ;;  %v213_v41 = vld [vmem:[%s887_s5 + $0x120] sm:$0xff] }
  0x14   : > { %772 = vmatpush1.bf16.msra.mxu0 %v771_v14  ;;  %801 = vmatpush1.bf16.msra.mxu1 %v771_v14  ;;  %v184_v42 = vld [vmem:[%s887_s5 + $0x38] sm:$0xff]  ;;  %v183_v44 = vld [vmem:[%s887_s5 + $0x30] sm:$0xff]  ;;  %v186_v46 = vld [vmem:[%s887_s5 + $0x48] sm:$0xff] }
  0x15   : > { %773 = vmatprep.subr.bf16.mxu0 %v826_v3  ;;  %792 = vmatprep.subr.bf16.mxu1 %v826_v3  ;;  %v216_v43 = vld [vmem:[%s887_s5 + $0x138] sm:$0xff]  ;;  %v215_v45 = vld [vmem:[%s887_s5 + $0x130] sm:$0xff]  ;;  %v218_v47 = vld [vmem:[%s887_s5 + $0x148] sm:$0xff] }
  0x16   : > { %v185_v48 = vld [vmem:[%s887_s5 + $0x40] sm:$0xff]  ;;  %v188_v50 = vld [vmem:[%s887_s5 + $0x58] sm:$0xff]  ;;  %v187_v52 = vld [vmem:[%s887_s5 + $0x50] sm:$0xff] }
  0x17   : > { %v217_v49 = vld [vmem:[%s887_s5 + $0x140] sm:$0xff]  ;;  %v220_v51 = vld [vmem:[%s887_s5 + $0x158] sm:$0xff]  ;;  %v219_v53 = vld [vmem:[%s887_s5 + $0x150] sm:$0xff] }
  0x18   : > { %775 = vmatpush1.bf16.msra.mxu0 %v774_v17  ;;  %802 = vmatpush1.bf16.msra.mxu1 %v774_v17  ;;  %v190_v54 = vld [vmem:[%s887_s5 + $0x68] sm:$0xff]  ;;  %v189_v56 = vld [vmem:[%s887_s5 + $0x60] sm:$0xff]  ;;  %v192_v58 = vld [vmem:[%s887_s5 + $0x78] sm:$0xff] }
  0x19   : > { %776 = vmatprep.subr.bf16.mxu0 %v826_v3  ;;  %793 = vmatprep.subr.bf16.mxu1 %v826_v3  ;;  %v222_v55 = vld [vmem:[%s887_s5 + $0x168] sm:$0xff]  ;;  %v221_v57 = vld [vmem:[%s887_s5 + $0x160] sm:$0xff]  ;;  %v224_v59 = vld [vmem:[%s887_s5 + $0x178] sm:$0xff] }
  0x1a   : > { %v191_v60 = vld [vmem:[%s887_s5 + $0x70] sm:$0xff]  ;;  %v194_v62 = vld [vmem:[%s887_s5 + $0x88] sm:$0xff]  ;;  %v193_v0 = vld [vmem:[%s887_s5 + $0x80] sm:$0xff] }
  0x1b   : > { %v223_v61 = vld [vmem:[%s887_s5 + $0x170] sm:$0xff]  ;;  %v226_v63 = vld [vmem:[%s887_s5 + $0x188] sm:$0xff]  ;;  %v225_v1 = vld [vmem:[%s887_s5 + $0x180] sm:$0xff] }
  0x1c   : > { %778 = vmatpush1.bf16.msra.mxu0 %v777_v20  ;;  %803 = vmatpush1.bf16.msra.mxu1 %v777_v20  ;;  %v196_v2 = vld [vmem:[%s887_s5 + $0x98] sm:$0xff]  ;;  %v195_v4 = vld [vmem:[%s887_s5 + $0x90] sm:$0xff]  ;;  %v198_v6 = vld [vmem:[%s887_s5 + $0xa8] sm:$0xff] }
  0x1d   : > { %779 = vmatprep.subr.bf16.mxu0 %v826_v3  ;;  %794 = vmatprep.subr.bf16.mxu1 %v826_v3  ;;  %v227_v5 = vld [vmem:[%s887_s5 + $0x190] sm:$0xff]  ;;  %v230_v7 = vld [vmem:[%s887_s5 + $0x1a8] sm:$0xff]  ;;  %v197_v8 = vld [vmem:[%s887_s5 + $0xa0] sm:$0xff] }
  0x1e   : > { %v229_v9 = vld [vmem:[%s887_s5 + $0x1a0] sm:$0xff]  ;;  %v200_v10 = vld [vmem:[%s887_s5 + $0xb8] sm:$0xff]  ;;  %v199_v12 = vld [vmem:[%s887_s5 + $0xb0] sm:$0xff] }
  0x1f   : > { %v232_v11 = vld [vmem:[%s887_s5 + $0x1b8] sm:$0xff]  ;;  %v231_v13 = vld [vmem:[%s887_s5 + $0x1b0] sm:$0xff]  ;;  %v202_v14 = vld [vmem:[%s887_s5 + $0xc8] sm:$0xff] }
  0x20   : > { %781 = vmatpush1.bf16.msra.mxu0 %v780_v23  ;;  %804 = vmatpush1.bf16.msra.mxu1 %v780_v23  ;;  %v234_v15 = vld [vmem:[%s887_s5 + $0x1c8] sm:$0xff]  ;;  %v201_v16 = vld [vmem:[%s887_s5 + $0xc0] sm:$0xff]  ;;  %v204_v18 = vld [vmem:[%s887_s5 + $0xd8] sm:$0xff] }
  0x21   : > { %782 = vmatprep.subr.bf16.mxu0 %v826_v3  ;;  %795 = vmatprep.subr.bf16.mxu1 %v826_v3  ;;  %v233_v17 = vld [vmem:[%s887_s5 + $0x1c0] sm:$0xff]  ;;  %v236_v19 = vld [vmem:[%s887_s5 + $0x1d8] sm:$0xff]  ;;  %v203_v20 = vld [vmem:[%s887_s5 + $0xd0] sm:$0xff] }
  0x22   : > { %v235_v21 = vld [vmem:[%s887_s5 + $0x1d0] sm:$0xff]  ;;  %v206_v22 = vld [vmem:[%s887_s5 + $0xe8] sm:$0xff]  ;;  %v205_v24 = vld [vmem:[%s887_s5 + $0xe0] sm:$0xff] }
  0x23   : > { %v238_v23 = vld [vmem:[%s887_s5 + $0x1e8] sm:$0xff]  ;;  %v237_v25 = vld [vmem:[%s887_s5 + $0x1e0] sm:$0xff]  ;;  %v240_v27 = vld [vmem:[%s887_s5 + $0x1f8] sm:$0xff] }
  0x24   : > { %784 = vmatpush1.bf16.msra.mxu0 %v783_v26  ;;  %805 = vmatpush1.bf16.msra.mxu1 %v783_v26  ;;  %v208_v26 = vld [vmem:[%s887_s5 + $0xf8] sm:$0xff]  ;;  %v207_v28 = vld [vmem:[%s887_s5 + $0xf0] sm:$0xff] }
  0x25   : > { %785 = vmatprep.subr.bf16.mxu0 %v826_v3  ;;  %796 = vmatprep.subr.bf16.mxu1 %v826_v3  ;;  %v228_v3 = vld [vmem:[%s887_s5 + $0x198] sm:$0xff] }
  0x28   : > { %787 = vmatpush1.bf16.msra.mxu0 %v786_v29  ;;  %806 = vmatpush1.bf16.msra.mxu1 %v786_v29  ;;  %v239_v29 = vld [vmem:[%s887_s5 + $0x1f0] sm:$0xff]  ;;  %s1046_s5 = scalar_lea.vmem %s1148_s3, %s723_s8 }
  0x29   : > { %404 = vmatprep.subr.mxu0 %v827_v30  ;;  %797 = vmatprep.subr.mxu1 %v827_v30  ;;  %v1038_v30 = vld [vmem:[%s1147_s2] ss:$0 sm:$0xff] }
  0x2c   : > { %725 = vmatpush1.msk.msra.mxu0 %vm364_vm1, %v259_v31  ;;  %807 = vmatpush1.msk.msra.mxu1 %vm364_vm1, %v259_v31 }
  0x2d   : > { %433 = vmatmul.mubr.f32.vlgmr.msra.gmra.mrb[0].mxu0 %v177_v32  ;;  %513 = vmatmul.mubr.f32.vlgmr.msra.gmra.mrb[0].mxu1 %v209_v33 }
  0x2e   : > { %727 = vmatprep.mubr.msk.f32.mxu0 %vm267_vm0, %v180_v34  ;;  %743 = vmatprep.mubr.msk.f32.mxu1 %vm267_vm0, %v212_v35 }
  0x31   : > { %438 = vmatmul.mubr.f32.gmra.mrb[2].mxu0 %v179_v36  ;;  %518 = vmatmul.mubr.f32.gmra.mrb[2].mxu1 %v211_v37 }
  0x32   : > { %728 = vmatprep.mubr.msk.f32.mxu0 %vm267_vm0, %v182_v38  ;;  %744 = vmatprep.mubr.msk.f32.mxu1 %vm267_vm0, %v214_v39 }
  0x35   : > { %443 = vmatmul.mubr.f32.gmra.mrb[4].mxu0 %v181_v40  ;;  %523 = vmatmul.mubr.f32.gmra.mrb[4].mxu1 %v213_v41 }
  0x36   : > { %729 = vmatprep.mubr.msk.f32.mxu0 %vm267_vm0, %v184_v42  ;;  %745 = vmatprep.mubr.msk.f32.mxu1 %vm267_vm0, %v216_v43 }
  0x39   : > { %448 = vmatmul.mubr.f32.gmra.mrb[6].mxu0 %v183_v44  ;;  %528 = vmatmul.mubr.f32.gmra.mrb[6].mxu1 %v215_v45 }
  0x3a   : > { %730 = vmatprep.mubr.msk.f32.mxu0 %vm267_vm0, %v186_v46  ;;  %746 = vmatprep.mubr.msk.f32.mxu1 %vm267_vm0, %v218_v47 }
  0x3d   : > { %453 = vmatmul.mubr.f32.gmra.mrb[8].mxu0 %v185_v48  ;;  %533 = vmatmul.mubr.f32.gmra.mrb[8].mxu1 %v217_v49 }
  0x3e   : > { %731 = vmatprep.mubr.msk.f32.mxu0 %vm267_vm0, %v188_v50  ;;  %747 = vmatprep.mubr.msk.f32.mxu1 %vm267_vm0, %v220_v51 }
  0x41   : > { %458 = vmatmul.mubr.f32.gmra.mrb[10].mxu0 %v187_v52  ;;  %538 = vmatmul.mubr.f32.gmra.mrb[10].mxu1 %v219_v53 }
  0x42   : > { %732 = vmatprep.mubr.msk.f32.mxu0 %vm267_vm0, %v190_v54  ;;  %748 = vmatprep.mubr.msk.f32.mxu1 %vm267_vm0, %v222_v55 }
  0x45   : > { %463 = vmatmul.mubr.f32.gmra.mrb[12].mxu0 %v189_v56  ;;  %543 = vmatmul.mubr.f32.gmra.mrb[12].mxu1 %v221_v57 }
  0x46   : > { %733 = vmatprep.mubr.msk.f32.mxu0 %vm267_vm0, %v192_v58  ;;  %749 = vmatprep.mubr.msk.f32.mxu1 %vm267_vm0, %v224_v59 }
  0x49   : > { %468 = vmatmul.mubr.f32.gmra.mrb[14].mxu0 %v191_v60  ;;  %548 = vmatmul.mubr.f32.gmra.mrb[14].mxu1 %v223_v61 }
  0x4a   : > { %734 = vmatprep.mubr.msk.f32.mxu0 %vm267_vm0, %v194_v62  ;;  %750 = vmatprep.mubr.msk.f32.mxu1 %vm267_vm0, %v226_v63 }
  0x4d   : > { %473 = vmatmul.mubr.f32.gmra.mrb[16].mxu0 %v193_v0  ;;  %553 = vmatmul.mubr.f32.gmra.mrb[16].mxu1 %v225_v1 }
  0x4e   : > { %735 = vmatprep.mubr.msk.f32.mxu0 %vm267_vm0, %v196_v2  ;;  %751 = vmatprep.mubr.msk.f32.mxu1 %vm267_vm0, %v228_v3 }
  0x51   : > { %478 = vmatmul.mubr.f32.gmra.mrb[18].mxu0 %v195_v4  ;;  %558 = vmatmul.mubr.f32.gmra.mrb[18].mxu1 %v227_v5 }
  0x52   : > { %736 = vmatprep.mubr.msk.f32.mxu0 %vm267_vm0, %v198_v6  ;;  %752 = vmatprep.mubr.msk.f32.mxu1 %vm267_vm0, %v230_v7 }
  0x55   : > { %483 = vmatmul.mubr.f32.gmra.mrb[20].mxu0 %v197_v8  ;;  %563 = vmatmul.mubr.f32.gmra.mrb[20].mxu1 %v229_v9 }
  0x56   : > { %737 = vmatprep.mubr.msk.f32.mxu0 %vm267_vm0, %v200_v10  ;;  %753 = vmatprep.mubr.msk.f32.mxu1 %vm267_vm0, %v232_v11 }
  0x59   : > { %488 = vmatmul.mubr.f32.gmra.mrb[22].mxu0 %v199_v12  ;;  %568 = vmatmul.mubr.f32.gmra.mrb[22].mxu1 %v231_v13 }
  0x5a   : > { %738 = vmatprep.mubr.msk.f32.mxu0 %vm267_vm0, %v202_v14  ;;  %754 = vmatprep.mubr.msk.f32.mxu1 %vm267_vm0, %v234_v15 }
  0x5d   : > { %493 = vmatmul.mubr.f32.gmra.mrb[24].mxu0 %v201_v16  ;;  %573 = vmatmul.mubr.f32.gmra.mrb[24].mxu1 %v233_v17 }
  0x5e   : > { %739 = vmatprep.mubr.msk.f32.mxu0 %vm267_vm0, %v204_v18  ;;  %755 = vmatprep.mubr.msk.f32.mxu1 %vm267_vm0, %v236_v19 }
  0x61   : > { %498 = vmatmul.mubr.f32.gmra.mrb[26].mxu0 %v203_v20  ;;  %578 = vmatmul.mubr.f32.gmra.mrb[26].mxu1 %v235_v21 }
  0x62   : > { %740 = vmatprep.mubr.msk.f32.mxu0 %vm267_vm0, %v206_v22  ;;  %756 = vmatprep.mubr.msk.f32.mxu1 %vm267_vm0, %v238_v23 }
  0x65   : > { %503 = vmatmul.mubr.f32.gmra.mrb[28].mxu0 %v205_v24  ;;  %583 = vmatmul.mubr.f32.gmra.mrb[28].mxu1 %v237_v25 }
  0x66   : > { %741 = vmatprep.mubr.msk.f32.mxu0 %vm267_vm0, %v208_v26  ;;  %757 = vmatprep.mubr.msk.f32.mxu1 %vm267_vm0, %v240_v27 }
  0x69   : > { %508 = vmatmul.mubr.f32.gmra.mrb[30].mxu0 %v207_v28  ;;  %588 = vmatmul.mubr.f32.gmra.mrb[30].mxu1 %v239_v29 }
 0x100   : > { %v434_v31 = vpop.f32.mrb[0].mxu0  ;;  %v514_v32 = vpop.f32.mrb[0].mxu1 }
 0x101   : > { %v435_v33 = vadd.f32 %v1038_v30, %v434_v31  ;;  %v515_v34 = vadd.f32 %v1038_v30, %v514_v32  ;;  %v436_v35 = vpop.f32.mrb[1].mxu0  ;;  %v516_v36 = vpop.f32.mrb[1].mxu1 }
 0x103   : > { %v593_v37 = vmax.f32 %v435_v33, 0.0  ;;  %v609_v38 = vmax.f32 %v515_v34, 0.0 }
 0x104   : > { %v439_v39 = vpop.f32.mrb[2].mxu0  ;;  %v519_v40 = vpop.f32.mrb[2].mxu1 }
 0x105   : > { %626 = vst.msk [vmem:[%s1046_s5] sm:$0xff] %vm625_vm2, %v593_v37  ;;  %642 = vst.msk [vmem:[%s1046_s5 + $0x80] sm:$0xff] %vm625_vm2, %v609_v38  ;;  %v440_v41 = vadd.f32 %v1038_v30, %v439_v39  ;;  %v520_v42 = vadd.f32 %v1038_v30, %v519_v40  ;;  %v441_v43 = vpop.f32.mrb[3].mxu0  ;;  %v521_v44 = vpop.f32.mrb[3].mxu1 }
 0x107   : > { %v594_v45 = vmax.f32 %v440_v41, 0.0  ;;  %v610_v46 = vmax.f32 %v520_v42, 0.0 }
 0x108   : > { %v444_v47 = vpop.f32.mrb[4].mxu0  ;;  %v524_v48 = vpop.f32.mrb[4].mxu1 }
 0x109   : > { %627 = vst.msk [vmem:[%s1046_s5 + $0x8] sm:$0xff] %vm625_vm2, %v594_v45  ;;  %643 = vst.msk [vmem:[%s1046_s5 + $0x88] sm:$0xff] %vm625_vm2, %v610_v46  ;;  %v445_v49 = vadd.f32 %v1038_v30, %v444_v47  ;;  %v525_v50 = vadd.f32 %v1038_v30, %v524_v48  ;;  %v446_v51 = vpop.f32.mrb[5].mxu0  ;;  %v526_v52 = vpop.f32.mrb[5].mxu1 }
 0x10b   : > { %v595_v53 = vmax.f32 %v445_v49, 0.0  ;;  %v611_v54 = vmax.f32 %v525_v50, 0.0 }
 0x10c   : > { %v449_v55 = vpop.f32.mrb[6].mxu0  ;;  %v529_v56 = vpop.f32.mrb[6].mxu1 }
 0x10d   : > { %628 = vst.msk [vmem:[%s1046_s5 + $0x10] sm:$0xff] %vm625_vm2, %v595_v53  ;;  %644 = vst.msk [vmem:[%s1046_s5 + $0x90] sm:$0xff] %vm625_vm2, %v611_v54  ;;  %v450_v57 = vadd.f32 %v1038_v30, %v449_v55  ;;  %v530_v58 = vadd.f32 %v1038_v30, %v529_v56  ;;  %v451_v59 = vpop.f32.mrb[7].mxu0  ;;  %v531_v60 = vpop.f32.mrb[7].mxu1 }
 0x10f   : > { %v596_v61 = vmax.f32 %v450_v57, 0.0  ;;  %v612_v62 = vmax.f32 %v530_v58, 0.0 }
 0x110   : > { %v454_v63 = vpop.f32.mrb[8].mxu0  ;;  %v534_v0 = vpop.f32.mrb[8].mxu1 }
 0x111   : > { %629 = vst.msk [vmem:[%s1046_s5 + $0x18] sm:$0xff] %vm625_vm2, %v596_v61  ;;  %645 = vst.msk [vmem:[%s1046_s5 + $0x98] sm:$0xff] %vm625_vm2, %v612_v62  ;;  %v455_v1 = vadd.f32 %v1038_v30, %v454_v63  ;;  %v535_v2 = vadd.f32 %v1038_v30, %v534_v0  ;;  %v456_v3 = vpop.f32.mrb[9].mxu0  ;;  %v536_v4 = vpop.f32.mrb[9].mxu1 }
 0x113   : > { %v597_v5 = vmax.f32 %v455_v1, 0.0  ;;  %v613_v6 = vmax.f32 %v535_v2, 0.0 }
 0x114   : > { %v459_v7 = vpop.f32.mrb[10].mxu0  ;;  %v539_v8 = vpop.f32.mrb[10].mxu1 }
 0x115   : > { %630 = vst.msk [vmem:[%s1046_s5 + $0x20] sm:$0xff] %vm625_vm2, %v597_v5  ;;  %646 = vst.msk [vmem:[%s1046_s5 + $0xa0] sm:$0xff] %vm625_vm2, %v613_v6  ;;  %v460_v9 = vadd.f32 %v1038_v30, %v459_v7  ;;  %v540_v10 = vadd.f32 %v1038_v30, %v539_v8  ;;  %v461_v11 = vpop.f32.mrb[11].mxu0  ;;  %v541_v12 = vpop.f32.mrb[11].mxu1 }
 0x117   : > { %v598_v13 = vmax.f32 %v460_v9, 0.0  ;;  %v614_v14 = vmax.f32 %v540_v10, 0.0 }
 0x118   : > { %v464_v15 = vpop.f32.mrb[12].mxu0  ;;  %v544_v16 = vpop.f32.mrb[12].mxu1 }
 0x119   : > { %631 = vst.msk [vmem:[%s1046_s5 + $0x28] sm:$0xff] %vm625_vm2, %v598_v13  ;;  %647 = vst.msk [vmem:[%s1046_s5 + $0xa8] sm:$0xff] %vm625_vm2, %v614_v14  ;;  %v465_v17 = vadd.f32 %v1038_v30, %v464_v15  ;;  %v545_v18 = vadd.f32 %v1038_v30, %v544_v16  ;;  %v466_v19 = vpop.f32.mrb[13].mxu0  ;;  %v546_v20 = vpop.f32.mrb[13].mxu1 }
 0x11b   : > { %v599_v21 = vmax.f32 %v465_v17, 0.0  ;;  %v615_v22 = vmax.f32 %v545_v18, 0.0 }
 0x11c   : > { %v469_v23 = vpop.f32.mrb[14].mxu0  ;;  %v549_v24 = vpop.f32.mrb[14].mxu1 }
 0x11d   : > { %632 = vst.msk [vmem:[%s1046_s5 + $0x30] sm:$0xff] %vm625_vm2, %v599_v21  ;;  %648 = vst.msk [vmem:[%s1046_s5 + $0xb0] sm:$0xff] %vm625_vm2, %v615_v22  ;;  %v470_v25 = vadd.f32 %v1038_v30, %v469_v23  ;;  %v550_v26 = vadd.f32 %v1038_v30, %v549_v24  ;;  %v471_v27 = vpop.f32.mrb[15].mxu0  ;;  %v551_v28 = vpop.f32.mrb[15].mxu1 }
 0x11f   : > { %v600_v29 = vmax.f32 %v470_v25, 0.0  ;;  %v616_v31 = vmax.f32 %v550_v26, 0.0 }
 0x120   : > { %v474_v32 = vpop.f32.mrb[16].mxu0  ;;  %v554_v33 = vpop.f32.mrb[16].mxu1 }
 0x121   : > { %633 = vst.msk [vmem:[%s1046_s5 + $0x38] sm:$0xff] %vm625_vm2, %v600_v29  ;;  %649 = vst.msk [vmem:[%s1046_s5 + $0xb8] sm:$0xff] %vm625_vm2, %v616_v31  ;;  %v475_v34 = vadd.f32 %v1038_v30, %v474_v32  ;;  %v555_v35 = vadd.f32 %v1038_v30, %v554_v33  ;;  %v476_v36 = vpop.f32.mrb[17].mxu0  ;;  %v556_v37 = vpop.f32.mrb[17].mxu1 }
 0x123   : > { %v601_v38 = vmax.f32 %v475_v34, 0.0  ;;  %v617_v39 = vmax.f32 %v555_v35, 0.0 }
 0x124   : > { %v479_v40 = vpop.f32.mrb[18].mxu0  ;;  %v559_v41 = vpop.f32.mrb[18].mxu1 }
 0x125   : > { %634 = vst.msk [vmem:[%s1046_s5 + $0x40] sm:$0xff] %vm625_vm2, %v601_v38  ;;  %650 = vst.msk [vmem:[%s1046_s5 + $0xc0] sm:$0xff] %vm625_vm2, %v617_v39  ;;  %v480_v42 = vadd.f32 %v1038_v30, %v479_v40  ;;  %v560_v43 = vadd.f32 %v1038_v30, %v559_v41  ;;  %v481_v44 = vpop.f32.mrb[19].mxu0  ;;  %v561_v45 = vpop.f32.mrb[19].mxu1 }
 0x127   : > { %v602_v46 = vmax.f32 %v480_v42, 0.0  ;;  %v618_v47 = vmax.f32 %v560_v43, 0.0 }
 0x128   : > { %v484_v48 = vpop.f32.mrb[20].mxu0  ;;  %v564_v49 = vpop.f32.mrb[20].mxu1 }
 0x129   : > { %635 = vst.msk [vmem:[%s1046_s5 + $0x48] sm:$0xff] %vm625_vm2, %v602_v46  ;;  %651 = vst.msk [vmem:[%s1046_s5 + $0xc8] sm:$0xff] %vm625_vm2, %v618_v47  ;;  %v485_v50 = vadd.f32 %v1038_v30, %v484_v48  ;;  %v565_v51 = vadd.f32 %v1038_v30, %v564_v49  ;;  %v486_v52 = vpop.f32.mrb[21].mxu0  ;;  %v566_v53 = vpop.f32.mrb[21].mxu1 }
 0x12b   : > { %v603_v54 = vmax.f32 %v485_v50, 0.0  ;;  %v619_v55 = vmax.f32 %v565_v51, 0.0 }
 0x12c   : > { %v489_v56 = vpop.f32.mrb[22].mxu0  ;;  %v569_v57 = vpop.f32.mrb[22].mxu1 }
 0x12d   : > { %636 = vst.msk [vmem:[%s1046_s5 + $0x50] sm:$0xff] %vm625_vm2, %v603_v54  ;;  %652 = vst.msk [vmem:[%s1046_s5 + $0xd0] sm:$0xff] %vm625_vm2, %v619_v55  ;;  %v490_v58 = vadd.f32 %v1038_v30, %v489_v56  ;;  %v570_v59 = vadd.f32 %v1038_v30, %v569_v57  ;;  %v491_v60 = vpop.f32.mrb[23].mxu0  ;;  %v571_v61 = vpop.f32.mrb[23].mxu1 }
 0x12f   : > { %v604_v62 = vmax.f32 %v490_v58, 0.0  ;;  %v620_v63 = vmax.f32 %v570_v59, 0.0 }
 0x130   : > { %v494_v0 = vpop.f32.mrb[24].mxu0  ;;  %v574_v1 = vpop.f32.mrb[24].mxu1 }
 0x131   : > { %637 = vst.msk [vmem:[%s1046_s5 + $0x58] sm:$0xff] %vm625_vm2, %v604_v62  ;;  %653 = vst.msk [vmem:[%s1046_s5 + $0xd8] sm:$0xff] %vm625_vm2, %v620_v63  ;;  %v495_v2 = vadd.f32 %v1038_v30, %v494_v0  ;;  %v575_v3 = vadd.f32 %v1038_v30, %v574_v1  ;;  %v496_v4 = vpop.f32.mrb[25].mxu0  ;;  %v576_v5 = vpop.f32.mrb[25].mxu1 }
 0x133   : > { %v605_v6 = vmax.f32 %v495_v2, 0.0  ;;  %v621_v7 = vmax.f32 %v575_v3, 0.0 }
 0x134   : > { %v499_v8 = vpop.f32.mrb[26].mxu0  ;;  %v579_v9 = vpop.f32.mrb[26].mxu1 }
 0x135   : > { %638 = vst.msk [vmem:[%s1046_s5 + $0x60] sm:$0xff] %vm625_vm2, %v605_v6  ;;  %654 = vst.msk [vmem:[%s1046_s5 + $0xe0] sm:$0xff] %vm625_vm2, %v621_v7  ;;  %v500_v10 = vadd.f32 %v1038_v30, %v499_v8  ;;  %v580_v11 = vadd.f32 %v1038_v30, %v579_v9  ;;  %v501_v12 = vpop.f32.mrb[27].mxu0  ;;  %v581_v13 = vpop.f32.mrb[27].mxu1 }
 0x137   : > { %v606_v14 = vmax.f32 %v500_v10, 0.0  ;;  %v622_v15 = vmax.f32 %v580_v11, 0.0 }
 0x138   : > { %v504_v16 = vpop.f32.mrb[28].mxu0  ;;  %v584_v17 = vpop.f32.mrb[28].mxu1 }
 0x139   : > { %639 = vst.msk [vmem:[%s1046_s5 + $0x68] sm:$0xff] %vm625_vm2, %v606_v14  ;;  %655 = vst.msk [vmem:[%s1046_s5 + $0xe8] sm:$0xff] %vm625_vm2, %v622_v15  ;;  %v505_v18 = vadd.f32 %v1038_v30, %v504_v16  ;;  %v585_v19 = vadd.f32 %v1038_v30, %v584_v17  ;;  %v506_v20 = vpop.f32.mrb[29].mxu0  ;;  %v586_v21 = vpop.f32.mrb[29].mxu1 }
 0x13b   : > { %v607_v22 = vmax.f32 %v505_v18, 0.0  ;;  %v623_v23 = vmax.f32 %v585_v19, 0.0 }
 0x13c   : > { %v509_v24 = vpop.f32.mrb[30].mxu0  ;;  %v589_v25 = vpop.f32.mrb[30].mxu1 }
 0x13d   : > { %640 = vst.msk [vmem:[%s1046_s5 + $0x70] sm:$0xff] %vm625_vm2, %v607_v22  ;;  %656 = vst.msk [vmem:[%s1046_s5 + $0xf0] sm:$0xff] %vm625_vm2, %v623_v23  ;;  %v510_v26 = vadd.f32 %v1038_v30, %v509_v24  ;;  %v590_v27 = vadd.f32 %v1038_v30, %v589_v25  ;;  %v511_v28 = vpop.f32.mrb[31].mxu0  ;;  %v591_v29 = vpop.f32.mrb[31].mxu1 }
 0x13f   : > { %v608_v31 = vmax.f32 %v510_v26, 0.0  ;;  %v624_v32 = vmax.f32 %v590_v27, 0.0 }
 0x141   : > { %641 = vst.msk [vmem:[%s1046_s5 + $0x78] sm:$0xff] %vm625_vm2, %v608_v31  ;;  %657 = vst.msk [vmem:[%s1046_s5 + $0xf8] sm:$0xff] %vm625_vm2, %v624_v32 }
 0x142 PF: > { %s13_s12 = sadd.s32 1, %s824_s12  }
 0x143   : > { %p10_p4 = scmp.ge.s32.totalorder %s13_s12, 4  }
 0x145   :  { %12 = sbr.rel (!%p10_p4) target bundleno = 1 (0x1), region = 62 }

// kernel: resnet_itta_forward.9
= control target key start
LH: loop header
LB: loop body
LE: loop exit
PB: predicated region body
PF: predicated region fallthrough
CT: control target
= control target key end

     0   :  { %vm152_vm0 = vcmask 523264   ;;  %s1095_s0 = inlined_call_operand.vmem [shape: f32[9,128,64], index: 0, kind: input, shape index: {}]   ;;  %s1096_s1 = inlined_call_operand.vmem [shape: f32[128,64], index: 1, kind: output, shape index: {}]  }
   0x1   :  { %v8_v0 = vld [vmem:[%s1095_s0] sm:$0xff]  ;;  %v9_v13 = vld [vmem:[%s1095_s0 + $0x8] sm:$0xff]  ;;  %v10_v32 = vld [vmem:[%s1095_s0 + $0x10] sm:$0xff] }
   0x2   :  { %v24_v1 = vld [vmem:[%s1095_s0 + $0x80] sm:$0xff]  ;;  %v153_v5 = vsel %vm152_vm0, %v8_v0, -inf  ;;  %v25_v14 = vld [vmem:[%s1095_s0 + $0x88] sm:$0xff]  ;;  %v170_v19 = vsel %vm152_vm0, %v9_v13, -inf  ;;  %v26_v33 = vld [vmem:[%s1095_s0 + $0x90] sm:$0xff]  ;;  %v187_v38 = vsel %vm152_vm0, %v10_v32, -inf }
   0x3   :  { %v40_v2 = vld [vmem:[%s1095_s0 + $0x100] sm:$0xff]  ;;  %v154_v6 = vsel %vm152_vm0, %v24_v1, -inf  ;;  %v41_v15 = vld [vmem:[%s1095_s0 + $0x108] sm:$0xff]  ;;  %v171_v20 = vsel %vm152_vm0, %v25_v14, -inf  ;;  %v42_v34 = vld [vmem:[%s1095_s0 + $0x110] sm:$0xff]  ;;  %v188_v39 = vsel %vm152_vm0, %v26_v33, -inf }
   0x4   :  { %v56_v3 = vld [vmem:[%s1095_s0 + $0x180] sm:$0xff]  ;;  %v156_v7 = vsel %vm152_vm0, %v40_v2, -inf  ;;  %v155_v11 = vmax.f32 %v153_v5, %v154_v6  ;;  %v57_v18 = vld [vmem:[%s1095_s0 + $0x188] sm:$0xff]  ;;  %v173_v21 = vsel %vm152_vm0, %v41_v15, -inf  ;;  %v172_v27 = vmax.f32 %v170_v19, %v171_v20  ;;  %v58_v37 = vld [vmem:[%s1095_s0 + $0x190] sm:$0xff] }
   0x5   :  { %v72_v4 = vld [vmem:[%s1095_s0 + $0x200] sm:$0xff]  ;;  %v158_v12 = vsel %vm152_vm0, %v56_v3, -inf  ;;  %v73_v24 = vld [vmem:[%s1095_s0 + $0x208] sm:$0xff]  ;;  %v175_v31 = vsel %vm152_vm0, %v57_v18, -inf  ;;  %v190_v40 = vsel %vm152_vm0, %v42_v34, -inf  ;;  %v74_v45 = vld [vmem:[%s1095_s0 + $0x210] sm:$0xff]  ;;  %v189_v46 = vmax.f32 %v187_v38, %v188_v39 }
   0x6   :  { %v88_v8 = vld [vmem:[%s1095_s0 + $0x280] sm:$0xff]  ;;  %v157_v17 = vmax.f32 %v155_v11, %v156_v7  ;;  %v160_v22 = vsel %vm152_vm0, %v72_v4, -inf  ;;  %v89_v25 = vld [vmem:[%s1095_s0 + $0x288] sm:$0xff]  ;;  %v174_v36 = vmax.f32 %v172_v27, %v173_v21  ;;  %v177_v44 = vsel %vm152_vm0, %v73_v24, -inf  ;;  %v11_v51 = vld [vmem:[%s1095_s0 + $0x18] sm:$0xff] }
   0x7   :  { %v104_v9 = vld [vmem:[%s1095_s0 + $0x300] sm:$0xff]  ;;  %v162_v23 = vsel %vm152_vm0, %v88_v8, -inf  ;;  %v105_v26 = vld [vmem:[%s1095_s0 + $0x308] sm:$0xff]  ;;  %v179_v48 = vsel %vm152_vm0, %v89_v25, -inf  ;;  %v192_v50 = vsel %vm152_vm0, %v58_v37, -inf  ;;  %v27_v52 = vld [vmem:[%s1095_s0 + $0x98] sm:$0xff]  ;;  %v191_v58 = vmax.f32 %v189_v46, %v190_v40 }
   0x8   :  { %v120_v10 = vld [vmem:[%s1095_s0 + $0x380] sm:$0xff]  ;;  %v159_v28 = vmax.f32 %v157_v17, %v158_v12  ;;  %v164_v29 = vsel %vm152_vm0, %v104_v9, -inf  ;;  %v121_v35 = vld [vmem:[%s1095_s0 + $0x388] sm:$0xff]  ;;  %v176_v47 = vmax.f32 %v174_v36, %v175_v31  ;;  %v181_v49 = vsel %vm152_vm0, %v105_v26, -inf  ;;  %v43_v53 = vld [vmem:[%s1095_s0 + $0x118] sm:$0xff] }
   0x9   :  { %v136_v16 = vld [vmem:[%s1095_s0 + $0x400] sm:$0xff]  ;;  %v166_v30 = vsel %vm152_vm0, %v120_v10, -inf  ;;  %v137_v43 = vld [vmem:[%s1095_s0 + $0x408] sm:$0xff]  ;;  %v183_v55 = vsel %vm152_vm0, %v121_v35, -inf  ;;  %v90_v56 = vld [vmem:[%s1095_s0 + $0x290] sm:$0xff]  ;;  %v204_v60 = vsel %vm152_vm0, %v11_v51, -inf  ;;  %v193_v4 = vmax.f32 %v191_v58, %v192_v50 }
   0xa   :  { %v161_v41 = vmax.f32 %v159_v28, %v160_v22  ;;  %v168_v42 = vsel %vm152_vm0, %v136_v16, -inf  ;;  %v106_v57 = vld [vmem:[%s1095_s0 + $0x310] sm:$0xff]  ;;  %v59_v59 = vld [vmem:[%s1095_s0 + $0x198] sm:$0xff]  ;;  %v178_v61 = vmax.f32 %v176_v47, %v177_v44  ;;  %v194_v62 = vsel %vm152_vm0, %v74_v45, -inf  ;;  %v12_v6 = vld [vmem:[%s1095_s0 + $0x20] sm:$0xff] }
   0xb   :  { %v75_v63 = vld [vmem:[%s1095_s0 + $0x218] sm:$0xff]  ;;  %v205_v0 = vsel %vm152_vm0, %v27_v52, -inf  ;;  %v207_v1 = vsel %vm152_vm0, %v43_v53, -inf  ;;  %v185_v3 = vsel %vm152_vm0, %v137_v43, -inf  ;;  %v28_v7 = vld [vmem:[%s1095_s0 + $0xa0] sm:$0xff]  ;;  %v196_v10 = vsel %vm152_vm0, %v90_v56, -inf }
   0xc   :  { %v163_v54 = vmax.f32 %v161_v41, %v162_v23  ;;  %v206_v5 = vmax.f32 %v204_v60, %v205_v0  ;;  %v44_v8 = vld [vmem:[%s1095_s0 + $0x120] sm:$0xff]  ;;  %v180_v9 = vmax.f32 %v178_v61, %v179_v48  ;;  %v198_v11 = vsel %vm152_vm0, %v106_v57, -inf  ;;  %v122_v14 = vld [vmem:[%s1095_s0 + $0x390] sm:$0xff]  ;;  %v91_v16 = vld [vmem:[%s1095_s0 + $0x298] sm:$0xff] }
   0xd   :  { %v209_v12 = vsel %vm152_vm0, %v59_v59, -inf  ;;  %v195_v15 = vmax.f32 %v193_v4, %v194_v62  ;;  %v211_v18 = vsel %vm152_vm0, %v75_v63, -inf  ;;  %v60_v19 = vld [vmem:[%s1095_s0 + $0x1a0] sm:$0xff]  ;;  %v138_v21 = vld [vmem:[%s1095_s0 + $0x410] sm:$0xff]  ;;  %v221_v22 = vsel %vm152_vm0, %v12_v6, -inf  ;;  %v107_v27 = vld [vmem:[%s1095_s0 + $0x318] sm:$0xff] }
   0xe   :  { %v165_v2 = vmax.f32 %v163_v54, %v164_v29  ;;  %v208_v17 = vmax.f32 %v206_v5, %v207_v1  ;;  %v182_v20 = vmax.f32 %v180_v9, %v181_v49  ;;  %v222_v23 = vsel %vm152_vm0, %v28_v7, -inf  ;;  %v76_v29 = vld [vmem:[%s1095_s0 + $0x220] sm:$0xff]  ;;  %v13_v31 = vld [vmem:[%s1095_s0 + $0x28] sm:$0xff]  ;;  %v123_v39 = vld [vmem:[%s1095_s0 + $0x398] sm:$0xff] }
   0xf   :  { %v224_v24 = vsel %vm152_vm0, %v44_v8, -inf  ;;  %v197_v26 = vmax.f32 %v195_v15, %v196_v10  ;;  %v200_v33 = vsel %vm152_vm0, %v122_v14, -inf  ;;  %v213_v34 = vsel %vm152_vm0, %v91_v16, -inf  ;;  %v29_v36 = vld [vmem:[%s1095_s0 + $0xa8] sm:$0xff]  ;;  %v92_v41 = vld [vmem:[%s1095_s0 + $0x2a0] sm:$0xff]  ;;  %v139_v50 = vld [vmem:[%s1095_s0 + $0x418] sm:$0xff] }
  0x10   :  { %v167_v13 = vmax.f32 %v165_v2, %v166_v30  ;;  %v210_v28 = vmax.f32 %v208_v17, %v209_v12  ;;  %v223_v30 = vmax.f32 %v221_v22, %v222_v23  ;;  %v184_v32 = vmax.f32 %v182_v20, %v183_v55  ;;  %v45_v43 = vld [vmem:[%s1095_s0 + $0x128] sm:$0xff]  ;;  %v108_v52 = vld [vmem:[%s1095_s0 + $0x320] sm:$0xff]  ;;  %v14_v60 = vld [vmem:[%s1095_s0 + $0x30] sm:$0xff] }
  0x11   :  { %v226_v35 = vsel %vm152_vm0, %v60_v19, -inf  ;;  %v199_v37 = vmax.f32 %v197_v26, %v198_v11  ;;  %v202_v38 = vsel %vm152_vm0, %v138_v21, -inf  ;;  %v215_v45 = vsel %vm152_vm0, %v107_v27, -inf  ;;  %v61_v47 = vld [vmem:[%s1095_s0 + $0x1a8] sm:$0xff]  ;;  %v30_v61 = vld [vmem:[%s1095_s0 + $0xb0] sm:$0xff]  ;;  %v124_v0 = vld [vmem:[%s1095_s0 + $0x3a0] sm:$0xff] }
  0x12   :  { %v169_v25 = vmax.f32 %v167_v13, %v168_v42  ;;  %v212_v40 = vmax.f32 %v210_v28, %v211_v18  ;;  %v225_v42 = vmax.f32 %v223_v30, %v224_v24  ;;  %v186_v44 = vmax.f32 %v184_v32, %v185_v3  ;;  %v77_v54 = vld [vmem:[%s1095_s0 + $0x228] sm:$0xff]  ;;  %v46_v3 = vld [vmem:[%s1095_s0 + $0x130] sm:$0xff]  ;;  %v140_v11 = vld [vmem:[%s1095_s0 + $0x420] sm:$0xff] }
  0x13   :  { %v228_v46 = vsel %vm152_vm0, %v76_v29, -inf  ;;  %v238_v48 = vsel %vm152_vm0, %v13_v31, -inf  ;;  %v201_v49 = vmax.f32 %v199_v37, %v200_v33  ;;  %v239_v55 = vsel %vm152_vm0, %v29_v36, -inf  ;;  %v93_v6 = vld [vmem:[%s1095_s0 + $0x2a8] sm:$0xff]  ;;  %v62_v9 = vld [vmem:[%s1095_s0 + $0x1b0] sm:$0xff]  ;;  %v15_v21 = vld [vmem:[%s1095_s0 + $0x38] sm:$0xff] }
  0x14   :  { %425 = vst.msk [vmem:[%s1096_s1] sm:$0xff] %vm152_vm0, %v169_v25  ;;  %v214_v51 = vmax.f32 %v212_v40, %v213_v34  ;;  %v227_v53 = vmax.f32 %v225_v42, %v226_v35  ;;  %426 = vst.msk [vmem:[%s1096_s1 + $0x8] sm:$0xff] %vm152_vm0, %v186_v44  ;;  %v217_v56 = vsel %vm152_vm0, %v123_v39, -inf  ;;  %v230_v57 = vsel %vm152_vm0, %v92_v41, -inf  ;;  %v109_v13 = vld [vmem:[%s1095_s0 + $0x328] sm:$0xff]  ;;  %v78_v18 = vld [vmem:[%s1095_s0 + $0x230] sm:$0xff] }
  0x15   :  { %v240_v58 = vmax.f32 %v238_v48, %v239_v55  ;;  %v241_v59 = vsel %vm152_vm0, %v45_v43, -inf  ;;  %v203_v62 = vmax.f32 %v201_v49, %v202_v38  ;;  %v243_v2 = vsel %vm152_vm0, %v61_v47, -inf  ;;  %v31_v22 = vld [vmem:[%s1095_s0 + $0xb8] sm:$0xff]  ;;  %v125_v29 = vld [vmem:[%s1095_s0 + $0x3a8] sm:$0xff]  ;;  %v94_v32 = vld [vmem:[%s1095_s0 + $0x2b0] sm:$0xff] }
  0x16   :  { %v216_v63 = vmax.f32 %v214_v51, %v215_v45  ;;  %v229_v1 = vmax.f32 %v227_v53, %v228_v46  ;;  %v219_v4 = vsel %vm152_vm0, %v139_v50, -inf  ;;  %v232_v5 = vsel %vm152_vm0, %v108_v52, -inf  ;;  %v47_v27 = vld [vmem:[%s1095_s0 + $0x138] sm:$0xff]  ;;  %v141_v36 = vld [vmem:[%s1095_s0 + $0x428] sm:$0xff]  ;;  %v110_v37 = vld [vmem:[%s1095_s0 + $0x330] sm:$0xff] }
  0x17   :  { %v242_v7 = vmax.f32 %v240_v58, %v241_v59  ;;  %v245_v8 = vsel %vm152_vm0, %v77_v54, -inf  ;;  %427 = vst.msk [vmem:[%s1096_s1 + $0x10] sm:$0xff] %vm152_vm0, %v203_v62  ;;  %v255_v14 = vsel %vm152_vm0, %v14_v60, -inf  ;;  %v256_v15 = vsel %vm152_vm0, %v30_v61, -inf  ;;  %v63_v34 = vld [vmem:[%s1095_s0 + $0x1b8] sm:$0xff]  ;;  %v16_v46 = vld [vmem:[%s1095_s0 + $0x40] sm:$0xff] }
  0x18   :  { %v218_v10 = vmax.f32 %v216_v63, %v217_v56  ;;  %v231_v12 = vmax.f32 %v229_v1, %v230_v57  ;;  %v234_v16 = vsel %vm152_vm0, %v124_v0, -inf  ;;  %v257_v19 = vmax.f32 %v255_v14, %v256_v15  ;;  %v79_v43 = vld [vmem:[%s1095_s0 + $0x238] sm:$0xff]  ;;  %v32_v47 = vld [vmem:[%s1095_s0 + $0xc0] sm:$0xff]  ;;  %v126_v50 = vld [vmem:[%s1095_s0 + $0x3b0] sm:$0xff] }
  0x19   :  { %v244_v17 = vmax.f32 %v242_v7, %v243_v2  ;;  %v258_v20 = vsel %vm152_vm0, %v46_v3, -inf  ;;  %v247_v25 = vsel %vm152_vm0, %v93_v6, -inf  ;;  %v260_v26 = vsel %vm152_vm0, %v62_v9, -inf  ;;  %v95_v56 = vld [vmem:[%s1095_s0 + $0x2b8] sm:$0xff]  ;;  %v48_v58 = vld [vmem:[%s1095_s0 + $0x140] sm:$0xff]  ;;  %v142_v60 = vld [vmem:[%s1095_s0 + $0x430] sm:$0xff] }
  0x1a   :  { %v220_v23 = vmax.f32 %v218_v10, %v219_v4  ;;  %v233_v24 = vmax.f32 %v231_v12, %v232_v5  ;;  %v236_v28 = vsel %vm152_vm0, %v140_v11, -inf  ;;  %v249_v31 = vsel %vm152_vm0, %v109_v13, -inf  ;;  %v64_v59 = vld [vmem:[%s1095_s0 + $0x1c0] sm:$0xff]  ;;  %v111_v3 = vld [vmem:[%s1095_s0 + $0x338] sm:$0xff]  ;;  %v17_v7 = vld [vmem:[%s1095_s0 + $0x48] sm:$0xff] }
  0x1b   :  { %v246_v30 = vmax.f32 %v244_v17, %v245_v8  ;;  %v259_v33 = vmax.f32 %v257_v19, %v258_v20  ;;  %v262_v38 = vsel %vm152_vm0, %v78_v18, -inf  ;;  %v272_v39 = vsel %vm152_vm0, %v15_v21, -inf  ;;  %v80_v5 = vld [vmem:[%s1095_s0 + $0x240] sm:$0xff]  ;;  %v33_v12 = vld [vmem:[%s1095_s0 + $0xc8] sm:$0xff]  ;;  %v127_v15 = vld [vmem:[%s1095_s0 + $0x3b8] sm:$0xff] }
  0x1c   :  { %428 = vst.msk [vmem:[%s1096_s1 + $0x18] sm:$0xff] %vm152_vm0, %v220_v23  ;;  %v235_v35 = vmax.f32 %v233_v24, %v234_v16  ;;  %v273_v40 = vsel %vm152_vm0, %v31_v22, -inf  ;;  %v275_v45 = vsel %vm152_vm0, %v47_v27, -inf  ;;  %v251_v49 = vsel %vm152_vm0, %v125_v29, -inf  ;;  %v96_v17 = vld [vmem:[%s1095_s0 + $0x2c0] sm:$0xff]  ;;  %v49_v19 = vld [vmem:[%s1095_s0 + $0x148] sm:$0xff] }
  0x1d   :  { %v248_v41 = vmax.f32 %v246_v30, %v247_v25  ;;  %v261_v42 = vmax.f32 %v259_v33, %v260_v26  ;;  %v274_v44 = vmax.f32 %v272_v39, %v273_v40  ;;  %v264_v51 = vsel %vm152_vm0, %v94_v32, -inf  ;;  %v65_v23 = vld [vmem:[%s1095_s0 + $0x1c8] sm:$0xff]  ;;  %v143_v26 = vld [vmem:[%s1095_s0 + $0x438] sm:$0xff]  ;;  %v128_v40 = vld [vmem:[%s1095_s0 + $0x3c0] sm:$0xff] }
  0x1e   :  { %v237_v48 = vmax.f32 %v235_v35, %v236_v28  ;;  %v277_v52 = vsel %vm152_vm0, %v63_v34, -inf  ;;  %v253_v54 = vsel %vm152_vm0, %v141_v36, -inf  ;;  %v266_v61 = vsel %vm152_vm0, %v110_v37, -inf  ;;  %v112_v28 = vld [vmem:[%s1095_s0 + $0x340] sm:$0xff]  ;;  %v81_v30 = vld [vmem:[%s1095_s0 + $0x248] sm:$0xff]  ;;  %v18_v36 = vld [vmem:[%s1095_s0 + $0x50] sm:$0xff] }
  0x1f   :  { %v250_v53 = vmax.f32 %v248_v41, %v249_v31  ;;  %v263_v55 = vmax.f32 %v261_v42, %v262_v38  ;;  %v276_v57 = vmax.f32 %v274_v44, %v275_v45  ;;  %v279_v62 = vsel %vm152_vm0, %v79_v43, -inf  ;;  %v34_v37 = vld [vmem:[%s1095_s0 + $0xd0] sm:$0xff] }
  0x20   :  { %429 = vst.msk [vmem:[%s1096_s1 + $0x20] sm:$0xff] %vm152_vm0, %v237_v48  ;;  %v289_v63 = vsel %vm152_vm0, %v16_v46, -inf  ;;  %v290_v0 = vsel %vm152_vm0, %v32_v47, -inf  ;;  %v268_v8 = vsel %vm152_vm0, %v126_v50, -inf  ;;  %v281_v9 = vsel %vm152_vm0, %v95_v56, -inf  ;;  %v50_v43 = vld [vmem:[%s1095_s0 + $0x150] sm:$0xff] }
  0x21   :  { %v252_v1 = vmax.f32 %v250_v53, %v251_v49  ;;  %v265_v2 = vmax.f32 %v263_v55, %v264_v51  ;;  %v278_v4 = vmax.f32 %v276_v57, %v277_v52  ;;  %v291_v6 = vmax.f32 %v289_v63, %v290_v0  ;;  %v97_v46 = vld [vmem:[%s1095_s0 + $0x2c8] sm:$0xff]  ;;  %v66_v49 = vld [vmem:[%s1095_s0 + $0x1d0] sm:$0xff]  ;;  %v144_v51 = vld [vmem:[%s1095_s0 + $0x440] sm:$0xff] }
  0x22   :  { %v292_v10 = vsel %vm152_vm0, %v48_v58, -inf  ;;  %v294_v11 = vsel %vm152_vm0, %v64_v59, -inf  ;;  %v270_v20 = vsel %vm152_vm0, %v142_v60, -inf  ;;  %v283_v21 = vsel %vm152_vm0, %v111_v3, -inf  ;;  %v113_v53 = vld [vmem:[%s1095_s0 + $0x348] sm:$0xff]  ;;  %v82_v58 = vld [vmem:[%s1095_s0 + $0x250] sm:$0xff] }
  0x23   :  { %v254_v13 = vmax.f32 %v252_v1, %v253_v54  ;;  %v267_v14 = vmax.f32 %v265_v2, %v266_v61  ;;  %v280_v16 = vmax.f32 %v278_v4, %v279_v62  ;;  %v293_v18 = vmax.f32 %v291_v6, %v292_v10  ;;  %v19_v61 = vld [vmem:[%s1095_s0 + $0x58] sm:$0xff] }
  0x24   :  { %v296_v22 = vsel %vm152_vm0, %v80_v5, -inf  ;;  %v306_v24 = vsel %vm152_vm0, %v17_v7, -inf  ;;  %v307_v31 = vsel %vm152_vm0, %v33_v12, -inf  ;;  %v285_v32 = vsel %vm152_vm0, %v127_v15, -inf  ;;  %v35_v62 = vld [vmem:[%s1095_s0 + $0xd8] sm:$0xff]  ;;  %v129_v5 = vld [vmem:[%s1095_s0 + $0x3c8] sm:$0xff] }
  0x25   :  { %430 = vst.msk [vmem:[%s1096_s1 + $0x28] sm:$0xff] %vm152_vm0, %v254_v13  ;;  %v269_v25 = vmax.f32 %v267_v14, %v268_v8  ;;  %v282_v27 = vmax.f32 %v280_v16, %v281_v9  ;;  %v295_v29 = vmax.f32 %v293_v18, %v294_v11  ;;  %v298_v33 = vsel %vm152_vm0, %v96_v17, -inf  ;;  %v51_v3 = vld [vmem:[%s1095_s0 + $0x158] sm:$0xff]  ;;  %v98_v8 = vld [vmem:[%s1095_s0 + $0x2d0] sm:$0xff]  ;;  %v145_v12 = vld [vmem:[%s1095_s0 + $0x448] sm:$0xff] }
  0x26   :  { %v308_v34 = vmax.f32 %v306_v24, %v307_v31  ;;  %v309_v35 = vsel %vm152_vm0, %v49_v19, -inf  ;;  %v311_v42 = vsel %vm152_vm0, %v65_v23, -inf  ;;  %v287_v44 = vsel %vm152_vm0, %v143_v26, -inf  ;;  %v67_v10 = vld [vmem:[%s1095_s0 + $0x1d8] sm:$0xff]  ;;  %v114_v13 = vld [vmem:[%s1095_s0 + $0x350] sm:$0xff]  ;;  %v36_v23 = vld [vmem:[%s1095_s0 + $0xe0] sm:$0xff] }
  0x27   :  { %v271_v38 = vmax.f32 %v269_v25, %v270_v20  ;;  %v284_v39 = vmax.f32 %v282_v27, %v283_v21  ;;  %v297_v41 = vmax.f32 %v295_v29, %v296_v22  ;;  %v300_v45 = vsel %vm152_vm0, %v112_v28, -inf  ;;  %v83_v19 = vld [vmem:[%s1095_s0 + $0x258] sm:$0xff]  ;;  %v20_v22 = vld [vmem:[%s1095_s0 + $0x60] sm:$0xff]  ;;  %v130_v26 = vld [vmem:[%s1095_s0 + $0x3d0] sm:$0xff] }
  0x28   :  { %v310_v47 = vmax.f32 %v308_v34, %v309_v35  ;;  %v313_v48 = vsel %vm152_vm0, %v81_v30, -inf  ;;  %v323_v54 = vsel %vm152_vm0, %v18_v36, -inf  ;;  %v324_v55 = vsel %vm152_vm0, %v34_v37, -inf  ;;  %v52_v34 = vld [vmem:[%s1095_s0 + $0x160] sm:$0xff]  ;;  %v146_v36 = vld [vmem:[%s1095_s0 + $0x450] sm:$0xff] }
  0x29   :  { %431 = vst.msk [vmem:[%s1096_s1 + $0x30] sm:$0xff] %vm152_vm0, %v271_v38  ;;  %v286_v50 = vmax.f32 %v284_v39, %v285_v32  ;;  %v299_v52 = vmax.f32 %v297_v41, %v298_v33  ;;  %v302_v56 = vsel %vm152_vm0, %v128_v40, -inf  ;;  %v325_v59 = vmax.f32 %v323_v54, %v324_v55  ;;  %v99_v32 = vld [vmem:[%s1095_s0 + $0x2d8] sm:$0xff]  ;;  %v68_v35 = vld [vmem:[%s1095_s0 + $0x1e0] sm:$0xff] }
  0x2a   :  { %v312_v57 = vmax.f32 %v310_v47, %v311_v42  ;;  %v326_v60 = vsel %vm152_vm0, %v50_v43, -inf  ;;  %v315_v1 = vsel %vm152_vm0, %v97_v46, -inf  ;;  %v328_v2 = vsel %vm152_vm0, %v66_v49, -inf  ;;  %v115_v43 = vld [vmem:[%s1095_s0 + $0x358] sm:$0xff]  ;;  %v21_v47 = vld [vmem:[%s1095_s0 + $0x68] sm:$0xff] }
  0x2b   :  { %v288_v63 = vmax.f32 %v286_v50, %v287_v44  ;;  %v301_v0 = vmax.f32 %v299_v52, %v300_v45  ;;  %v304_v4 = vsel %vm152_vm0, %v144_v51, -inf  ;;  %v317_v7 = vsel %vm152_vm0, %v113_v53, -inf  ;;  %v84_v45 = vld [vmem:[%s1095_s0 + $0x260] sm:$0xff]  ;;  %v37_v52 = vld [vmem:[%s1095_s0 + $0xe8] sm:$0xff]  ;;  %v131_v55 = vld [vmem:[%s1095_s0 + $0x3d8] sm:$0xff] }
  0x2c   :  { %v314_v6 = vmax.f32 %v312_v57, %v313_v48  ;;  %v327_v9 = vmax.f32 %v325_v59, %v326_v60  ;;  %v330_v14 = vsel %vm152_vm0, %v82_v58, -inf  ;;  %v340_v15 = vsel %vm152_vm0, %v19_v61, -inf  ;;  %v100_v57 = vld [vmem:[%s1095_s0 + $0x2e0] sm:$0xff]  ;;  %v53_v59 = vld [vmem:[%s1095_s0 + $0x168] sm:$0xff] }
  0x2d   :  { %432 = vst.msk [vmem:[%s1096_s1 + $0x38] sm:$0xff] %vm152_vm0, %v288_v63  ;;  %v303_v11 = vmax.f32 %v301_v0, %v302_v56  ;;  %v341_v16 = vsel %vm152_vm0, %v35_v62, -inf  ;;  %v343_v21 = vsel %vm152_vm0, %v51_v3, -inf  ;;  %v319_v25 = vsel %vm152_vm0, %v129_v5, -inf  ;;  %v69_v63 = vld [vmem:[%s1095_s0 + $0x1e8] sm:$0xff] }
  0x2e   :  { %v316_v17 = vmax.f32 %v314_v6, %v315_v1  ;;  %v329_v18 = vmax.f32 %v327_v9, %v328_v2  ;;  %v342_v20 = vmax.f32 %v340_v15, %v341_v16  ;;  %v332_v27 = vsel %vm152_vm0, %v98_v8, -inf  ;;  %v147_v2 = vld [vmem:[%s1095_s0 + $0x458] sm:$0xff]  ;;  %v85_v6 = vld [vmem:[%s1095_s0 + $0x268] sm:$0xff]  ;;  %v132_v16 = vld [vmem:[%s1095_s0 + $0x3e0] sm:$0xff] }
  0x2f   :  { %v305_v24 = vmax.f32 %v303_v11, %v304_v4  ;;  %v345_v28 = vsel %vm152_vm0, %v67_v10, -inf  ;;  %v321_v30 = vsel %vm152_vm0, %v145_v12, -inf  ;;  %v334_v37 = vsel %vm152_vm0, %v114_v13, -inf  ;;  %v116_v4 = vld [vmem:[%s1095_s0 + $0x360] sm:$0xff]  ;;  %v22_v12 = vld [vmem:[%s1095_s0 + $0x70] sm:$0xff] }
  0x30   :  { %v318_v29 = vmax.f32 %v316_v17, %v317_v7  ;;  %v331_v31 = vmax.f32 %v329_v18, %v330_v14  ;;  %v344_v33 = vmax.f32 %v342_v20, %v343_v21  ;;  %v347_v38 = vsel %vm152_vm0, %v83_v19, -inf  ;;  %v38_v13 = vld [vmem:[%s1095_s0 + $0xf0] sm:$0xff] }
  0x31   :  { %433 = vst.msk [vmem:[%s1096_s1 + $0x40] sm:$0xff] %vm152_vm0, %v305_v24  ;;  %v357_v39 = vsel %vm152_vm0, %v20_v22, -inf  ;;  %v358_v40 = vsel %vm152_vm0, %v36_v23, -inf  ;;  %v336_v48 = vsel %vm152_vm0, %v130_v26, -inf  ;;  %v349_v49 = vsel %vm152_vm0, %v99_v32, -inf  ;;  %v54_v19 = vld [vmem:[%s1095_s0 + $0x170] sm:$0xff] }
  0x32   :  { %v320_v41 = vmax.f32 %v318_v29, %v319_v25  ;;  %v333_v42 = vmax.f32 %v331_v31, %v332_v27  ;;  %v346_v44 = vmax.f32 %v344_v33, %v345_v28  ;;  %v359_v46 = vmax.f32 %v357_v39, %v358_v40  ;;  %v101_v22 = vld [vmem:[%s1095_s0 + $0x2e8] sm:$0xff]  ;;  %v70_v25 = vld [vmem:[%s1095_s0 + $0x1f0] sm:$0xff]  ;;  %v148_v27 = vld [vmem:[%s1095_s0 + $0x460] sm:$0xff] }
  0x33   :  { %v360_v50 = vsel %vm152_vm0, %v52_v34, -inf  ;;  %v362_v51 = vsel %vm152_vm0, %v68_v35, -inf  ;;  %v338_v60 = vsel %vm152_vm0, %v146_v36, -inf  ;;  %v351_v61 = vsel %vm152_vm0, %v115_v43, -inf  ;;  %v117_v29 = vld [vmem:[%s1095_s0 + $0x368] sm:$0xff]  ;;  %v86_v34 = vld [vmem:[%s1095_s0 + $0x270] sm:$0xff] }
  0x34   :  { %v322_v53 = vmax.f32 %v320_v41, %v321_v30  ;;  %v335_v54 = vmax.f32 %v333_v42, %v334_v37  ;;  %v348_v56 = vmax.f32 %v346_v44, %v347_v38  ;;  %v361_v58 = vmax.f32 %v359_v46, %v360_v50  ;;  %v23_v37 = vld [vmem:[%s1095_s0 + $0x78] sm:$0xff] }
  0x35   :  { %v364_v62 = vsel %vm152_vm0, %v84_v45, -inf  ;;  %v374_v0 = vsel %vm152_vm0, %v21_v47, -inf  ;;  %v375_v7 = vsel %vm152_vm0, %v37_v52, -inf  ;;  %v353_v8 = vsel %vm152_vm0, %v131_v55, -inf  ;;  %v39_v38 = vld [vmem:[%s1095_s0 + $0xf8] sm:$0xff]  ;;  %v133_v45 = vld [vmem:[%s1095_s0 + $0x3e8] sm:$0xff] }
  0x36   :  { %434 = vst.msk [vmem:[%s1096_s1 + $0x48] sm:$0xff] %vm152_vm0, %v322_v53  ;;  %v337_v1 = vmax.f32 %v335_v54, %v336_v48  ;;  %v350_v3 = vmax.f32 %v348_v56, %v349_v49  ;;  %v363_v5 = vmax.f32 %v361_v58, %v362_v51  ;;  %v366_v9 = vsel %vm152_vm0, %v100_v57, -inf  ;;  %v55_v43 = vld [vmem:[%s1095_s0 + $0x178] sm:$0xff]  ;;  %v102_v48 = vld [vmem:[%s1095_s0 + $0x2f0] sm:$0xff]  ;;  %v149_v55 = vld [vmem:[%s1095_s0 + $0x468] sm:$0xff] }
  0x37   :  { %v376_v10 = vmax.f32 %v374_v0, %v375_v7  ;;  %v377_v11 = vsel %vm152_vm0, %v53_v59, -inf  ;;  %v379_v18 = vsel %vm152_vm0, %v69_v63, -inf  ;;  %v355_v20 = vsel %vm152_vm0, %v147_v2, -inf  ;;  %v71_v50 = vld [vmem:[%s1095_s0 + $0x1f8] sm:$0xff]  ;;  %v118_v57 = vld [vmem:[%s1095_s0 + $0x370] sm:$0xff] }
  0x38   :  { %v339_v14 = vmax.f32 %v337_v1, %v338_v60  ;;  %v352_v15 = vmax.f32 %v350_v3, %v351_v61  ;;  %v365_v17 = vmax.f32 %v363_v5, %v364_v62  ;;  %v368_v21 = vsel %vm152_vm0, %v116_v4, -inf  ;;  %v87_v59 = vld [vmem:[%s1095_s0 + $0x278] sm:$0xff]  ;;  %v134_v3 = vld [vmem:[%s1095_s0 + $0x3f0] sm:$0xff] }
  0x39   :  { %v378_v23 = vmax.f32 %v376_v10, %v377_v11  ;;  %v381_v24 = vsel %vm152_vm0, %v85_v6, -inf  ;;  %v391_v30 = vsel %vm152_vm0, %v22_v12, -inf  ;;  %v392_v31 = vsel %vm152_vm0, %v38_v13, -inf  ;;  %v103_v5 = vld [vmem:[%s1095_s0 + $0x2f8] sm:$0xff]  ;;  %v150_v11 = vld [vmem:[%s1095_s0 + $0x470] sm:$0xff] }
  0x3a   :  { %435 = vst.msk [vmem:[%s1096_s1 + $0x50] sm:$0xff] %vm152_vm0, %v339_v14  ;;  %v354_v26 = vmax.f32 %v352_v15, %v353_v8  ;;  %v367_v28 = vmax.f32 %v365_v17, %v366_v9  ;;  %v370_v32 = vsel %vm152_vm0, %v132_v16, -inf  ;;  %v393_v35 = vmax.f32 %v391_v30, %v392_v31  ;;  %v119_v13 = vld [vmem:[%s1095_s0 + $0x378] sm:$0xff] }
  0x3b   :  { %v380_v33 = vmax.f32 %v378_v23, %v379_v18  ;;  %v394_v36 = vsel %vm152_vm0, %v54_v19, -inf  ;;  %v383_v41 = vsel %vm152_vm0, %v101_v22, -inf  ;;  %v396_v42 = vsel %vm152_vm0, %v70_v25, -inf  ;;  %v135_v19 = vld [vmem:[%s1095_s0 + $0x3f8] sm:$0xff] }
  0x3c   :  { %v356_v39 = vmax.f32 %v354_v26, %v355_v20  ;;  %v369_v40 = vmax.f32 %v367_v28, %v368_v21  ;;  %v372_v44 = vsel %vm152_vm0, %v148_v27, -inf  ;;  %v385_v47 = vsel %vm152_vm0, %v117_v29, -inf }
  0x3d   :  { %v382_v46 = vmax.f32 %v380_v33, %v381_v24  ;;  %v395_v49 = vmax.f32 %v393_v35, %v394_v36  ;;  %v398_v52 = vsel %vm152_vm0, %v86_v34, -inf  ;;  %v408_v53 = vsel %vm152_vm0, %v23_v37, -inf  ;;  %v151_v24 = vld [vmem:[%s1095_s0 + $0x478] sm:$0xff] }
  0x3e   :  { %436 = vst.msk [vmem:[%s1096_s1 + $0x58] sm:$0xff] %vm152_vm0, %v356_v39  ;;  %v371_v51 = vmax.f32 %v369_v40, %v370_v32  ;;  %v409_v54 = vsel %vm152_vm0, %v39_v38, -inf  ;;  %v411_v61 = vsel %vm152_vm0, %v55_v43, -inf  ;;  %v387_v63 = vsel %vm152_vm0, %v133_v45, -inf }
  0x3f   :  { %v384_v56 = vmax.f32 %v382_v46, %v383_v41  ;;  %v397_v58 = vmax.f32 %v395_v49, %v396_v42  ;;  %v410_v60 = vmax.f32 %v408_v53, %v409_v54  ;;  %v400_v0 = vsel %vm152_vm0, %v102_v48, -inf }
  0x40   :  { %v373_v62 = vmax.f32 %v371_v51, %v372_v44  ;;  %v413_v1 = vsel %vm152_vm0, %v71_v50, -inf  ;;  %v389_v7 = vsel %vm152_vm0, %v149_v55, -inf  ;;  %v402_v8 = vsel %vm152_vm0, %v118_v57, -inf }
  0x41   :  { %v386_v2 = vmax.f32 %v384_v56, %v385_v47  ;;  %v399_v4 = vmax.f32 %v397_v58, %v398_v52  ;;  %v412_v6 = vmax.f32 %v410_v60, %v411_v61  ;;  %v415_v9 = vsel %vm152_vm0, %v87_v59, -inf }
  0x42   :  { %437 = vst.msk [vmem:[%s1096_s1 + $0x60] sm:$0xff] %vm152_vm0, %v373_v62  ;;  %v404_v15 = vsel %vm152_vm0, %v134_v3, -inf  ;;  %v417_v16 = vsel %vm152_vm0, %v103_v5, -inf  ;;  %v406_v21 = vsel %vm152_vm0, %v150_v11, -inf  ;;  %v419_v22 = vsel %vm152_vm0, %v119_v13, -inf }
  0x43   :  { %v388_v10 = vmax.f32 %v386_v2, %v387_v63  ;;  %v401_v12 = vmax.f32 %v399_v4, %v400_v0  ;;  %v414_v14 = vmax.f32 %v412_v6, %v413_v1  ;;  %v421_v26 = vsel %vm152_vm0, %v135_v19, -inf }
  0x44   :  { %v423_v29 = vsel %vm152_vm0, %v151_v24, -inf }
  0x45   :  { %v390_v17 = vmax.f32 %v388_v10, %v389_v7  ;;  %v403_v18 = vmax.f32 %v401_v12, %v402_v8  ;;  %v416_v20 = vmax.f32 %v414_v14, %v415_v9 }
  0x47   :  { %438 = vst.msk [vmem:[%s1096_s1 + $0x68] sm:$0xff] %vm152_vm0, %v390_v17  ;;  %v405_v23 = vmax.f32 %v403_v18, %v404_v15  ;;  %v418_v25 = vmax.f32 %v416_v20, %v417_v16 }
  0x49   :  { %v407_v27 = vmax.f32 %v405_v23, %v406_v21  ;;  %v420_v28 = vmax.f32 %v418_v25, %v419_v22 }
  0x4b   :  { %439 = vst.msk [vmem:[%s1096_s1 + $0x70] sm:$0xff] %vm152_vm0, %v407_v27  ;;  %v422_v30 = vmax.f32 %v420_v28, %v421_v26 }
  0x4d   :  { %v424_v31 = vmax.f32 %v422_v30, %v423_v29 }
  0x4f   :  { %440 = vst.msk [vmem:[%s1096_s1 + $0x78] sm:$0xff] %vm152_vm0, %v424_v31 }

// kernel: resnet_itta_forward.10
= control target key start
LH: loop header
LB: loop body
LE: loop exit
PB: predicated region body
PF: predicated region fallthrough
CT: control target
= control target key end

     0   :  { %vm173_vm0 = vcmask 523264   ;;  %s1623_s1 = inlined_call_operand.vmem [shape: f32[576,64], index: 1, kind: input, shape index: {}]   ;;  %s1624_s0 = inlined_call_operand.vmem [shape: f32[128,576], index: 0, kind: input, shape index: {}]   ;;  %s1625_s2 = inlined_call_operand.vmem [shape: f32[1,64], index: 2, kind: input, shape index: {}]   ;;  %s1626_s3 = inlined_call_operand.vmem [shape: f32[128,64], index: 3, kind: output, shape index: {}]  }
   0x1   :  { %v110_v0 = vld [vmem:[%s1623_s1 + $0x80] sm:$0xff]  ;;  %v111_v1 = vld [vmem:[%s1623_s1 + $0x88] sm:$0xff]  ;;  %v112_v11 = vld [vmem:[%s1623_s1 + $0x90] sm:$0xff] }
   0x2   :  { %v142_v2 = vld [vmem:[%s1623_s1 + $0x180] sm:$0xff]  ;;  %v934_v3 = vpack.c.bf16 %v111_v1, %v110_v0  ;;  %v143_v4 = vld [vmem:[%s1623_s1 + $0x188] sm:$0xff]  ;;  %v113_v13 = vld [vmem:[%s1623_s1 + $0x98] sm:$0xff] }
   0x3   :  { %v94_v5 = vld [vmem:[%s1623_s1] sm:$0xff]  ;;  %v95_v6 = vld [vmem:[%s1623_s1 + $0x8] sm:$0xff]  ;;  %v966_v7 = vpack.c.bf16 %v143_v4, %v142_v2  ;;  %v144_v14 = vld [vmem:[%s1623_s1 + $0x190] sm:$0xff]  ;;  %v938_v16 = vpack.c.bf16 %v113_v13, %v112_v11 }
   0x4   :  { %v936_v8 = vpack.c.bf16 %v95_v6, %v94_v5  ;;  %v126_v9 = vld [vmem:[%s1623_s1 + $0x100] sm:$0xff]  ;;  %v127_v10 = vld [vmem:[%s1623_s1 + $0x108] sm:$0xff]  ;;  %935 = vmatprep.subr.bf16.mxu0 %v934_v3  ;;  %v145_v15 = vld [vmem:[%s1623_s1 + $0x198] sm:$0xff] }
   0x5   :  { %v968_v12 = vpack.c.bf16 %v127_v10, %v126_v9  ;;  %967 = vmatprep.subr.bf16.mxu1 %v966_v7  ;;  %v970_v17 = vpack.c.bf16 %v145_v15, %v144_v14  ;;  %v96_v18 = vld [vmem:[%s1623_s1 + $0x10] sm:$0xff]  ;;  %v97_v19 = vld [vmem:[%s1623_s1 + $0x18] sm:$0xff]  ;;  %v114_v23 = vld [vmem:[%s1623_s1 + $0xa0] sm:$0xff] }
   0x6   :  { %937 = vmatpush3.bf16.msra.mxu0 %v936_v8  ;;  %v128_v20 = vld [vmem:[%s1623_s1 + $0x110] sm:$0xff]  ;;  %v940_v21 = vpack.c.bf16 %v97_v19, %v96_v18  ;;  %v129_v22 = vld [vmem:[%s1623_s1 + $0x118] sm:$0xff]  ;;  %v115_v24 = vld [vmem:[%s1623_s1 + $0xa8] sm:$0xff] }
   0x7   :  { %969 = vmatpush3.bf16.msra.mxu1 %v968_v12  ;;  %939 = vmatprep.subr.bf16.mxu0 %v938_v16  ;;  %v972_v25 = vpack.c.bf16 %v129_v22, %v128_v20  ;;  %v942_v26 = vpack.c.bf16 %v115_v24, %v114_v23  ;;  %v146_v27 = vld [vmem:[%s1623_s1 + $0x1a0] sm:$0xff]  ;;  %v147_v28 = vld [vmem:[%s1623_s1 + $0x1a8] sm:$0xff]  ;;  %v116_v35 = vld [vmem:[%s1623_s1 + $0xb0] sm:$0xff] }
   0x8   :  { %971 = vmatprep.subr.bf16.mxu1 %v970_v17  ;;  %v98_v29 = vld [vmem:[%s1623_s1 + $0x20] sm:$0xff]  ;;  %v974_v30 = vpack.c.bf16 %v147_v28, %v146_v27  ;;  %v99_v31 = vld [vmem:[%s1623_s1 + $0x28] sm:$0xff]  ;;  %v117_v36 = vld [vmem:[%s1623_s1 + $0xb8] sm:$0xff] }
   0x9   :  { %v130_v32 = vld [vmem:[%s1623_s1 + $0x120] sm:$0xff]  ;;  %v131_v33 = vld [vmem:[%s1623_s1 + $0x128] sm:$0xff]  ;;  %v944_v34 = vpack.c.bf16 %v99_v31, %v98_v29  ;;  %v148_v37 = vld [vmem:[%s1623_s1 + $0x1b0] sm:$0xff]  ;;  %v946_v39 = vpack.c.bf16 %v117_v36, %v116_v35 }
   0xa   :  { %941 = vmatpush3.bf16.msra.mxu0 %v940_v21  ;;  %v976_v38 = vpack.c.bf16 %v131_v33, %v130_v32  ;;  %v149_v40 = vld [vmem:[%s1623_s1 + $0x1b8] sm:$0xff]  ;;  %v100_v41 = vld [vmem:[%s1623_s1 + $0x30] sm:$0xff]  ;;  %v118_v46 = vld [vmem:[%s1623_s1 + $0xc0] sm:$0xff] }
   0xb   :  { %973 = vmatpush3.bf16.msra.mxu1 %v972_v25  ;;  %943 = vmatprep.subr.bf16.mxu0 %v942_v26  ;;  %v101_v42 = vld [vmem:[%s1623_s1 + $0x38] sm:$0xff]  ;;  %v978_v43 = vpack.c.bf16 %v149_v40, %v148_v37  ;;  %v132_v44 = vld [vmem:[%s1623_s1 + $0x130] sm:$0xff]  ;;  %v119_v47 = vld [vmem:[%s1623_s1 + $0xc8] sm:$0xff] }
   0xc   :  { %975 = vmatprep.subr.bf16.mxu1 %v974_v30  ;;  %v133_v45 = vld [vmem:[%s1623_s1 + $0x138] sm:$0xff]  ;;  %v150_v48 = vld [vmem:[%s1623_s1 + $0x1c0] sm:$0xff]  ;;  %v151_v49 = vld [vmem:[%s1623_s1 + $0x1c8] sm:$0xff]  ;;  %v948_v50 = vpack.c.bf16 %v101_v42, %v100_v41  ;;  %v950_v52 = vpack.c.bf16 %v119_v47, %v118_v46 }
   0xd   :  { %v980_v51 = vpack.c.bf16 %v133_v45, %v132_v44  ;;  %v102_v53 = vld [vmem:[%s1623_s1 + $0x40] sm:$0xff]  ;;  %v103_v54 = vld [vmem:[%s1623_s1 + $0x48] sm:$0xff]  ;;  %v982_v56 = vpack.c.bf16 %v151_v49, %v150_v48  ;;  %v120_v58 = vld [vmem:[%s1623_s1 + $0xd0] sm:$0xff] }
   0xe   :  { %945 = vmatpush3.bf16.msra.mxu0 %v944_v34  ;;  %v134_v55 = vld [vmem:[%s1623_s1 + $0x140] sm:$0xff]  ;;  %v135_v57 = vld [vmem:[%s1623_s1 + $0x148] sm:$0xff]  ;;  %v121_v59 = vld [vmem:[%s1623_s1 + $0xd8] sm:$0xff]  ;;  %v952_v62 = vpack.c.bf16 %v103_v54, %v102_v53 }
   0xf   :  { %977 = vmatpush3.bf16.msra.mxu1 %v976_v38  ;;  %947 = vmatprep.subr.bf16.mxu0 %v946_v39  ;;  %v152_v60 = vld [vmem:[%s1623_s1 + $0x1d0] sm:$0xff]  ;;  %v153_v61 = vld [vmem:[%s1623_s1 + $0x1d8] sm:$0xff]  ;;  %v984_v63 = vpack.c.bf16 %v135_v57, %v134_v55  ;;  %v954_v0 = vpack.c.bf16 %v121_v59, %v120_v58  ;;  %v122_v6 = vld [vmem:[%s1623_s1 + $0xe0] sm:$0xff] }
  0x10   :  { %979 = vmatprep.subr.bf16.mxu1 %v978_v43  ;;  %v104_v1 = vld [vmem:[%s1623_s1 + $0x50] sm:$0xff]  ;;  %v105_v2 = vld [vmem:[%s1623_s1 + $0x58] sm:$0xff]  ;;  %v986_v4 = vpack.c.bf16 %v153_v61, %v152_v60  ;;  %v123_v7 = vld [vmem:[%s1623_s1 + $0xe8] sm:$0xff] }
  0x11   :  { %v136_v3 = vld [vmem:[%s1623_s1 + $0x150] sm:$0xff]  ;;  %v137_v5 = vld [vmem:[%s1623_s1 + $0x158] sm:$0xff]  ;;  %v154_v8 = vld [vmem:[%s1623_s1 + $0x1e0] sm:$0xff]  ;;  %v956_v10 = vpack.c.bf16 %v105_v2, %v104_v1  ;;  %v958_v14 = vpack.c.bf16 %v123_v7, %v122_v6 }
  0x12   :  { %949 = vmatpush3.bf16.msra.mxu0 %v948_v50  ;;  %v155_v9 = vld [vmem:[%s1623_s1 + $0x1e8] sm:$0xff]  ;;  %v106_v11 = vld [vmem:[%s1623_s1 + $0x60] sm:$0xff]  ;;  %v988_v13 = vpack.c.bf16 %v137_v5, %v136_v3  ;;  %v17_v17 = vld [vmem:[%s1624_s0 + $0x18] sm:$0xff] }
  0x13   :  { %981 = vmatpush3.bf16.msra.mxu1 %v980_v51  ;;  %951 = vmatprep.subr.bf16.mxu0 %v950_v52  ;;  %v107_v12 = vld [vmem:[%s1623_s1 + $0x68] sm:$0xff]  ;;  %v138_v15 = vld [vmem:[%s1623_s1 + $0x160] sm:$0xff]  ;;  %v990_v18 = vpack.c.bf16 %v155_v9, %v154_v8  ;;  %v124_v20 = vld [vmem:[%s1623_s1 + $0xf0] sm:$0xff] }
  0x14   :  { %983 = vmatprep.subr.bf16.mxu1 %v982_v56  ;;  %v15_v16 = vld [vmem:[%s1624_s0 + $0x8] sm:$0xff]  ;;  %v125_v21 = vld [vmem:[%s1623_s1 + $0xf8] sm:$0xff]  ;;  %v156_v22 = vld [vmem:[%s1623_s1 + $0x1f0] sm:$0xff]  ;;  %431 = vmatprep.mubr.f32.mxu1 %v17_v17  ;;  %v960_v24 = vpack.c.bf16 %v107_v12, %v106_v11 }
  0x15   :  { %v139_v19 = vld [vmem:[%s1623_s1 + $0x168] sm:$0xff]  ;;  %286 = vmatprep.mubr.f32.mxu0 %v15_v16  ;;  %v157_v23 = vld [vmem:[%s1623_s1 + $0x1f8] sm:$0xff]  ;;  %v962_v26 = vpack.c.bf16 %v125_v21, %v124_v20  ;;  %v108_v27 = vld [vmem:[%s1623_s1 + $0x70] sm:$0xff] }
  0x16   :  { %953 = vmatpush3.bf16.msra.mxu0 %v952_v62  ;;  %v992_v25 = vpack.c.bf16 %v139_v19, %v138_v15  ;;  %v109_v28 = vld [vmem:[%s1623_s1 + $0x78] sm:$0xff]  ;;  %v140_v29 = vld [vmem:[%s1623_s1 + $0x170] sm:$0xff]  ;;  %v994_v30 = vpack.c.bf16 %v157_v23, %v156_v22  ;;  %v158_v32 = vld [vmem:[%s1623_s1 + $0x200] sm:$0xff] }
  0x17   :  { %985 = vmatpush3.bf16.msra.mxu1 %v984_v63  ;;  %955 = vmatprep.subr.bf16.mxu0 %v954_v0  ;;  %v141_v31 = vld [vmem:[%s1623_s1 + $0x178] sm:$0xff]  ;;  %v159_v33 = vld [vmem:[%s1623_s1 + $0x208] sm:$0xff]  ;;  %v964_v34 = vpack.c.bf16 %v109_v28, %v108_v27  ;;  %v160_v37 = vld [vmem:[%s1623_s1 + $0x210] sm:$0xff] }
  0x18   :  { %987 = vmatprep.subr.bf16.mxu1 %v986_v4  ;;  %v996_v35 = vpack.c.bf16 %v141_v31, %v140_v29  ;;  %v998_v36 = vpack.c.bf16 %v159_v33, %v158_v32  ;;  %v161_v38 = vld [vmem:[%s1623_s1 + $0x218] sm:$0xff]  ;;  %v14_v39 = vld [vmem:[%s1624_s0] sm:$0xff]  ;;  %v16_v40 = vld [vmem:[%s1624_s0 + $0x10] sm:$0xff] }
  0x19   :  { %v20_v41 = vld [vmem:[%s1624_s0 + $0x30] sm:$0xff]  ;;  %v1002_v42 = vpack.c.bf16 %v161_v38, %v160_v37  ;;  %v22_v43 = vld [vmem:[%s1624_s0 + $0x40] sm:$0xff]  ;;  %v163_v45 = vld [vmem:[%s1623_s1 + $0x228] sm:$0xff] }
  0x1a   :  { %957 = vmatpush3.bf16.msra.mxu0 %v956_v10  ;;  %v162_v44 = vld [vmem:[%s1623_s1 + $0x220] sm:$0xff]  ;;  %v19_v46 = vld [vmem:[%s1624_s0 + $0x28] sm:$0xff]  ;;  %v21_v47 = vld [vmem:[%s1624_s0 + $0x38] sm:$0xff] }
  0x1b   :  { %989 = vmatpush3.bf16.msra.mxu1 %v988_v13  ;;  %959 = vmatprep.subr.bf16.mxu0 %v958_v14  ;;  %v25_v48 = vld [vmem:[%s1624_s0 + $0x58] sm:$0xff]  ;;  %v27_v49 = vld [vmem:[%s1624_s0 + $0x68] sm:$0xff]  ;;  %v1006_v50 = vpack.c.bf16 %v163_v45, %v162_v44  ;;  %v24_v51 = vld [vmem:[%s1624_s0 + $0x50] sm:$0xff] }
  0x1c   :  { %991 = vmatprep.subr.bf16.mxu1 %v990_v18  ;;  %v164_v52 = vld [vmem:[%s1623_s1 + $0x230] sm:$0xff]  ;;  %v26_v53 = vld [vmem:[%s1624_s0 + $0x60] sm:$0xff]  ;;  %v165_v55 = vld [vmem:[%s1623_s1 + $0x238] sm:$0xff] }
  0x1d   :  { %v30_v54 = vld [vmem:[%s1624_s0 + $0x80] sm:$0xff]  ;;  %v32_v56 = vld [vmem:[%s1624_s0 + $0x90] sm:$0xff]  ;;  %v1010_v57 = vpack.c.bf16 %v165_v55, %v164_v52  ;;  %v29_v58 = vld [vmem:[%s1624_s0 + $0x78] sm:$0xff] }
  0x1e   :  { %961 = vmatpush3.bf16.msra.mxu0 %v960_v24  ;;  %v31_v59 = vld [vmem:[%s1624_s0 + $0x88] sm:$0xff]  ;;  %v37_v61 = vld [vmem:[%s1624_s0 + $0xb8] sm:$0xff]  ;;  %v34_v62 = vld [vmem:[%s1624_s0 + $0xa0] sm:$0xff] }
  0x1f   :  { %993 = vmatpush3.bf16.msra.mxu1 %v992_v25  ;;  %963 = vmatprep.subr.bf16.mxu0 %v962_v26  ;;  %v35_v60 = vld [vmem:[%s1624_s0 + $0xa8] sm:$0xff]  ;;  %v36_v63 = vld [vmem:[%s1624_s0 + $0xb0] sm:$0xff]  ;;  %v42_v1 = vld [vmem:[%s1624_s0 + $0xe0] sm:$0xff] }
  0x20   :  { %995 = vmatprep.subr.bf16.mxu1 %v994_v30  ;;  %v40_v0 = vld [vmem:[%s1624_s0 + $0xd0] sm:$0xff]  ;;  %v39_v2 = vld [vmem:[%s1624_s0 + $0xc8] sm:$0xff]  ;;  %v41_v3 = vld [vmem:[%s1624_s0 + $0xd8] sm:$0xff] }
  0x21   :  { %v45_v4 = vld [vmem:[%s1624_s0 + $0xf8] sm:$0xff]  ;;  %v47_v5 = vld [vmem:[%s1624_s0 + $0x108] sm:$0xff]  ;;  %v44_v6 = vld [vmem:[%s1624_s0 + $0xf0] sm:$0xff] }
  0x22   :  { %965 = vmatpush3.bf16.msra.mxu0 %v964_v34  ;;  %v46_v7 = vld [vmem:[%s1624_s0 + $0x100] sm:$0xff]  ;;  %v52_v9 = vld [vmem:[%s1624_s0 + $0x130] sm:$0xff]  ;;  %v49_v10 = vld [vmem:[%s1624_s0 + $0x118] sm:$0xff] }
  0x23   :  { %997 = vmatpush3.bf16.msra.mxu1 %v996_v35  ;;  %999 = vmatprep.subr.bf16.mxu0 %v998_v36  ;;  %v50_v8 = vld [vmem:[%s1624_s0 + $0x120] sm:$0xff]  ;;  %v51_v11 = vld [vmem:[%s1624_s0 + $0x128] sm:$0xff]  ;;  %v57_v13 = vld [vmem:[%s1624_s0 + $0x158] sm:$0xff] }
  0x24   :  { %1014 = vmatprep.subr.bf16.mxu1 %v998_v36  ;;  %v55_v12 = vld [vmem:[%s1624_s0 + $0x148] sm:$0xff]  ;;  %v54_v14 = vld [vmem:[%s1624_s0 + $0x140] sm:$0xff]  ;;  %v56_v15 = vld [vmem:[%s1624_s0 + $0x150] sm:$0xff] }
  0x25   :  { %287 = vmatmul.mubr.f32.vlgmr.msra.gmra.mrb[0].mxu0 %v14_v39  ;;  %v60_v16 = vld [vmem:[%s1624_s0 + $0x170] sm:$0xff]  ;;  %v62_v17 = vld [vmem:[%s1624_s0 + $0x180] sm:$0xff]  ;;  %v59_v18 = vld [vmem:[%s1624_s0 + $0x168] sm:$0xff] }
  0x26   :  { %432 = vmatmul.mubr.f32.vlgmr.msra.gmra.mrb[0].mxu1 %v16_v40  ;;  %1001 = vmatpush3.bf16.msra.mxu0 %v998_v36  ;;  %v61_v19 = vld [vmem:[%s1624_s0 + $0x178] sm:$0xff]  ;;  %v67_v21 = vld [vmem:[%s1624_s0 + $0x1a8] sm:$0xff]  ;;  %v64_v22 = vld [vmem:[%s1624_s0 + $0x190] sm:$0xff] }
  0x27   :  { %1018 = vmatpush3.bf16.msra.mxu1 %v998_v36  ;;  %291 = vmatprep.mubr.f32.mxu0 %v20_v41  ;;  %v65_v20 = vld [vmem:[%s1624_s0 + $0x198] sm:$0xff]  ;;  %v66_v23 = vld [vmem:[%s1624_s0 + $0x1a0] sm:$0xff]  ;;  %v72_v25 = vld [vmem:[%s1624_s0 + $0x1d0] sm:$0xff] }
  0x28   :  { %436 = vmatprep.mubr.f32.mxu1 %v22_v43  ;;  %1003 = vmatprep.subr.bf16.mxu0 %v1002_v42  ;;  %v70_v24 = vld [vmem:[%s1624_s0 + $0x1c0] sm:$0xff]  ;;  %v69_v26 = vld [vmem:[%s1624_s0 + $0x1b8] sm:$0xff]  ;;  %v71_v27 = vld [vmem:[%s1624_s0 + $0x1c8] sm:$0xff] }
  0x29   :  { %292 = vmatmul.mubr.f32.gmra.mrb[2].mxu0 %v19_v46  ;;  %1015 = vmatprep.subr.bf16.mxu1 %v1002_v42  ;;  %v75_v28 = vld [vmem:[%s1624_s0 + $0x1e8] sm:$0xff]  ;;  %v77_v29 = vld [vmem:[%s1624_s0 + $0x1f8] sm:$0xff]  ;;  %v74_v30 = vld [vmem:[%s1624_s0 + $0x1e0] sm:$0xff] }
  0x2a   :  { %437 = vmatmul.mubr.f32.gmra.mrb[2].mxu1 %v21_v47  ;;  %296 = vmatprep.mubr.f32.mxu0 %v25_v48  ;;  %v76_v31 = vld [vmem:[%s1624_s0 + $0x1f0] sm:$0xff]  ;;  %v82_v33 = vld [vmem:[%s1624_s0 + $0x220] sm:$0xff]  ;;  %v79_v34 = vld [vmem:[%s1624_s0 + $0x208] sm:$0xff] }
  0x2b   :  { %441 = vmatprep.mubr.f32.mxu1 %v27_v49  ;;  %1005 = vmatpush3.bf16.msra.mxu0 %v1002_v42  ;;  %v80_v32 = vld [vmem:[%s1624_s0 + $0x210] sm:$0xff]  ;;  %v81_v35 = vld [vmem:[%s1624_s0 + $0x218] sm:$0xff]  ;;  %v87_v37 = vld [vmem:[%s1624_s0 + $0x248] sm:$0xff] }
  0x2c   :  { %1019 = vmatpush3.bf16.msra.mxu1 %v1002_v42  ;;  %1007 = vmatprep.subr.bf16.mxu0 %v1006_v50  ;;  %v85_v36 = vld [vmem:[%s1624_s0 + $0x238] sm:$0xff]  ;;  %v84_v38 = vld [vmem:[%s1624_s0 + $0x230] sm:$0xff]  ;;  %v86_v39 = vld [vmem:[%s1624_s0 + $0x240] sm:$0xff] }
  0x2d   :  { %297 = vmatmul.mubr.f32.gmra.mrb[4].mxu0 %v24_v51  ;;  %1016 = vmatprep.subr.bf16.mxu1 %v1006_v50  ;;  %v90_v40 = vld [vmem:[%s1624_s0 + $0x260] sm:$0xff]  ;;  %v92_v41 = vld [vmem:[%s1624_s0 + $0x270] sm:$0xff]  ;;  %v89_v42 = vld [vmem:[%s1624_s0 + $0x258] sm:$0xff] }
  0x2e   :  { %442 = vmatmul.mubr.f32.gmra.mrb[4].mxu1 %v26_v53  ;;  %301 = vmatprep.mubr.f32.mxu0 %v30_v54  ;;  %v91_v43 = vld [vmem:[%s1624_s0 + $0x268] sm:$0xff]  ;;  %v18_v44 = vld [vmem:[%s1624_s0 + $0x20] sm:$0xff]  ;;  %v28_v48 = vld [vmem:[%s1624_s0 + $0x70] sm:$0xff] }
  0x2f   :  { %446 = vmatprep.mubr.f32.mxu1 %v32_v56  ;;  %1009 = vmatpush3.bf16.msra.mxu0 %v1006_v50  ;;  %v58_v45 = vld [vmem:[%s1624_s0 + $0x160] sm:$0xff]  ;;  %v23_v46 = vld [vmem:[%s1624_s0 + $0x48] sm:$0xff]  ;;  %v68_v49 = vld [vmem:[%s1624_s0 + $0x1b0] sm:$0xff] }
  0x30   :  { %1020 = vmatpush3.bf16.msra.mxu1 %v1006_v50  ;;  %1011 = vmatprep.subr.bf16.mxu0 %v1010_v57  ;;  %v63_v47 = vld [vmem:[%s1624_s0 + $0x188] sm:$0xff]  ;;  %v33_v50 = vld [vmem:[%s1624_s0 + $0x98] sm:$0xff]  ;;  %v38_v52 = vld [vmem:[%s1624_s0 + $0xc0] sm:$0xff] }
  0x31   :  { %302 = vmatmul.mubr.f32.gmra.mrb[6].mxu0 %v29_v58  ;;  %1017 = vmatprep.subr.bf16.mxu1 %v1010_v57  ;;  %v73_v51 = vld [vmem:[%s1624_s0 + $0x1d8] sm:$0xff]  ;;  %v78_v53 = vld [vmem:[%s1624_s0 + $0x200] sm:$0xff]  ;;  %v43_v54 = vld [vmem:[%s1624_s0 + $0xe8] sm:$0xff] }
  0x32   :  { %447 = vmatmul.mubr.f32.gmra.mrb[6].mxu1 %v31_v59  ;;  %306 = vmatprep.mubr.f32.mxu0 %v35_v60  ;;  %v83_v55 = vld [vmem:[%s1624_s0 + $0x228] sm:$0xff]  ;;  %v48_v56 = vld [vmem:[%s1624_s0 + $0x110] sm:$0xff]  ;;  %v53_v58 = vld [vmem:[%s1624_s0 + $0x138] sm:$0xff] }
  0x33   :  { %451 = vmatprep.mubr.f32.mxu1 %v37_v61  ;;  %1013 = vmatpush3.bf16.msra.mxu0 %v1010_v57  ;;  %v93_v59 = vld [vmem:[%s1624_s0 + $0x278] sm:$0xff] }
  0x34   :  { %1021 = vmatpush3.bf16.msra.mxu1 %v1010_v57  ;;  %v88_v57 = vld [vmem:[%s1624_s0 + $0x250] sm:$0xff] }
  0x35   :  { %307 = vmatmul.mubr.f32.gmra.mrb[8].mxu0 %v34_v62  ;;  %v1517_v62 = vld [vmem:[%s1625_s2] ss:$0 sm:$0xff] }
  0x36   :  { %452 = vmatmul.mubr.f32.gmra.mrb[8].mxu1 %v36_v63  ;;  %311 = vmatprep.mubr.f32.mxu0 %v40_v0 }
  0x37   :  { %456 = vmatprep.mubr.f32.mxu1 %v42_v1 }
  0x39   :  { %312 = vmatmul.mubr.f32.gmra.mrb[10].mxu0 %v39_v2 }
  0x3a   :  { %457 = vmatmul.mubr.f32.gmra.mrb[10].mxu1 %v41_v3  ;;  %316 = vmatprep.mubr.f32.mxu0 %v45_v4 }
  0x3b   :  { %461 = vmatprep.mubr.f32.mxu1 %v47_v5 }
  0x3d   :  { %317 = vmatmul.mubr.f32.gmra.mrb[12].mxu0 %v44_v6 }
  0x3e   :  { %462 = vmatmul.mubr.f32.gmra.mrb[12].mxu1 %v46_v7  ;;  %321 = vmatprep.mubr.f32.mxu0 %v50_v8 }
  0x3f   :  { %466 = vmatprep.mubr.f32.mxu1 %v52_v9 }
  0x41   :  { %322 = vmatmul.mubr.f32.gmra.mrb[14].mxu0 %v49_v10 }
  0x42   :  { %467 = vmatmul.mubr.f32.gmra.mrb[14].mxu1 %v51_v11  ;;  %326 = vmatprep.mubr.f32.mxu0 %v55_v12 }
  0x43   :  { %471 = vmatprep.mubr.f32.mxu1 %v57_v13 }
  0x45   :  { %327 = vmatmul.mubr.f32.gmra.mrb[16].mxu0 %v54_v14 }
  0x46   :  { %472 = vmatmul.mubr.f32.gmra.mrb[16].mxu1 %v56_v15  ;;  %331 = vmatprep.mubr.f32.mxu0 %v60_v16 }
  0x47   :  { %476 = vmatprep.mubr.f32.mxu1 %v62_v17 }
  0x49   :  { %332 = vmatmul.mubr.f32.gmra.mrb[18].mxu0 %v59_v18 }
  0x4a   :  { %477 = vmatmul.mubr.f32.gmra.mrb[18].mxu1 %v61_v19  ;;  %336 = vmatprep.mubr.f32.mxu0 %v65_v20 }
  0x4b   :  { %481 = vmatprep.mubr.f32.mxu1 %v67_v21 }
  0x4d   :  { %337 = vmatmul.mubr.f32.gmra.mrb[20].mxu0 %v64_v22 }
  0x4e   :  { %482 = vmatmul.mubr.f32.gmra.mrb[20].mxu1 %v66_v23  ;;  %341 = vmatprep.mubr.f32.mxu0 %v70_v24 }
  0x4f   :  { %486 = vmatprep.mubr.f32.mxu1 %v72_v25 }
  0x51   :  { %342 = vmatmul.mubr.f32.gmra.mrb[22].mxu0 %v69_v26 }
  0x52   :  { %487 = vmatmul.mubr.f32.gmra.mrb[22].mxu1 %v71_v27  ;;  %346 = vmatprep.mubr.f32.mxu0 %v75_v28 }
  0x53   :  { %491 = vmatprep.mubr.f32.mxu1 %v77_v29 }
  0x55   :  { %347 = vmatmul.mubr.f32.gmra.mrb[24].mxu0 %v74_v30 }
  0x56   :  { %492 = vmatmul.mubr.f32.gmra.mrb[24].mxu1 %v76_v31  ;;  %351 = vmatprep.mubr.f32.mxu0 %v80_v32 }
  0x57   :  { %496 = vmatprep.mubr.f32.mxu1 %v82_v33 }
  0x59   :  { %352 = vmatmul.mubr.f32.gmra.mrb[26].mxu0 %v79_v34 }
  0x5a   :  { %497 = vmatmul.mubr.f32.gmra.mrb[26].mxu1 %v81_v35  ;;  %356 = vmatprep.mubr.f32.mxu0 %v85_v36 }
  0x5b   :  { %501 = vmatprep.mubr.f32.mxu1 %v87_v37 }
  0x5d   :  { %357 = vmatmul.mubr.f32.gmra.mrb[28].mxu0 %v84_v38 }
  0x5e   :  { %502 = vmatmul.mubr.f32.gmra.mrb[28].mxu1 %v86_v39  ;;  %361 = vmatprep.mubr.f32.mxu0 %v90_v40 }
  0x5f   :  { %506 = vmatprep.mubr.f32.mxu1 %v92_v41 }
  0x61   :  { %362 = vmatmul.mubr.f32.gmra.mrb[30].mxu0 %v89_v42 }
  0x62   :  { %507 = vmatmul.mubr.f32.gmra.mrb[30].mxu1 %v91_v43  ;;  %910 = vmatprep.mubr.msk.f32.mxu0 %vm173_vm0, %v18_v44 }
  0x63   :  { %922 = vmatprep.mubr.msk.f32.mxu1 %vm173_vm0, %v58_v45 }
  0x65   :  { %911 = vmatmul.mubr.msk.f32.vlgmr.msra.gmra.mrb[32].mxu0 %vm173_vm0, %v23_v46 }
  0x66   :  { %923 = vmatmul.mubr.msk.f32.vlgmr.msra.gmra.mrb[32].mxu1 %vm173_vm0, %v63_v47  ;;  %913 = vmatprep.mubr.msk.f32.mxu0 %vm173_vm0, %v28_v48 }
  0x67   :  { %925 = vmatprep.mubr.msk.f32.mxu1 %vm173_vm0, %v68_v49 }
  0x69   :  { %914 = vmatmul.mubr.msk.f32.gmra.mrb[34].mxu0 %vm173_vm0, %v33_v50 }
  0x6a   :  { %926 = vmatmul.mubr.msk.f32.gmra.mrb[34].mxu1 %vm173_vm0, %v73_v51  ;;  %916 = vmatprep.mubr.msk.f32.mxu0 %vm173_vm0, %v38_v52 }
  0x6b   :  { %928 = vmatprep.mubr.msk.f32.mxu1 %vm173_vm0, %v78_v53 }
  0x6d   :  { %917 = vmatmul.mubr.msk.f32.gmra.mrb[36].mxu0 %vm173_vm0, %v43_v54 }
  0x6e   :  { %929 = vmatmul.mubr.msk.f32.gmra.mrb[36].mxu1 %vm173_vm0, %v83_v55  ;;  %919 = vmatprep.mubr.msk.f32.mxu0 %vm173_vm0, %v48_v56 }
  0x6f   :  { %931 = vmatprep.mubr.msk.f32.mxu1 %vm173_vm0, %v88_v57 }
  0x71   :  { %920 = vmatmul.mubr.msk.f32.gmra.mrb[38].mxu0 %vm173_vm0, %v53_v58 }
  0x72   :  { %932 = vmatmul.mubr.msk.f32.gmra.mrb[38].mxu1 %vm173_vm0, %v93_v59 }
  0xf8   :  { %v742_v60 = vpop.f32.mrb[0].mxu0 }
  0xf9   :  { %v822_v61 = vpop.f32.mrb[0].mxu1  ;;  %v743_v63 = vpop.f32.mrb[1].mxu0 }
  0xfa   :  { %v744_v0 = vadd.f32 %v743_v63, %v742_v60  ;;  %v823_v1 = vpop.f32.mrb[1].mxu1 }
  0xfb   :  { %v824_v2 = vadd.f32 %v823_v1, %v822_v61 }
  0xfc   :  { %v289_v3 = vadd.f32 %v744_v0, %v1517_v62  ;;  %v745_v4 = vpop.f32.mrb[2].mxu0 }
  0xfd   :  { %v825_v5 = vpop.f32.mrb[2].mxu1  ;;  %v746_v6 = vpop.f32.mrb[3].mxu0 }
  0xfe   :  { %v747_v7 = vadd.f32 %v746_v6, %v745_v4  ;;  %v826_v8 = vpop.f32.mrb[3].mxu1  ;;  %v1520_v9 = vadd.f32 %v824_v2, %v289_v3 }
  0xff   :  { %v827_v10 = vadd.f32 %v826_v8, %v825_v5 }
 0x100   :  { %v294_v11 = vadd.f32 %v747_v7, %v1517_v62  ;;  %v748_v12 = vpop.f32.mrb[4].mxu0 }
 0x101   :  { %v828_v13 = vpop.f32.mrb[4].mxu1  ;;  %v749_v14 = vpop.f32.mrb[5].mxu0 }
 0x102   :  { %v750_v15 = vadd.f32 %v749_v14, %v748_v12  ;;  %v829_v16 = vpop.f32.mrb[5].mxu1  ;;  %v1523_v17 = vadd.f32 %v827_v10, %v294_v11 }
 0x103   :  { %v830_v18 = vadd.f32 %v829_v16, %v828_v13 }
 0x104   :  { %v299_v19 = vadd.f32 %v750_v15, %v1517_v62  ;;  %v751_v20 = vpop.f32.mrb[6].mxu0 }
 0x105   :  { %v831_v21 = vpop.f32.mrb[6].mxu1  ;;  %v752_v22 = vpop.f32.mrb[7].mxu0 }
 0x106   :  { %v753_v23 = vadd.f32 %v752_v22, %v751_v20  ;;  %v832_v24 = vpop.f32.mrb[7].mxu1  ;;  %v1526_v25 = vadd.f32 %v830_v18, %v299_v19 }
 0x107   :  { %v833_v26 = vadd.f32 %v832_v24, %v831_v21 }
 0x108   :  { %v304_v27 = vadd.f32 %v753_v23, %v1517_v62  ;;  %v754_v28 = vpop.f32.mrb[8].mxu0 }
 0x109   :  { %v834_v29 = vpop.f32.mrb[8].mxu1  ;;  %v755_v30 = vpop.f32.mrb[9].mxu0 }
 0x10a   :  { %v756_v31 = vadd.f32 %v755_v30, %v754_v28  ;;  %v835_v32 = vpop.f32.mrb[9].mxu1  ;;  %v1529_v33 = vadd.f32 %v833_v26, %v304_v27 }
 0x10b   :  { %v836_v34 = vadd.f32 %v835_v32, %v834_v29 }
 0x10c   :  { %v309_v35 = vadd.f32 %v756_v31, %v1517_v62  ;;  %v757_v36 = vpop.f32.mrb[10].mxu0 }
 0x10d   :  { %v837_v37 = vpop.f32.mrb[10].mxu1  ;;  %v758_v38 = vpop.f32.mrb[11].mxu0 }
 0x10e   :  { %v759_v39 = vadd.f32 %v758_v38, %v757_v36  ;;  %v838_v40 = vpop.f32.mrb[11].mxu1  ;;  %v1532_v41 = vadd.f32 %v836_v34, %v309_v35 }
 0x10f   :  { %v839_v42 = vadd.f32 %v838_v40, %v837_v37 }
 0x110   :  { %v314_v43 = vadd.f32 %v759_v39, %v1517_v62  ;;  %v760_v44 = vpop.f32.mrb[12].mxu0 }
 0x111   :  { %v840_v45 = vpop.f32.mrb[12].mxu1  ;;  %v761_v46 = vpop.f32.mrb[13].mxu0 }
 0x112   :  { %v762_v47 = vadd.f32 %v761_v46, %v760_v44  ;;  %v841_v48 = vpop.f32.mrb[13].mxu1  ;;  %v1535_v49 = vadd.f32 %v839_v42, %v314_v43 }
 0x113   :  { %v842_v50 = vadd.f32 %v841_v48, %v840_v45 }
 0x114   :  { %v319_v51 = vadd.f32 %v762_v47, %v1517_v62  ;;  %v763_v52 = vpop.f32.mrb[14].mxu0 }
 0x115   :  { %v843_v53 = vpop.f32.mrb[14].mxu1  ;;  %v764_v54 = vpop.f32.mrb[15].mxu0 }
 0x116   :  { %v765_v55 = vadd.f32 %v764_v54, %v763_v52  ;;  %v844_v56 = vpop.f32.mrb[15].mxu1  ;;  %v1538_v57 = vadd.f32 %v842_v50, %v319_v51 }
 0x117   :  { %v845_v58 = vadd.f32 %v844_v56, %v843_v53 }
 0x118   :  { %v324_v59 = vadd.f32 %v765_v55, %v1517_v62  ;;  %v766_v60 = vpop.f32.mrb[16].mxu0 }
 0x119   :  { %v846_v61 = vpop.f32.mrb[16].mxu1  ;;  %v767_v63 = vpop.f32.mrb[17].mxu0 }
 0x11a   :  { %v768_v0 = vadd.f32 %v767_v63, %v766_v60  ;;  %v847_v1 = vpop.f32.mrb[17].mxu1  ;;  %v1541_v2 = vadd.f32 %v845_v58, %v324_v59 }
 0x11b   :  { %v848_v3 = vadd.f32 %v847_v1, %v846_v61 }
 0x11c   :  { %v329_v4 = vadd.f32 %v768_v0, %v1517_v62  ;;  %v769_v5 = vpop.f32.mrb[18].mxu0 }
 0x11d   :  { %v849_v6 = vpop.f32.mrb[18].mxu1  ;;  %v770_v7 = vpop.f32.mrb[19].mxu0 }
 0x11e   :  { %v771_v8 = vadd.f32 %v770_v7, %v769_v5  ;;  %v850_v10 = vpop.f32.mrb[19].mxu1  ;;  %v474_v11 = vadd.f32 %v848_v3, %v329_v4 }
 0x11f   :  { %v851_v12 = vadd.f32 %v850_v10, %v849_v6 }
 0x120   :  { %v334_v13 = vadd.f32 %v771_v8, %v1517_v62  ;;  %v772_v14 = vpop.f32.mrb[20].mxu0 }
 0x121   :  { %v852_v15 = vpop.f32.mrb[20].mxu1  ;;  %v773_v16 = vpop.f32.mrb[21].mxu0 }
 0x122   :  { %v774_v18 = vadd.f32 %v773_v16, %v772_v14  ;;  %v853_v19 = vpop.f32.mrb[21].mxu1  ;;  %v479_v20 = vadd.f32 %v851_v12, %v334_v13 }
 0x123   :  { %v854_v21 = vadd.f32 %v853_v19, %v852_v15 }
 0x124   :  { %v339_v22 = vadd.f32 %v774_v18, %v1517_v62  ;;  %v775_v23 = vpop.f32.mrb[22].mxu0 }
 0x125   :  { %v855_v24 = vpop.f32.mrb[22].mxu1  ;;  %v776_v26 = vpop.f32.mrb[23].mxu0 }
 0x126   :  { %v777_v27 = vadd.f32 %v776_v26, %v775_v23  ;;  %v856_v28 = vpop.f32.mrb[23].mxu1  ;;  %v484_v29 = vadd.f32 %v854_v21, %v339_v22 }
 0x127   :  { %v857_v30 = vadd.f32 %v856_v28, %v855_v24 }
 0x128   :  { %v344_v31 = vadd.f32 %v777_v27, %v1517_v62  ;;  %v778_v32 = vpop.f32.mrb[24].mxu0 }
 0x129   :  { %v858_v34 = vpop.f32.mrb[24].mxu1  ;;  %v779_v35 = vpop.f32.mrb[25].mxu0 }
 0x12a   :  { %v780_v36 = vadd.f32 %v779_v35, %v778_v32  ;;  %v859_v37 = vpop.f32.mrb[25].mxu1  ;;  %v489_v38 = vadd.f32 %v857_v30, %v344_v31 }
 0x12b   :  { %v860_v39 = vadd.f32 %v859_v37, %v858_v34 }
 0x12c   :  { %v349_v40 = vadd.f32 %v780_v36, %v1517_v62  ;;  %v781_v42 = vpop.f32.mrb[26].mxu0 }
 0x12d   :  { %v861_v43 = vpop.f32.mrb[26].mxu1  ;;  %v782_v44 = vpop.f32.mrb[27].mxu0 }
 0x12e   :  { %v783_v45 = vadd.f32 %v782_v44, %v781_v42  ;;  %v862_v46 = vpop.f32.mrb[27].mxu1  ;;  %v494_v47 = vadd.f32 %v860_v39, %v349_v40 }
 0x12f   :  { %v863_v48 = vadd.f32 %v862_v46, %v861_v43 }
 0x130   :  { %v354_v50 = vadd.f32 %v783_v45, %v1517_v62  ;;  %v784_v51 = vpop.f32.mrb[28].mxu0 }
 0x131   :  { %v864_v52 = vpop.f32.mrb[28].mxu1  ;;  %v785_v53 = vpop.f32.mrb[29].mxu0 }
 0x132   :  { %v786_v54 = vadd.f32 %v785_v53, %v784_v51  ;;  %v865_v55 = vpop.f32.mrb[29].mxu1  ;;  %v499_v56 = vadd.f32 %v863_v48, %v354_v50 }
 0x133   :  { %v866_v58 = vadd.f32 %v865_v55, %v864_v52 }
 0x134   :  { %v359_v59 = vadd.f32 %v786_v54, %v1517_v62  ;;  %v787_v60 = vpop.f32.mrb[30].mxu0 }
 0x135   :  { %v867_v61 = vpop.f32.mrb[30].mxu1  ;;  %v788_v63 = vpop.f32.mrb[31].mxu0 }
 0x136   :  { %v789_v0 = vadd.f32 %v788_v63, %v787_v60  ;;  %v868_v1 = vpop.f32.mrb[31].mxu1  ;;  %v504_v3 = vadd.f32 %v866_v58, %v359_v59 }
 0x137   :  { %v869_v4 = vadd.f32 %v868_v1, %v867_v61 }
 0x138   :  { %v364_v5 = vadd.f32 %v789_v0, %v1517_v62  ;;  %v912_v6 = vpop.f32.mrb[32].mxu0 }
 0x139   :  { %v584_v7 = vadd.f32 %v912_v6, %v1523_v17  ;;  %v924_v8 = vpop.f32.mrb[32].mxu1  ;;  %v578_v10 = vpop.f32.mrb[33].mxu0 }
 0x13a   :  { %v624_v12 = vadd.f32 %v924_v8, %v479_v20  ;;  %v579_v13 = vadd.f32 %v578_v10, %v1520_v9  ;;  %v618_v14 = vpop.f32.mrb[33].mxu1  ;;  %v509_v15 = vadd.f32 %v869_v4, %v364_v5 }
 0x13b   :  { %v658_v16 = vmax.f32 %v584_v7, 0.0  ;;  %v619_v18 = vadd.f32 %v618_v14, %v474_v11 }
 0x13c   :  { %v666_v19 = vmax.f32 %v624_v12, 0.0  ;;  %v657_v21 = vmax.f32 %v579_v13, 0.0  ;;  %v915_v22 = vpop.f32.mrb[34].mxu0 }
 0x13d   :  { %674 = vst.msk [vmem:[%s1626_s3 + $0x8] sm:$0xff] %vm173_vm0, %v658_v16  ;;  %v665_v62 = vmax.f32 %v619_v18, 0.0  ;;  %v594_v17 = vadd.f32 %v915_v22, %v1529_v33  ;;  %v927_v23 = vpop.f32.mrb[34].mxu1  ;;  %v588_v24 = vpop.f32.mrb[35].mxu0 }
 0x13e   :  { %682 = vst.msk [vmem:[%s1626_s3 + $0x48] sm:$0xff] %vm173_vm0, %v666_v19  ;;  %673 = vst.msk [vmem:[%s1626_s3] sm:$0xff] %vm173_vm0, %v657_v21  ;;  %v634_v9 = vadd.f32 %v927_v23, %v489_v38  ;;  %v589_v11 = vadd.f32 %v588_v24, %v1526_v25  ;;  %v628_v20 = vpop.f32.mrb[35].mxu1 }
 0x13f   :  { %681 = vst.msk [vmem:[%s1626_s3 + $0x40] sm:$0xff] %vm173_vm0, %v665_v62  ;;  %v660_v33 = vmax.f32 %v594_v17, 0.0  ;;  %v629_v26 = vadd.f32 %v628_v20, %v484_v29 }
 0x140   :  { %v668_v27 = vmax.f32 %v634_v9, 0.0  ;;  %v659_v28 = vmax.f32 %v589_v11, 0.0  ;;  %v918_v30 = vpop.f32.mrb[36].mxu0 }
 0x141   :  { %676 = vst.msk [vmem:[%s1626_s3 + $0x18] sm:$0xff] %vm173_vm0, %v660_v33  ;;  %v667_v31 = vmax.f32 %v629_v26, 0.0  ;;  %v604_v32 = vadd.f32 %v918_v30, %v1535_v49  ;;  %v930_v25 = vpop.f32.mrb[36].mxu1  ;;  %v598_v34 = vpop.f32.mrb[37].mxu0 }
 0x142   :  { %684 = vst.msk [vmem:[%s1626_s3 + $0x58] sm:$0xff] %vm173_vm0, %v668_v27  ;;  %675 = vst.msk [vmem:[%s1626_s3 + $0x10] sm:$0xff] %vm173_vm0, %v659_v28  ;;  %v644_v29 = vadd.f32 %v930_v25, %v499_v56  ;;  %v599_v35 = vadd.f32 %v598_v34, %v1532_v41  ;;  %v638_v36 = vpop.f32.mrb[37].mxu1 }
 0x143   :  { %683 = vst.msk [vmem:[%s1626_s3 + $0x50] sm:$0xff] %vm173_vm0, %v667_v31  ;;  %v662_v49 = vmax.f32 %v604_v32, 0.0  ;;  %v639_v37 = vadd.f32 %v638_v36, %v494_v47 }
 0x144   :  { %v670_v38 = vmax.f32 %v644_v29, 0.0  ;;  %v661_v39 = vmax.f32 %v599_v35, 0.0  ;;  %v921_v40 = vpop.f32.mrb[38].mxu0 }
 0x145   :  { %678 = vst.msk [vmem:[%s1626_s3 + $0x28] sm:$0xff] %vm173_vm0, %v662_v49  ;;  %v669_v42 = vmax.f32 %v639_v37, 0.0  ;;  %v614_v43 = vadd.f32 %v921_v40, %v1541_v2  ;;  %v933_v41 = vpop.f32.mrb[38].mxu1  ;;  %v608_v44 = vpop.f32.mrb[39].mxu0 }
 0x146   :  { %686 = vst.msk [vmem:[%s1626_s3 + $0x68] sm:$0xff] %vm173_vm0, %v670_v38  ;;  %677 = vst.msk [vmem:[%s1626_s3 + $0x20] sm:$0xff] %vm173_vm0, %v661_v39  ;;  %v654_v45 = vadd.f32 %v933_v41, %v509_v15  ;;  %v609_v46 = vadd.f32 %v608_v44, %v1538_v57  ;;  %v648_v47 = vpop.f32.mrb[39].mxu1 }
 0x147   :  { %685 = vst.msk [vmem:[%s1626_s3 + $0x60] sm:$0xff] %vm173_vm0, %v669_v42  ;;  %v664_v2 = vmax.f32 %v614_v43, 0.0  ;;  %v649_v48 = vadd.f32 %v648_v47, %v504_v3 }
 0x148   :  { %v672_v50 = vmax.f32 %v654_v45, 0.0  ;;  %v663_v51 = vmax.f32 %v609_v46, 0.0 }
 0x149   :  { %680 = vst.msk [vmem:[%s1626_s3 + $0x38] sm:$0xff] %vm173_vm0, %v664_v2  ;;  %v671_v52 = vmax.f32 %v649_v48, 0.0 }
 0x14a   :  { %688 = vst.msk [vmem:[%s1626_s3 + $0x78] sm:$0xff] %vm173_vm0, %v672_v50  ;;  %679 = vst.msk [vmem:[%s1626_s3 + $0x30] sm:$0xff] %vm173_vm0, %v663_v51 }
 0x14b   :  { %687 = vst.msk [vmem:[%s1626_s3 + $0x70] sm:$0xff] %vm173_vm0, %v671_v52 }

// kernel: resnet_itta_forward.11
= control target key start
LH: loop header
LB: loop body
LE: loop exit
PB: predicated region body
PF: predicated region fallthrough
CT: control target
= control target key end

     0   :  { %vm176_vm0 = vcmask 523264   ;;  %s1729_s1 = inlined_call_operand.vmem [shape: f32[576,64], index: 1, kind: input, shape index: {}]   ;;  %s1730_s0 = inlined_call_operand.vmem [shape: f32[128,576], index: 0, kind: input, shape index: {}]   ;;  %s1731_s2 = inlined_call_operand.vmem [shape: f32[1,64], index: 2, kind: input, shape index: {}]   ;;  %s1732_s3 = inlined_call_operand.vmem [shape: f32[128,64], index: 3, kind: input, shape index: {}]   ;;  %s1733_s4 = inlined_call_operand.vmem [shape: f32[128,64], index: 4, kind: output, shape index: {}]  }
   0x1   :  { %v113_v0 = vld [vmem:[%s1729_s1 + $0x80] sm:$0xff]  ;;  %v114_v1 = vld [vmem:[%s1729_s1 + $0x88] sm:$0xff]  ;;  %v115_v11 = vld [vmem:[%s1729_s1 + $0x90] sm:$0xff] }
   0x2   :  { %v145_v2 = vld [vmem:[%s1729_s1 + $0x180] sm:$0xff]  ;;  %v969_v3 = vpack.c.bf16 %v114_v1, %v113_v0  ;;  %v146_v4 = vld [vmem:[%s1729_s1 + $0x188] sm:$0xff]  ;;  %v116_v13 = vld [vmem:[%s1729_s1 + $0x98] sm:$0xff] }
   0x3   :  { %v97_v5 = vld [vmem:[%s1729_s1] sm:$0xff]  ;;  %v98_v6 = vld [vmem:[%s1729_s1 + $0x8] sm:$0xff]  ;;  %v1001_v7 = vpack.c.bf16 %v146_v4, %v145_v2  ;;  %v147_v14 = vld [vmem:[%s1729_s1 + $0x190] sm:$0xff]  ;;  %v973_v16 = vpack.c.bf16 %v116_v13, %v115_v11 }
   0x4   :  { %v971_v8 = vpack.c.bf16 %v98_v6, %v97_v5  ;;  %v129_v9 = vld [vmem:[%s1729_s1 + $0x100] sm:$0xff]  ;;  %v130_v10 = vld [vmem:[%s1729_s1 + $0x108] sm:$0xff]  ;;  %970 = vmatprep.subr.bf16.mxu0 %v969_v3  ;;  %v148_v15 = vld [vmem:[%s1729_s1 + $0x198] sm:$0xff] }
   0x5   :  { %v1003_v12 = vpack.c.bf16 %v130_v10, %v129_v9  ;;  %1002 = vmatprep.subr.bf16.mxu1 %v1001_v7  ;;  %v1005_v17 = vpack.c.bf16 %v148_v15, %v147_v14  ;;  %v99_v18 = vld [vmem:[%s1729_s1 + $0x10] sm:$0xff]  ;;  %v100_v19 = vld [vmem:[%s1729_s1 + $0x18] sm:$0xff]  ;;  %v117_v23 = vld [vmem:[%s1729_s1 + $0xa0] sm:$0xff] }
   0x6   :  { %972 = vmatpush3.bf16.msra.mxu0 %v971_v8  ;;  %v131_v20 = vld [vmem:[%s1729_s1 + $0x110] sm:$0xff]  ;;  %v975_v21 = vpack.c.bf16 %v100_v19, %v99_v18  ;;  %v132_v22 = vld [vmem:[%s1729_s1 + $0x118] sm:$0xff]  ;;  %v118_v24 = vld [vmem:[%s1729_s1 + $0xa8] sm:$0xff] }
   0x7   :  { %1004 = vmatpush3.bf16.msra.mxu1 %v1003_v12  ;;  %974 = vmatprep.subr.bf16.mxu0 %v973_v16  ;;  %v1007_v25 = vpack.c.bf16 %v132_v22, %v131_v20  ;;  %v977_v26 = vpack.c.bf16 %v118_v24, %v117_v23  ;;  %v149_v27 = vld [vmem:[%s1729_s1 + $0x1a0] sm:$0xff]  ;;  %v150_v28 = vld [vmem:[%s1729_s1 + $0x1a8] sm:$0xff]  ;;  %v119_v35 = vld [vmem:[%s1729_s1 + $0xb0] sm:$0xff] }
   0x8   :  { %1006 = vmatprep.subr.bf16.mxu1 %v1005_v17  ;;  %v101_v29 = vld [vmem:[%s1729_s1 + $0x20] sm:$0xff]  ;;  %v1009_v30 = vpack.c.bf16 %v150_v28, %v149_v27  ;;  %v102_v31 = vld [vmem:[%s1729_s1 + $0x28] sm:$0xff]  ;;  %v120_v36 = vld [vmem:[%s1729_s1 + $0xb8] sm:$0xff] }
   0x9   :  { %v133_v32 = vld [vmem:[%s1729_s1 + $0x120] sm:$0xff]  ;;  %v134_v33 = vld [vmem:[%s1729_s1 + $0x128] sm:$0xff]  ;;  %v979_v34 = vpack.c.bf16 %v102_v31, %v101_v29  ;;  %v151_v37 = vld [vmem:[%s1729_s1 + $0x1b0] sm:$0xff]  ;;  %v981_v39 = vpack.c.bf16 %v120_v36, %v119_v35 }
   0xa   :  { %976 = vmatpush3.bf16.msra.mxu0 %v975_v21  ;;  %v1011_v38 = vpack.c.bf16 %v134_v33, %v133_v32  ;;  %v152_v40 = vld [vmem:[%s1729_s1 + $0x1b8] sm:$0xff]  ;;  %v103_v41 = vld [vmem:[%s1729_s1 + $0x30] sm:$0xff]  ;;  %v121_v46 = vld [vmem:[%s1729_s1 + $0xc0] sm:$0xff] }
   0xb   :  { %1008 = vmatpush3.bf16.msra.mxu1 %v1007_v25  ;;  %978 = vmatprep.subr.bf16.mxu0 %v977_v26  ;;  %v104_v42 = vld [vmem:[%s1729_s1 + $0x38] sm:$0xff]  ;;  %v1013_v43 = vpack.c.bf16 %v152_v40, %v151_v37  ;;  %v135_v44 = vld [vmem:[%s1729_s1 + $0x130] sm:$0xff]  ;;  %v122_v47 = vld [vmem:[%s1729_s1 + $0xc8] sm:$0xff] }
   0xc   :  { %1010 = vmatprep.subr.bf16.mxu1 %v1009_v30  ;;  %v136_v45 = vld [vmem:[%s1729_s1 + $0x138] sm:$0xff]  ;;  %v153_v48 = vld [vmem:[%s1729_s1 + $0x1c0] sm:$0xff]  ;;  %v154_v49 = vld [vmem:[%s1729_s1 + $0x1c8] sm:$0xff]  ;;  %v983_v50 = vpack.c.bf16 %v104_v42, %v103_v41  ;;  %v985_v52 = vpack.c.bf16 %v122_v47, %v121_v46 }
   0xd   :  { %v1015_v51 = vpack.c.bf16 %v136_v45, %v135_v44  ;;  %v105_v53 = vld [vmem:[%s1729_s1 + $0x40] sm:$0xff]  ;;  %v106_v54 = vld [vmem:[%s1729_s1 + $0x48] sm:$0xff]  ;;  %v1017_v56 = vpack.c.bf16 %v154_v49, %v153_v48  ;;  %v123_v58 = vld [vmem:[%s1729_s1 + $0xd0] sm:$0xff] }
   0xe   :  { %980 = vmatpush3.bf16.msra.mxu0 %v979_v34  ;;  %v137_v55 = vld [vmem:[%s1729_s1 + $0x140] sm:$0xff]  ;;  %v138_v57 = vld [vmem:[%s1729_s1 + $0x148] sm:$0xff]  ;;  %v124_v59 = vld [vmem:[%s1729_s1 + $0xd8] sm:$0xff]  ;;  %v987_v62 = vpack.c.bf16 %v106_v54, %v105_v53 }
   0xf   :  { %1012 = vmatpush3.bf16.msra.mxu1 %v1011_v38  ;;  %982 = vmatprep.subr.bf16.mxu0 %v981_v39  ;;  %v155_v60 = vld [vmem:[%s1729_s1 + $0x1d0] sm:$0xff]  ;;  %v156_v61 = vld [vmem:[%s1729_s1 + $0x1d8] sm:$0xff]  ;;  %v1019_v63 = vpack.c.bf16 %v138_v57, %v137_v55  ;;  %v989_v0 = vpack.c.bf16 %v124_v59, %v123_v58  ;;  %v125_v6 = vld [vmem:[%s1729_s1 + $0xe0] sm:$0xff] }
  0x10   :  { %1014 = vmatprep.subr.bf16.mxu1 %v1013_v43  ;;  %v107_v1 = vld [vmem:[%s1729_s1 + $0x50] sm:$0xff]  ;;  %v108_v2 = vld [vmem:[%s1729_s1 + $0x58] sm:$0xff]  ;;  %v1021_v4 = vpack.c.bf16 %v156_v61, %v155_v60  ;;  %v126_v7 = vld [vmem:[%s1729_s1 + $0xe8] sm:$0xff] }
  0x11   :  { %v139_v3 = vld [vmem:[%s1729_s1 + $0x150] sm:$0xff]  ;;  %v140_v5 = vld [vmem:[%s1729_s1 + $0x158] sm:$0xff]  ;;  %v157_v8 = vld [vmem:[%s1729_s1 + $0x1e0] sm:$0xff]  ;;  %v991_v10 = vpack.c.bf16 %v108_v2, %v107_v1  ;;  %v993_v14 = vpack.c.bf16 %v126_v7, %v125_v6 }
  0x12   :  { %984 = vmatpush3.bf16.msra.mxu0 %v983_v50  ;;  %v158_v9 = vld [vmem:[%s1729_s1 + $0x1e8] sm:$0xff]  ;;  %v109_v11 = vld [vmem:[%s1729_s1 + $0x60] sm:$0xff]  ;;  %v1023_v13 = vpack.c.bf16 %v140_v5, %v139_v3  ;;  %v20_v17 = vld [vmem:[%s1730_s0 + $0x18] sm:$0xff] }
  0x13   :  { %1016 = vmatpush3.bf16.msra.mxu1 %v1015_v51  ;;  %986 = vmatprep.subr.bf16.mxu0 %v985_v52  ;;  %v110_v12 = vld [vmem:[%s1729_s1 + $0x68] sm:$0xff]  ;;  %v141_v15 = vld [vmem:[%s1729_s1 + $0x160] sm:$0xff]  ;;  %v1025_v18 = vpack.c.bf16 %v158_v9, %v157_v8  ;;  %v127_v20 = vld [vmem:[%s1729_s1 + $0xf0] sm:$0xff] }
  0x14   :  { %1018 = vmatprep.subr.bf16.mxu1 %v1017_v56  ;;  %v18_v16 = vld [vmem:[%s1730_s0 + $0x8] sm:$0xff]  ;;  %v128_v21 = vld [vmem:[%s1729_s1 + $0xf8] sm:$0xff]  ;;  %v159_v22 = vld [vmem:[%s1729_s1 + $0x1f0] sm:$0xff]  ;;  %434 = vmatprep.mubr.f32.mxu1 %v20_v17  ;;  %v995_v24 = vpack.c.bf16 %v110_v12, %v109_v11 }
  0x15   :  { %v142_v19 = vld [vmem:[%s1729_s1 + $0x168] sm:$0xff]  ;;  %289 = vmatprep.mubr.f32.mxu0 %v18_v16  ;;  %v160_v23 = vld [vmem:[%s1729_s1 + $0x1f8] sm:$0xff]  ;;  %v997_v26 = vpack.c.bf16 %v128_v21, %v127_v20  ;;  %v111_v27 = vld [vmem:[%s1729_s1 + $0x70] sm:$0xff] }
  0x16   :  { %988 = vmatpush3.bf16.msra.mxu0 %v987_v62  ;;  %v1027_v25 = vpack.c.bf16 %v142_v19, %v141_v15  ;;  %v112_v28 = vld [vmem:[%s1729_s1 + $0x78] sm:$0xff]  ;;  %v143_v29 = vld [vmem:[%s1729_s1 + $0x170] sm:$0xff]  ;;  %v1029_v30 = vpack.c.bf16 %v160_v23, %v159_v22  ;;  %v161_v32 = vld [vmem:[%s1729_s1 + $0x200] sm:$0xff] }
  0x17   :  { %1020 = vmatpush3.bf16.msra.mxu1 %v1019_v63  ;;  %990 = vmatprep.subr.bf16.mxu0 %v989_v0  ;;  %v144_v31 = vld [vmem:[%s1729_s1 + $0x178] sm:$0xff]  ;;  %v162_v33 = vld [vmem:[%s1729_s1 + $0x208] sm:$0xff]  ;;  %v999_v34 = vpack.c.bf16 %v112_v28, %v111_v27  ;;  %v163_v37 = vld [vmem:[%s1729_s1 + $0x210] sm:$0xff] }
  0x18   :  { %1022 = vmatprep.subr.bf16.mxu1 %v1021_v4  ;;  %v1031_v35 = vpack.c.bf16 %v144_v31, %v143_v29  ;;  %v1033_v36 = vpack.c.bf16 %v162_v33, %v161_v32  ;;  %v164_v38 = vld [vmem:[%s1729_s1 + $0x218] sm:$0xff]  ;;  %v17_v39 = vld [vmem:[%s1730_s0] sm:$0xff]  ;;  %v19_v40 = vld [vmem:[%s1730_s0 + $0x10] sm:$0xff] }
  0x19   :  { %v23_v41 = vld [vmem:[%s1730_s0 + $0x30] sm:$0xff]  ;;  %v1037_v42 = vpack.c.bf16 %v164_v38, %v163_v37  ;;  %v25_v43 = vld [vmem:[%s1730_s0 + $0x40] sm:$0xff]  ;;  %v166_v45 = vld [vmem:[%s1729_s1 + $0x228] sm:$0xff] }
  0x1a   :  { %992 = vmatpush3.bf16.msra.mxu0 %v991_v10  ;;  %v165_v44 = vld [vmem:[%s1729_s1 + $0x220] sm:$0xff]  ;;  %v22_v46 = vld [vmem:[%s1730_s0 + $0x28] sm:$0xff]  ;;  %v24_v47 = vld [vmem:[%s1730_s0 + $0x38] sm:$0xff] }
  0x1b   :  { %1024 = vmatpush3.bf16.msra.mxu1 %v1023_v13  ;;  %994 = vmatprep.subr.bf16.mxu0 %v993_v14  ;;  %v28_v48 = vld [vmem:[%s1730_s0 + $0x58] sm:$0xff]  ;;  %v30_v49 = vld [vmem:[%s1730_s0 + $0x68] sm:$0xff]  ;;  %v1041_v50 = vpack.c.bf16 %v166_v45, %v165_v44  ;;  %v27_v51 = vld [vmem:[%s1730_s0 + $0x50] sm:$0xff] }
  0x1c   :  { %1026 = vmatprep.subr.bf16.mxu1 %v1025_v18  ;;  %v167_v52 = vld [vmem:[%s1729_s1 + $0x230] sm:$0xff]  ;;  %v29_v53 = vld [vmem:[%s1730_s0 + $0x60] sm:$0xff]  ;;  %v168_v55 = vld [vmem:[%s1729_s1 + $0x238] sm:$0xff] }
  0x1d   :  { %v33_v54 = vld [vmem:[%s1730_s0 + $0x80] sm:$0xff]  ;;  %v35_v56 = vld [vmem:[%s1730_s0 + $0x90] sm:$0xff]  ;;  %v1045_v57 = vpack.c.bf16 %v168_v55, %v167_v52  ;;  %v32_v58 = vld [vmem:[%s1730_s0 + $0x78] sm:$0xff] }
  0x1e   :  { %996 = vmatpush3.bf16.msra.mxu0 %v995_v24  ;;  %v34_v59 = vld [vmem:[%s1730_s0 + $0x88] sm:$0xff]  ;;  %v40_v61 = vld [vmem:[%s1730_s0 + $0xb8] sm:$0xff]  ;;  %v37_v62 = vld [vmem:[%s1730_s0 + $0xa0] sm:$0xff] }
  0x1f   :  { %1028 = vmatpush3.bf16.msra.mxu1 %v1027_v25  ;;  %998 = vmatprep.subr.bf16.mxu0 %v997_v26  ;;  %v38_v60 = vld [vmem:[%s1730_s0 + $0xa8] sm:$0xff]  ;;  %v39_v63 = vld [vmem:[%s1730_s0 + $0xb0] sm:$0xff]  ;;  %v45_v1 = vld [vmem:[%s1730_s0 + $0xe0] sm:$0xff] }
  0x20   :  { %1030 = vmatprep.subr.bf16.mxu1 %v1029_v30  ;;  %v43_v0 = vld [vmem:[%s1730_s0 + $0xd0] sm:$0xff]  ;;  %v42_v2 = vld [vmem:[%s1730_s0 + $0xc8] sm:$0xff]  ;;  %v44_v3 = vld [vmem:[%s1730_s0 + $0xd8] sm:$0xff] }
  0x21   :  { %v48_v4 = vld [vmem:[%s1730_s0 + $0xf8] sm:$0xff]  ;;  %v50_v5 = vld [vmem:[%s1730_s0 + $0x108] sm:$0xff]  ;;  %v47_v6 = vld [vmem:[%s1730_s0 + $0xf0] sm:$0xff] }
  0x22   :  { %1000 = vmatpush3.bf16.msra.mxu0 %v999_v34  ;;  %v49_v7 = vld [vmem:[%s1730_s0 + $0x100] sm:$0xff]  ;;  %v55_v9 = vld [vmem:[%s1730_s0 + $0x130] sm:$0xff]  ;;  %v52_v10 = vld [vmem:[%s1730_s0 + $0x118] sm:$0xff] }
  0x23   :  { %1032 = vmatpush3.bf16.msra.mxu1 %v1031_v35  ;;  %1034 = vmatprep.subr.bf16.mxu0 %v1033_v36  ;;  %v53_v8 = vld [vmem:[%s1730_s0 + $0x120] sm:$0xff]  ;;  %v54_v11 = vld [vmem:[%s1730_s0 + $0x128] sm:$0xff]  ;;  %v60_v13 = vld [vmem:[%s1730_s0 + $0x158] sm:$0xff] }
  0x24   :  { %1049 = vmatprep.subr.bf16.mxu1 %v1033_v36  ;;  %v58_v12 = vld [vmem:[%s1730_s0 + $0x148] sm:$0xff]  ;;  %v57_v14 = vld [vmem:[%s1730_s0 + $0x140] sm:$0xff]  ;;  %v59_v15 = vld [vmem:[%s1730_s0 + $0x150] sm:$0xff] }
  0x25   :  { %290 = vmatmul.mubr.f32.vlgmr.msra.gmra.mrb[0].mxu0 %v17_v39  ;;  %v63_v16 = vld [vmem:[%s1730_s0 + $0x170] sm:$0xff]  ;;  %v65_v17 = vld [vmem:[%s1730_s0 + $0x180] sm:$0xff]  ;;  %v62_v18 = vld [vmem:[%s1730_s0 + $0x168] sm:$0xff] }
  0x26   :  { %435 = vmatmul.mubr.f32.vlgmr.msra.gmra.mrb[0].mxu1 %v19_v40  ;;  %1036 = vmatpush3.bf16.msra.mxu0 %v1033_v36  ;;  %v64_v19 = vld [vmem:[%s1730_s0 + $0x178] sm:$0xff]  ;;  %v70_v21 = vld [vmem:[%s1730_s0 + $0x1a8] sm:$0xff]  ;;  %v67_v22 = vld [vmem:[%s1730_s0 + $0x190] sm:$0xff] }
  0x27   :  { %1053 = vmatpush3.bf16.msra.mxu1 %v1033_v36  ;;  %294 = vmatprep.mubr.f32.mxu0 %v23_v41  ;;  %v68_v20 = vld [vmem:[%s1730_s0 + $0x198] sm:$0xff]  ;;  %v69_v23 = vld [vmem:[%s1730_s0 + $0x1a0] sm:$0xff]  ;;  %v75_v25 = vld [vmem:[%s1730_s0 + $0x1d0] sm:$0xff] }
  0x28   :  { %439 = vmatprep.mubr.f32.mxu1 %v25_v43  ;;  %1038 = vmatprep.subr.bf16.mxu0 %v1037_v42  ;;  %v73_v24 = vld [vmem:[%s1730_s0 + $0x1c0] sm:$0xff]  ;;  %v72_v26 = vld [vmem:[%s1730_s0 + $0x1b8] sm:$0xff]  ;;  %v74_v27 = vld [vmem:[%s1730_s0 + $0x1c8] sm:$0xff] }
  0x29   :  { %295 = vmatmul.mubr.f32.gmra.mrb[2].mxu0 %v22_v46  ;;  %1050 = vmatprep.subr.bf16.mxu1 %v1037_v42  ;;  %v78_v28 = vld [vmem:[%s1730_s0 + $0x1e8] sm:$0xff]  ;;  %v80_v29 = vld [vmem:[%s1730_s0 + $0x1f8] sm:$0xff]  ;;  %v77_v30 = vld [vmem:[%s1730_s0 + $0x1e0] sm:$0xff] }
  0x2a   :  { %440 = vmatmul.mubr.f32.gmra.mrb[2].mxu1 %v24_v47  ;;  %299 = vmatprep.mubr.f32.mxu0 %v28_v48  ;;  %v79_v31 = vld [vmem:[%s1730_s0 + $0x1f0] sm:$0xff]  ;;  %v85_v33 = vld [vmem:[%s1730_s0 + $0x220] sm:$0xff]  ;;  %v82_v34 = vld [vmem:[%s1730_s0 + $0x208] sm:$0xff] }
  0x2b   :  { %444 = vmatprep.mubr.f32.mxu1 %v30_v49  ;;  %1040 = vmatpush3.bf16.msra.mxu0 %v1037_v42  ;;  %v83_v32 = vld [vmem:[%s1730_s0 + $0x210] sm:$0xff]  ;;  %v84_v35 = vld [vmem:[%s1730_s0 + $0x218] sm:$0xff]  ;;  %v90_v37 = vld [vmem:[%s1730_s0 + $0x248] sm:$0xff] }
  0x2c   :  { %1054 = vmatpush3.bf16.msra.mxu1 %v1037_v42  ;;  %1042 = vmatprep.subr.bf16.mxu0 %v1041_v50  ;;  %v88_v36 = vld [vmem:[%s1730_s0 + $0x238] sm:$0xff]  ;;  %v87_v38 = vld [vmem:[%s1730_s0 + $0x230] sm:$0xff]  ;;  %v89_v39 = vld [vmem:[%s1730_s0 + $0x240] sm:$0xff] }
  0x2d   :  { %300 = vmatmul.mubr.f32.gmra.mrb[4].mxu0 %v27_v51  ;;  %1051 = vmatprep.subr.bf16.mxu1 %v1041_v50  ;;  %v93_v40 = vld [vmem:[%s1730_s0 + $0x260] sm:$0xff]  ;;  %v95_v41 = vld [vmem:[%s1730_s0 + $0x270] sm:$0xff]  ;;  %v92_v42 = vld [vmem:[%s1730_s0 + $0x258] sm:$0xff] }
  0x2e   :  { %445 = vmatmul.mubr.f32.gmra.mrb[4].mxu1 %v29_v53  ;;  %304 = vmatprep.mubr.f32.mxu0 %v33_v54  ;;  %v94_v43 = vld [vmem:[%s1730_s0 + $0x268] sm:$0xff]  ;;  %v21_v44 = vld [vmem:[%s1730_s0 + $0x20] sm:$0xff]  ;;  %v31_v48 = vld [vmem:[%s1730_s0 + $0x70] sm:$0xff] }
  0x2f   :  { %449 = vmatprep.mubr.f32.mxu1 %v35_v56  ;;  %1044 = vmatpush3.bf16.msra.mxu0 %v1041_v50  ;;  %v61_v45 = vld [vmem:[%s1730_s0 + $0x160] sm:$0xff]  ;;  %v26_v46 = vld [vmem:[%s1730_s0 + $0x48] sm:$0xff]  ;;  %v71_v49 = vld [vmem:[%s1730_s0 + $0x1b0] sm:$0xff] }
  0x30   :  { %1055 = vmatpush3.bf16.msra.mxu1 %v1041_v50  ;;  %1046 = vmatprep.subr.bf16.mxu0 %v1045_v57  ;;  %v66_v47 = vld [vmem:[%s1730_s0 + $0x188] sm:$0xff]  ;;  %v36_v50 = vld [vmem:[%s1730_s0 + $0x98] sm:$0xff]  ;;  %v41_v52 = vld [vmem:[%s1730_s0 + $0xc0] sm:$0xff] }
  0x31   :  { %305 = vmatmul.mubr.f32.gmra.mrb[6].mxu0 %v32_v58  ;;  %1052 = vmatprep.subr.bf16.mxu1 %v1045_v57  ;;  %v76_v51 = vld [vmem:[%s1730_s0 + $0x1d8] sm:$0xff]  ;;  %v81_v53 = vld [vmem:[%s1730_s0 + $0x200] sm:$0xff]  ;;  %v46_v54 = vld [vmem:[%s1730_s0 + $0xe8] sm:$0xff] }
  0x32   :  { %450 = vmatmul.mubr.f32.gmra.mrb[6].mxu1 %v34_v59  ;;  %309 = vmatprep.mubr.f32.mxu0 %v38_v60  ;;  %v86_v55 = vld [vmem:[%s1730_s0 + $0x228] sm:$0xff]  ;;  %v51_v56 = vld [vmem:[%s1730_s0 + $0x110] sm:$0xff]  ;;  %v56_v58 = vld [vmem:[%s1730_s0 + $0x138] sm:$0xff] }
  0x33   :  { %454 = vmatprep.mubr.f32.mxu1 %v40_v61  ;;  %1048 = vmatpush3.bf16.msra.mxu0 %v1045_v57  ;;  %v96_v59 = vld [vmem:[%s1730_s0 + $0x278] sm:$0xff] }
  0x34   :  { %1056 = vmatpush3.bf16.msra.mxu1 %v1045_v57  ;;  %v91_v57 = vld [vmem:[%s1730_s0 + $0x250] sm:$0xff] }
  0x35   :  { %310 = vmatmul.mubr.f32.gmra.mrb[8].mxu0 %v37_v62  ;;  %v1557_v62 = vld [vmem:[%s1731_s2] ss:$0 sm:$0xff] }
  0x36   :  { %455 = vmatmul.mubr.f32.gmra.mrb[8].mxu1 %v39_v63  ;;  %314 = vmatprep.mubr.f32.mxu0 %v43_v0 }
  0x37   :  { %459 = vmatprep.mubr.f32.mxu1 %v45_v1 }
  0x39   :  { %315 = vmatmul.mubr.f32.gmra.mrb[10].mxu0 %v42_v2 }
  0x3a   :  { %460 = vmatmul.mubr.f32.gmra.mrb[10].mxu1 %v44_v3  ;;  %319 = vmatprep.mubr.f32.mxu0 %v48_v4 }
  0x3b   :  { %464 = vmatprep.mubr.f32.mxu1 %v50_v5 }
  0x3d   :  { %320 = vmatmul.mubr.f32.gmra.mrb[12].mxu0 %v47_v6 }
  0x3e   :  { %465 = vmatmul.mubr.f32.gmra.mrb[12].mxu1 %v49_v7  ;;  %324 = vmatprep.mubr.f32.mxu0 %v53_v8 }
  0x3f   :  { %469 = vmatprep.mubr.f32.mxu1 %v55_v9 }
  0x41   :  { %325 = vmatmul.mubr.f32.gmra.mrb[14].mxu0 %v52_v10 }
  0x42   :  { %470 = vmatmul.mubr.f32.gmra.mrb[14].mxu1 %v54_v11  ;;  %329 = vmatprep.mubr.f32.mxu0 %v58_v12 }
  0x43   :  { %474 = vmatprep.mubr.f32.mxu1 %v60_v13 }
  0x45   :  { %330 = vmatmul.mubr.f32.gmra.mrb[16].mxu0 %v57_v14 }
  0x46   :  { %475 = vmatmul.mubr.f32.gmra.mrb[16].mxu1 %v59_v15  ;;  %334 = vmatprep.mubr.f32.mxu0 %v63_v16 }
  0x47   :  { %479 = vmatprep.mubr.f32.mxu1 %v65_v17 }
  0x49   :  { %335 = vmatmul.mubr.f32.gmra.mrb[18].mxu0 %v62_v18 }
  0x4a   :  { %480 = vmatmul.mubr.f32.gmra.mrb[18].mxu1 %v64_v19  ;;  %339 = vmatprep.mubr.f32.mxu0 %v68_v20 }
  0x4b   :  { %484 = vmatprep.mubr.f32.mxu1 %v70_v21 }
  0x4d   :  { %340 = vmatmul.mubr.f32.gmra.mrb[20].mxu0 %v67_v22 }
  0x4e   :  { %485 = vmatmul.mubr.f32.gmra.mrb[20].mxu1 %v69_v23  ;;  %344 = vmatprep.mubr.f32.mxu0 %v73_v24 }
  0x4f   :  { %489 = vmatprep.mubr.f32.mxu1 %v75_v25 }
  0x51   :  { %345 = vmatmul.mubr.f32.gmra.mrb[22].mxu0 %v72_v26 }
  0x52   :  { %490 = vmatmul.mubr.f32.gmra.mrb[22].mxu1 %v74_v27  ;;  %349 = vmatprep.mubr.f32.mxu0 %v78_v28 }
  0x53   :  { %494 = vmatprep.mubr.f32.mxu1 %v80_v29 }
  0x55   :  { %350 = vmatmul.mubr.f32.gmra.mrb[24].mxu0 %v77_v30 }
  0x56   :  { %495 = vmatmul.mubr.f32.gmra.mrb[24].mxu1 %v79_v31  ;;  %354 = vmatprep.mubr.f32.mxu0 %v83_v32 }
  0x57   :  { %499 = vmatprep.mubr.f32.mxu1 %v85_v33 }
  0x59   :  { %355 = vmatmul.mubr.f32.gmra.mrb[26].mxu0 %v82_v34 }
  0x5a   :  { %500 = vmatmul.mubr.f32.gmra.mrb[26].mxu1 %v84_v35  ;;  %359 = vmatprep.mubr.f32.mxu0 %v88_v36 }
  0x5b   :  { %504 = vmatprep.mubr.f32.mxu1 %v90_v37 }
  0x5d   :  { %360 = vmatmul.mubr.f32.gmra.mrb[28].mxu0 %v87_v38 }
  0x5e   :  { %505 = vmatmul.mubr.f32.gmra.mrb[28].mxu1 %v89_v39  ;;  %364 = vmatprep.mubr.f32.mxu0 %v93_v40 }
  0x5f   :  { %509 = vmatprep.mubr.f32.mxu1 %v95_v41 }
  0x61   :  { %365 = vmatmul.mubr.f32.gmra.mrb[30].mxu0 %v92_v42 }
  0x62   :  { %510 = vmatmul.mubr.f32.gmra.mrb[30].mxu1 %v94_v43  ;;  %945 = vmatprep.mubr.msk.f32.mxu0 %vm176_vm0, %v21_v44 }
  0x63   :  { %957 = vmatprep.mubr.msk.f32.mxu1 %vm176_vm0, %v61_v45 }
  0x65   :  { %946 = vmatmul.mubr.msk.f32.vlgmr.msra.gmra.mrb[32].mxu0 %vm176_vm0, %v26_v46 }
  0x66   :  { %958 = vmatmul.mubr.msk.f32.vlgmr.msra.gmra.mrb[32].mxu1 %vm176_vm0, %v66_v47  ;;  %948 = vmatprep.mubr.msk.f32.mxu0 %vm176_vm0, %v31_v48 }
  0x67   :  { %960 = vmatprep.mubr.msk.f32.mxu1 %vm176_vm0, %v71_v49 }
  0x69   :  { %949 = vmatmul.mubr.msk.f32.gmra.mrb[34].mxu0 %vm176_vm0, %v36_v50 }
  0x6a   :  { %961 = vmatmul.mubr.msk.f32.gmra.mrb[34].mxu1 %vm176_vm0, %v76_v51  ;;  %951 = vmatprep.mubr.msk.f32.mxu0 %vm176_vm0, %v41_v52 }
  0x6b   :  { %963 = vmatprep.mubr.msk.f32.mxu1 %vm176_vm0, %v81_v53 }
  0x6d   :  { %952 = vmatmul.mubr.msk.f32.gmra.mrb[36].mxu0 %vm176_vm0, %v46_v54 }
  0x6e   :  { %964 = vmatmul.mubr.msk.f32.gmra.mrb[36].mxu1 %vm176_vm0, %v86_v55  ;;  %954 = vmatprep.mubr.msk.f32.mxu0 %vm176_vm0, %v51_v56 }
  0x6f   :  { %966 = vmatprep.mubr.msk.f32.mxu1 %vm176_vm0, %v91_v57 }
  0x71   :  { %955 = vmatmul.mubr.msk.f32.gmra.mrb[38].mxu0 %vm176_vm0, %v56_v58 }
  0x72   :  { %967 = vmatmul.mubr.msk.f32.gmra.mrb[38].mxu1 %vm176_vm0, %v96_v59 }
  0xf8   :  { %v777_v60 = vpop.f32.mrb[0].mxu0 }
  0xf9   :  { %v857_v61 = vpop.f32.mrb[0].mxu1  ;;  %v778_v63 = vpop.f32.mrb[1].mxu0 }
  0xfa   :  { %v779_v0 = vadd.f32 %v778_v63, %v777_v60  ;;  %v858_v1 = vpop.f32.mrb[1].mxu1 }
  0xfb   :  { %v859_v2 = vadd.f32 %v858_v1, %v857_v61 }
  0xfc   :  { %v292_v3 = vadd.f32 %v779_v0, %v1557_v62  ;;  %v780_v4 = vpop.f32.mrb[2].mxu0 }
  0xfd   :  { %v860_v5 = vpop.f32.mrb[2].mxu1  ;;  %v781_v6 = vpop.f32.mrb[3].mxu0 }
  0xfe   :  { %v782_v7 = vadd.f32 %v781_v6, %v780_v4  ;;  %v861_v8 = vpop.f32.mrb[3].mxu1  ;;  %v1560_v9 = vadd.f32 %v859_v2, %v292_v3 }
  0xff   :  { %v862_v10 = vadd.f32 %v861_v8, %v860_v5 }
 0x100   :  { %v297_v11 = vadd.f32 %v782_v7, %v1557_v62  ;;  %v783_v12 = vpop.f32.mrb[4].mxu0 }
 0x101   :  { %v863_v13 = vpop.f32.mrb[4].mxu1  ;;  %v784_v14 = vpop.f32.mrb[5].mxu0 }
 0x102   :  { %v785_v15 = vadd.f32 %v784_v14, %v783_v12  ;;  %v864_v16 = vpop.f32.mrb[5].mxu1  ;;  %v1563_v17 = vadd.f32 %v862_v10, %v297_v11 }
 0x103   :  { %v865_v18 = vadd.f32 %v864_v16, %v863_v13 }
 0x104   :  { %v302_v19 = vadd.f32 %v785_v15, %v1557_v62  ;;  %v786_v20 = vpop.f32.mrb[6].mxu0 }
 0x105   :  { %v866_v21 = vpop.f32.mrb[6].mxu1  ;;  %v787_v22 = vpop.f32.mrb[7].mxu0 }
 0x106   :  { %v788_v23 = vadd.f32 %v787_v22, %v786_v20  ;;  %v867_v24 = vpop.f32.mrb[7].mxu1  ;;  %v1566_v25 = vadd.f32 %v865_v18, %v302_v19 }
 0x107   :  { %v868_v26 = vadd.f32 %v867_v24, %v866_v21 }
 0x108   :  { %v307_v27 = vadd.f32 %v788_v23, %v1557_v62  ;;  %v789_v28 = vpop.f32.mrb[8].mxu0 }
 0x109   :  { %v869_v29 = vpop.f32.mrb[8].mxu1  ;;  %v790_v30 = vpop.f32.mrb[9].mxu0 }
 0x10a   :  { %v791_v31 = vadd.f32 %v790_v30, %v789_v28  ;;  %v870_v32 = vpop.f32.mrb[9].mxu1  ;;  %v1569_v33 = vadd.f32 %v868_v26, %v307_v27 }
 0x10b   :  { %v871_v34 = vadd.f32 %v870_v32, %v869_v29 }
 0x10c   :  { %v312_v35 = vadd.f32 %v791_v31, %v1557_v62  ;;  %v792_v36 = vpop.f32.mrb[10].mxu0 }
 0x10d   :  { %v872_v37 = vpop.f32.mrb[10].mxu1  ;;  %v793_v38 = vpop.f32.mrb[11].mxu0 }
 0x10e   :  { %v794_v39 = vadd.f32 %v793_v38, %v792_v36  ;;  %v873_v40 = vpop.f32.mrb[11].mxu1  ;;  %v1572_v41 = vadd.f32 %v871_v34, %v312_v35 }
 0x10f   :  { %v874_v42 = vadd.f32 %v873_v40, %v872_v37 }
 0x110   :  { %v317_v43 = vadd.f32 %v794_v39, %v1557_v62  ;;  %v795_v44 = vpop.f32.mrb[12].mxu0 }
 0x111   :  { %v875_v45 = vpop.f32.mrb[12].mxu1  ;;  %v796_v46 = vpop.f32.mrb[13].mxu0 }
 0x112   :  { %v797_v47 = vadd.f32 %v796_v46, %v795_v44  ;;  %v876_v48 = vpop.f32.mrb[13].mxu1  ;;  %v1575_v49 = vadd.f32 %v874_v42, %v317_v43 }
 0x113   :  { %v877_v50 = vadd.f32 %v876_v48, %v875_v45 }
 0x114   :  { %v322_v51 = vadd.f32 %v797_v47, %v1557_v62  ;;  %v798_v52 = vpop.f32.mrb[14].mxu0 }
 0x115   :  { %v878_v53 = vpop.f32.mrb[14].mxu1  ;;  %v799_v54 = vpop.f32.mrb[15].mxu0 }
 0x116   :  { %v800_v55 = vadd.f32 %v799_v54, %v798_v52  ;;  %v879_v56 = vpop.f32.mrb[15].mxu1  ;;  %v1578_v57 = vadd.f32 %v877_v50, %v322_v51 }
 0x117   :  { %v880_v58 = vadd.f32 %v879_v56, %v878_v53 }
 0x118   :  { %v327_v59 = vadd.f32 %v800_v55, %v1557_v62  ;;  %v801_v60 = vpop.f32.mrb[16].mxu0 }
 0x119   :  { %v881_v61 = vpop.f32.mrb[16].mxu1  ;;  %v802_v63 = vpop.f32.mrb[17].mxu0 }
 0x11a   :  { %v803_v0 = vadd.f32 %v802_v63, %v801_v60  ;;  %v882_v1 = vpop.f32.mrb[17].mxu1  ;;  %v1581_v2 = vadd.f32 %v880_v58, %v327_v59 }
 0x11b   :  { %v883_v3 = vadd.f32 %v882_v1, %v881_v61 }
 0x11c   :  { %v332_v4 = vadd.f32 %v803_v0, %v1557_v62  ;;  %v804_v5 = vpop.f32.mrb[18].mxu0 }
 0x11d   :  { %v884_v6 = vpop.f32.mrb[18].mxu1  ;;  %v805_v7 = vpop.f32.mrb[19].mxu0 }
 0x11e   :  { %v806_v8 = vadd.f32 %v805_v7, %v804_v5  ;;  %v885_v10 = vpop.f32.mrb[19].mxu1  ;;  %v1584_v11 = vadd.f32 %v883_v3, %v332_v4  ;;  %v661_v7 = vld [vmem:[%s1732_s3 + $0x8] sm:$0xff] }
 0x11f   :  { %v886_v12 = vadd.f32 %v885_v10, %v884_v6 }
 0x120   :  { %v337_v13 = vadd.f32 %v806_v8, %v1557_v62  ;;  %v807_v14 = vpop.f32.mrb[20].mxu0 }
 0x121   :  { %v887_v15 = vpop.f32.mrb[20].mxu1  ;;  %v808_v16 = vpop.f32.mrb[21].mxu0 }
 0x122   :  { %v809_v18 = vadd.f32 %v808_v16, %v807_v14  ;;  %v888_v19 = vpop.f32.mrb[21].mxu1  ;;  %v482_v20 = vadd.f32 %v886_v12, %v337_v13  ;;  %v669_v12 = vld [vmem:[%s1732_s3 + $0x48] sm:$0xff]  ;;  %v660_v14 = vld [vmem:[%s1732_s3] sm:$0xff] }
 0x123   :  { %v889_v21 = vadd.f32 %v888_v19, %v887_v15 }
 0x124   :  { %v342_v22 = vadd.f32 %v809_v18, %v1557_v62  ;;  %v810_v23 = vpop.f32.mrb[22].mxu0  ;;  %v668_v18 = vld [vmem:[%s1732_s3 + $0x40] sm:$0xff] }
 0x125   :  { %v890_v24 = vpop.f32.mrb[22].mxu1  ;;  %v811_v26 = vpop.f32.mrb[23].mxu0 }
 0x126   :  { %v812_v27 = vadd.f32 %v811_v26, %v810_v23  ;;  %v891_v28 = vpop.f32.mrb[23].mxu1  ;;  %v1588_v29 = vadd.f32 %v889_v21, %v342_v22  ;;  %v663_v26 = vld [vmem:[%s1732_s3 + $0x18] sm:$0xff] }
 0x127   :  { %v892_v30 = vadd.f32 %v891_v28, %v890_v24 }
 0x128   :  { %v347_v31 = vadd.f32 %v812_v27, %v1557_v62  ;;  %v813_v32 = vpop.f32.mrb[24].mxu0 }
 0x129   :  { %v893_v34 = vpop.f32.mrb[24].mxu1  ;;  %v814_v35 = vpop.f32.mrb[25].mxu0 }
 0x12a   :  { %v815_v36 = vadd.f32 %v814_v35, %v813_v32  ;;  %v894_v37 = vpop.f32.mrb[25].mxu1  ;;  %v492_v38 = vadd.f32 %v892_v30, %v347_v31  ;;  %v671_v30 = vld [vmem:[%s1732_s3 + $0x58] sm:$0xff] }
 0x12b   :  { %v895_v39 = vadd.f32 %v894_v37, %v893_v34 }
 0x12c   :  { %v352_v40 = vadd.f32 %v815_v36, %v1557_v62  ;;  %v816_v42 = vpop.f32.mrb[26].mxu0 }
 0x12d   :  { %v896_v43 = vpop.f32.mrb[26].mxu1  ;;  %v817_v44 = vpop.f32.mrb[27].mxu0 }
 0x12e   :  { %v818_v45 = vadd.f32 %v817_v44, %v816_v42  ;;  %v897_v46 = vpop.f32.mrb[27].mxu1  ;;  %v1592_v47 = vadd.f32 %v895_v39, %v352_v40  ;;  %v665_v44 = vld [vmem:[%s1732_s3 + $0x28] sm:$0xff] }
 0x12f   :  { %v898_v48 = vadd.f32 %v897_v46, %v896_v43 }
 0x130   :  { %v357_v50 = vadd.f32 %v818_v45, %v1557_v62  ;;  %v819_v51 = vpop.f32.mrb[28].mxu0 }
 0x131   :  { %v899_v52 = vpop.f32.mrb[28].mxu1  ;;  %v820_v53 = vpop.f32.mrb[29].mxu0 }
 0x132   :  { %v821_v54 = vadd.f32 %v820_v53, %v819_v51  ;;  %v900_v55 = vpop.f32.mrb[29].mxu1  ;;  %v1595_v56 = vadd.f32 %v898_v48, %v357_v50  ;;  %v673_v50 = vld [vmem:[%s1732_s3 + $0x68] sm:$0xff] }
 0x133   :  { %v901_v58 = vadd.f32 %v900_v55, %v899_v52  ;;  %v664_v52 = vld [vmem:[%s1732_s3 + $0x20] sm:$0xff] }
 0x134   :  { %v362_v59 = vadd.f32 %v821_v54, %v1557_v62  ;;  %v822_v60 = vpop.f32.mrb[30].mxu0 }
 0x135   :  { %v902_v61 = vpop.f32.mrb[30].mxu1  ;;  %v823_v63 = vpop.f32.mrb[31].mxu0 }
 0x136   :  { %v824_v0 = vadd.f32 %v823_v63, %v822_v60  ;;  %v903_v1 = vpop.f32.mrb[31].mxu1  ;;  %v1598_v3 = vadd.f32 %v901_v58, %v362_v59 }
 0x137   :  { %v904_v4 = vadd.f32 %v903_v1, %v902_v61  ;;  %v667_v1 = vld [vmem:[%s1732_s3 + $0x38] sm:$0xff] }
 0x138   :  { %v367_v5 = vadd.f32 %v824_v0, %v1557_v62  ;;  %v947_v6 = vpop.f32.mrb[32].mxu0 }
 0x139   :  { %v587_v8 = vadd.f32 %v947_v6, %v1563_v17  ;;  %v959_v10 = vpop.f32.mrb[32].mxu1  ;;  %v581_v13 = vpop.f32.mrb[33].mxu0 }
 0x13a   :  { %v627_v15 = vadd.f32 %v959_v10, %v482_v20  ;;  %v582_v62 = vadd.f32 %v581_v13, %v1560_v9  ;;  %v621_v16 = vpop.f32.mrb[33].mxu1  ;;  %v1615_v19 = vadd.f32 %v904_v4, %v367_v5  ;;  %v666_v10 = vld [vmem:[%s1732_s3 + $0x30] sm:$0xff] }
 0x13b   :  { %v677_v17 = vadd.f32 %v661_v7, %v587_v8  ;;  %v622_v21 = vadd.f32 %v621_v16, %v1584_v11  ;;  %v662_v11 = vld [vmem:[%s1732_s3 + $0x10] sm:$0xff]  ;;  %v675_v7 = vld [vmem:[%s1732_s3 + $0x78] sm:$0xff] }
 0x13c   :  { %v685_v22 = vadd.f32 %v669_v12, %v627_v15  ;;  %v676_v23 = vadd.f32 %v660_v14, %v582_v62  ;;  %v950_v24 = vpop.f32.mrb[34].mxu0 }
 0x13d   :  { %v693_v20 = vmax.f32 %v677_v17, 0.0  ;;  %v684_v27 = vadd.f32 %v668_v18, %v622_v21  ;;  %v597_v9 = vadd.f32 %v950_v24, %v1569_v33  ;;  %v962_v28 = vpop.f32.mrb[34].mxu1  ;;  %v591_v31 = vpop.f32.mrb[35].mxu0  ;;  %v670_v33 = vld [vmem:[%s1732_s3 + $0x50] sm:$0xff] }
 0x13e   :  { %v701_v32 = vmax.f32 %v685_v22, 0.0  ;;  %v692_v34 = vmax.f32 %v676_v23, 0.0  ;;  %v637_v35 = vadd.f32 %v962_v28, %v492_v38  ;;  %v592_v36 = vadd.f32 %v591_v31, %v1566_v25  ;;  %v631_v37 = vpop.f32.mrb[35].mxu1 }
 0x13f   :  { %709 = vst.msk [vmem:[%s1733_s4 + $0x8] sm:$0xff] %vm176_vm0, %v693_v20  ;;  %v700_v39 = vmax.f32 %v684_v27, 0.0  ;;  %v679_v40 = vadd.f32 %v663_v26, %v597_v9  ;;  %v632_v42 = vadd.f32 %v631_v37, %v1588_v29 }
 0x140   :  { %717 = vst.msk [vmem:[%s1733_s4 + $0x48] sm:$0xff] %vm176_vm0, %v701_v32  ;;  %708 = vst.msk [vmem:[%s1733_s4] sm:$0xff] %vm176_vm0, %v692_v34  ;;  %v687_v25 = vadd.f32 %v671_v30, %v637_v35  ;;  %v678_v38 = vadd.f32 %v662_v11, %v592_v36  ;;  %v953_v43 = vpop.f32.mrb[36].mxu0 }
 0x141   :  { %716 = vst.msk [vmem:[%s1733_s4 + $0x40] sm:$0xff] %vm176_vm0, %v700_v39  ;;  %v695_v29 = vmax.f32 %v679_v40, 0.0  ;;  %v686_v45 = vadd.f32 %v670_v33, %v632_v42  ;;  %v607_v46 = vadd.f32 %v953_v43, %v1575_v49  ;;  %v965_v48 = vpop.f32.mrb[36].mxu1  ;;  %v601_v51 = vpop.f32.mrb[37].mxu0  ;;  %v672_v49 = vld [vmem:[%s1732_s3 + $0x60] sm:$0xff] }
 0x142   :  { %v703_v53 = vmax.f32 %v687_v25, 0.0  ;;  %v694_v54 = vmax.f32 %v678_v38, 0.0  ;;  %v647_v55 = vadd.f32 %v965_v48, %v1595_v56  ;;  %v602_v58 = vadd.f32 %v601_v51, %v1572_v41  ;;  %v641_v59 = vpop.f32.mrb[37].mxu1 }
 0x143   :  { %711 = vst.msk [vmem:[%s1733_s4 + $0x18] sm:$0xff] %vm176_vm0, %v695_v29  ;;  %v702_v60 = vmax.f32 %v686_v45, 0.0  ;;  %v681_v61 = vadd.f32 %v665_v44, %v607_v46  ;;  %v642_v63 = vadd.f32 %v641_v59, %v1592_v47 }
 0x144   :  { %719 = vst.msk [vmem:[%s1733_s4 + $0x58] sm:$0xff] %vm176_vm0, %v703_v53  ;;  %710 = vst.msk [vmem:[%s1733_s4 + $0x10] sm:$0xff] %vm176_vm0, %v694_v54  ;;  %v689_v41 = vadd.f32 %v673_v50, %v647_v55  ;;  %v680_v56 = vadd.f32 %v664_v52, %v602_v58  ;;  %v956_v0 = vpop.f32.mrb[38].mxu0 }
 0x145   :  { %718 = vst.msk [vmem:[%s1733_s4 + $0x50] sm:$0xff] %vm176_vm0, %v702_v60  ;;  %v697_v47 = vmax.f32 %v681_v61, 0.0  ;;  %v688_v4 = vadd.f32 %v672_v49, %v642_v63  ;;  %v617_v5 = vadd.f32 %v956_v0, %v1581_v2  ;;  %v968_v6 = vpop.f32.mrb[38].mxu1  ;;  %v611_v8 = vpop.f32.mrb[39].mxu0  ;;  %v674_v2 = vld [vmem:[%s1732_s3 + $0x70] sm:$0xff] }
 0x146   :  { %v705_v12 = vmax.f32 %v689_v41, 0.0  ;;  %v696_v13 = vmax.f32 %v680_v56, 0.0  ;;  %v657_v14 = vadd.f32 %v968_v6, %v1615_v19  ;;  %v612_v15 = vadd.f32 %v611_v8, %v1578_v57  ;;  %v651_v62 = vpop.f32.mrb[39].mxu1 }
 0x147   :  { %713 = vst.msk [vmem:[%s1733_s4 + $0x28] sm:$0xff] %vm176_vm0, %v697_v47  ;;  %v704_v16 = vmax.f32 %v688_v4, 0.0  ;;  %v683_v18 = vadd.f32 %v667_v1, %v617_v5  ;;  %v652_v17 = vadd.f32 %v651_v62, %v1598_v3 }
 0x148   :  { %721 = vst.msk [vmem:[%s1733_s4 + $0x68] sm:$0xff] %vm176_vm0, %v705_v12  ;;  %712 = vst.msk [vmem:[%s1733_s4 + $0x20] sm:$0xff] %vm176_vm0, %v696_v13  ;;  %v691_v57 = vadd.f32 %v675_v7, %v657_v14  ;;  %v682_v19 = vadd.f32 %v666_v10, %v612_v15 }
 0x149   :  { %720 = vst.msk [vmem:[%s1733_s4 + $0x60] sm:$0xff] %vm176_vm0, %v704_v16  ;;  %v699_v21 = vmax.f32 %v683_v18, 0.0  ;;  %v690_v22 = vadd.f32 %v674_v2, %v652_v17 }
 0x14a   :  { %v707_v3 = vmax.f32 %v691_v57, 0.0  ;;  %v698_v23 = vmax.f32 %v682_v19, 0.0 }
 0x14b   :  { %715 = vst.msk [vmem:[%s1733_s4 + $0x38] sm:$0xff] %vm176_vm0, %v699_v21  ;;  %v706_v24 = vmax.f32 %v690_v22, 0.0 }
 0x14c   :  { %723 = vst.msk [vmem:[%s1733_s4 + $0x78] sm:$0xff] %vm176_vm0, %v707_v3  ;;  %714 = vst.msk [vmem:[%s1733_s4 + $0x30] sm:$0xff] %vm176_vm0, %v698_v23 }
 0x14d   :  { %722 = vst.msk [vmem:[%s1733_s4 + $0x70] sm:$0xff] %vm176_vm0, %v706_v24 }

// kernel: resnet_itta_forward.14
= control target key start
LH: loop header
LB: loop body
LE: loop exit
PB: predicated region body
PF: predicated region fallthrough
CT: control target
= control target key end

     0   :  { %vm26_vm0 = vcmask 523264   ;;  %vm349_vm1 = vcmask 516096   ;;  %s604_s0 = inlined_call_operand.vmem [shape: f32[2,8,8,64], index: 0, kind: input, shape index: {}]   ;;  %s605_s1 = inlined_call_operand.vmem [shape: f32[2,1,1,64], index: 1, kind: output, shape index: {0}]   ;;  %s606_s2 = inlined_call_operand.vmem [shape: f32[2,1,1,64], index: 2, kind: output, shape index: {1}]  }
   0x1   :  { %v400_v0 = vld [vmem:[%s604_s0] sm:$0xff]  ;;  %v405_v1 = vld [vmem:[%s604_s0 + $0x8] sm:$0xff]  ;;  %v410_v2 = vld [vmem:[%s604_s0 + $0x10] sm:$0xff] }
   0x2   :  { %v415_v3 = vld [vmem:[%s604_s0 + $0x18] sm:$0xff]  ;;  %v420_v4 = vld [vmem:[%s604_s0 + $0x20] sm:$0xff]  ;;  %v425_v5 = vld [vmem:[%s604_s0 + $0x28] sm:$0xff]  ;;  %v27_v6 = vsel %vm26_vm0, %v400_v0, 0.0  ;;  %v34_v7 = vsel %vm26_vm0, %v405_v1, 0.0  ;;  %v41_v8 = vsel %vm26_vm0, %v410_v2, 0.0 }
   0x3   :  { %v436_v9 = vld [vmem:[%s604_s0 + $0x30] sm:$0xff]  ;;  %v441_v10 = vld [vmem:[%s604_s0 + $0x38] sm:$0xff]  ;;  %v28_v11 = vrot.slane %v27_v6, 4  ;;  %v35_v12 = vrot.slane %v34_v7, 4  ;;  %v42_v13 = vrot.slane %v41_v8, 4  ;;  %v48_v14 = vsel %vm26_vm0, %v415_v3, 0.0 }
   0x4   :  { %v55_v15 = vsel %vm26_vm0, %v420_v4, 0.0  ;;  %v62_v16 = vsel %vm26_vm0, %v425_v5, 0.0  ;;  %v49_v20 = vrot.slane %v48_v14, 4  ;;  %v69_v23 = vsel %vm26_vm0, %v436_v9, 0.0  ;;  %v456_v43 = vld [vmem:[%s604_s0 + $0x40] sm:$0xff]  ;;  %v461_v44 = vld [vmem:[%s604_s0 + $0x48] sm:$0xff] }
   0x5   :  { %v29_v17 = vadd.f32 %v28_v11, %v27_v6  ;;  %v36_v18 = vadd.f32 %v35_v12, %v34_v7  ;;  %v43_v19 = vadd.f32 %v42_v13, %v41_v8  ;;  %v56_v21 = vrot.slane %v55_v15, 4  ;;  %v466_v45 = vld [vmem:[%s604_s0 + $0x50] sm:$0xff]  ;;  %v473_v50 = vld [vmem:[%s604_s0 + $0x58] sm:$0xff]  ;;  %v480_v54 = vld [vmem:[%s604_s0 + $0x60] sm:$0xff] }
   0x6   :  { %v63_v22 = vrot.slane %v62_v16, 4  ;;  %v76_v24 = vsel %vm26_vm0, %v441_v10, 0.0  ;;  %v50_v28 = vadd.f32 %v49_v20, %v48_v14  ;;  %v70_v31 = vrot.slane %v69_v23, 4  ;;  %v491_v59 = vld [vmem:[%s604_s0 + $0x68] sm:$0xff]  ;;  %v497_v6 = vld [vmem:[%s604_s0 + $0x70] sm:$0xff]  ;;  %v502_v7 = vld [vmem:[%s604_s0 + $0x78] sm:$0xff] }
   0x7   :  { %v30_v25 = vrot.slane %v29_v17, 2  ;;  %v37_v26 = vrot.slane %v36_v18, 2  ;;  %v44_v27 = vrot.slane %v43_v19, 2  ;;  %v57_v29 = vadd.f32 %v56_v21, %v55_v15 }
   0x8   :  { %v64_v30 = vadd.f32 %v63_v22, %v62_v16  ;;  %v77_v32 = vrot.slane %v76_v24, 4  ;;  %v51_v36 = vrot.slane %v50_v28, 2  ;;  %v71_v39 = vadd.f32 %v70_v31, %v69_v23 }
   0x9   :  { %v31_v33 = vadd.f32 %v30_v25, %v29_v17  ;;  %v38_v34 = vadd.f32 %v37_v26, %v36_v18  ;;  %v45_v35 = vadd.f32 %v44_v27, %v43_v19  ;;  %v58_v37 = vrot.slane %v57_v29, 2 }
   0xa   :  { %v65_v38 = vrot.slane %v64_v30, 2  ;;  %v78_v40 = vadd.f32 %v77_v32, %v76_v24  ;;  %v52_v47 = vadd.f32 %v51_v36, %v50_v28  ;;  %v72_v52 = vrot.slane %v71_v39, 2 }
   0xb   :  { %v32_v41 = vrot.slane %v31_v33, 1  ;;  %v39_v42 = vrot.slane %v38_v34, 1  ;;  %v46_v46 = vrot.slane %v45_v35, 1  ;;  %v59_v48 = vadd.f32 %v58_v37, %v57_v29 }
   0xc   :  { %v468_v49 = vadd.f32 %v65_v38, %v64_v30  ;;  %v79_v53 = vrot.slane %v78_v40, 2  ;;  %v83_v56 = vsel %vm26_vm0, %v456_v43, 0.0  ;;  %v90_v57 = vsel %vm26_vm0, %v461_v44, 0.0 }
   0xd   :  { %v475_v51 = vadd.f32 %v32_v41, %v31_v33  ;;  %v40_v55 = vadd.f32 %v39_v42, %v38_v34  ;;  %v97_v58 = vsel %vm26_vm0, %v466_v45, 0.0  ;;  %v47_v60 = vadd.f32 %v46_v46, %v45_v35 }
   0xe   :  { %v53_v61 = vrot.slane %v52_v47, 1  ;;  %v60_v62 = vrot.slane %v59_v48, 1  ;;  %v67_v63 = vrot.slane %v468_v49, 1  ;;  %v84_v8 = vrot.slane %v83_v56, 4 }
   0xf   :  { %v91_v11 = vrot.slane %v90_v57, 4  ;;  %v98_v12 = vrot.slane %v97_v58, 4  ;;  %v104_v13 = vsel %vm26_vm0, %v473_v50, 0.0  ;;  %v73_v14 = vadd.f32 %v72_v52, %v71_v39 }
  0x10   :  { %v80_v15 = vadd.f32 %v79_v53, %v78_v40  ;;  %v105_v16 = vrot.slane %v104_v13, 4  ;;  %v111_v17 = vsel %vm26_vm0, %v480_v54, 0.0  ;;  %v85_v18 = vadd.f32 %v84_v8, %v83_v56 }
  0x11   :  { %v92_v19 = vadd.f32 %v91_v11, %v90_v57  ;;  %v99_v20 = vadd.f32 %v98_v12, %v97_v58  ;;  %v112_v21 = vrot.slane %v111_v17, 4  ;;  %v118_v23 = vsel %vm26_vm0, %v491_v59, 0.0 }
  0x12   :  { %v106_v22 = vadd.f32 %v105_v16, %v104_v13  ;;  %v125_v24 = vsel %vm26_vm0, %v497_v6, 0.0  ;;  %v132_v25 = vsel %vm26_vm0, %v502_v7, 0.0  ;;  %v86_v26 = vrot.slane %v85_v18, 2 }
  0x13   :  { %v93_v27 = vrot.slane %v92_v19, 2  ;;  %v100_v28 = vrot.slane %v99_v20, 2  ;;  %v113_v29 = vadd.f32 %v112_v21, %v111_v17  ;;  %v119_v31 = vrot.slane %v118_v23, 4 }
  0x14   :  { %v107_v30 = vrot.slane %v106_v22, 2  ;;  %v126_v32 = vrot.slane %v125_v24, 4  ;;  %v133_v33 = vrot.slane %v132_v25, 4  ;;  %v87_v34 = vadd.f32 %v86_v26, %v85_v18 }
  0x15   :  { %v94_v35 = vadd.f32 %v93_v27, %v92_v19  ;;  %v101_v36 = vadd.f32 %v100_v28, %v99_v20  ;;  %v114_v37 = vrot.slane %v113_v29, 2  ;;  %v120_v39 = vadd.f32 %v119_v31, %v118_v23 }
  0x16   :  { %v108_v38 = vadd.f32 %v107_v30, %v106_v22  ;;  %v127_v40 = vadd.f32 %v126_v32, %v125_v24  ;;  %v134_v41 = vadd.f32 %v133_v33, %v132_v25  ;;  %v88_v42 = vrot.slane %v87_v34, 1 }
  0x17   :  { %v95_v46 = vrot.slane %v94_v35, 1  ;;  %v102_v52 = vrot.slane %v101_v36, 1  ;;  %v115_v53 = vadd.f32 %v114_v37, %v113_v29  ;;  %v54_v56 = vadd.f32 %v53_v61, %v52_v47 }
  0x18   :  { %v61_v57 = vadd.f32 %v60_v62, %v59_v48  ;;  %v121_v58 = vrot.slane %v120_v39, 2  ;;  %v128_v8 = vrot.slane %v127_v40, 2  ;;  %v74_v11 = vrot.slane %v73_v14, 1 }
  0x19   :  { %v89_v12 = vadd.f32 %v88_v42, %v87_v34  ;;  %v109_v13 = vrot.slane %v108_v38, 1  ;;  %v135_v16 = vrot.slane %v134_v41, 2  ;;  %v96_v17 = vadd.f32 %v95_v46, %v94_v35 }
  0x1a   :  { %v116_v18 = vrot.slane %v115_v53, 1  ;;  %v122_v19 = vadd.f32 %v121_v58, %v120_v39  ;;  %v129_v20 = vadd.f32 %v128_v8, %v127_v40  ;;  %v103_v21 = vadd.f32 %v102_v52, %v101_v36 }
  0x1b   :  { %v139_v22 = vsel %vm26_vm0, %v475_v51, 0.0  ;;  %v140_v23 = vsel %vm26_vm0, %v40_v55, 0.0  ;;  %v142_v24 = vsel %vm26_vm0, %v47_v60, 0.0  ;;  %v68_v47 = vadd.f32 %v67_v63, %v468_v49 }
  0x1c   :  { %v81_v48 = vrot.slane %v80_v15, 1  ;;  %v141_v61 = vadd.f32 %v140_v23, %v139_v22  ;;  %v110_v62 = vadd.f32 %v109_v13, %v108_v38  ;;  %v123_v25 = vrot.slane %v122_v19, 1 }
  0x1d   :  { %v136_v26 = vadd.f32 %v135_v16, %v134_v41  ;;  %v144_v27 = vsel %vm26_vm0, %v54_v56, 0.0  ;;  %v75_v28 = vadd.f32 %v74_v11, %v73_v14  ;;  %v117_v29 = vadd.f32 %v116_v18, %v115_v53 }
  0x1e   :  { %v130_v30 = vrot.slane %v129_v20, 1  ;;  %v143_v31 = vadd.f32 %v142_v24, %v141_v61  ;;  %v146_v32 = vsel %vm26_vm0, %v61_v57, 0.0  ;;  %v154_v51 = vsel %vm26_vm0, %v89_v12, 0.0 }
  0x1f   :  { %v155_v55 = vsel %vm26_vm0, %v96_v17, 0.0  ;;  %v157_v60 = vsel %vm26_vm0, %v103_v21, 0.0  ;;  %v82_v49 = vadd.f32 %v81_v48, %v80_v15  ;;  %v124_v34 = vadd.f32 %v123_v25, %v122_v19 }
  0x20   :  { %v145_v63 = vadd.f32 %v144_v27, %v143_v31  ;;  %v156_v33 = vadd.f32 %v155_v55, %v154_v51  ;;  %v137_v35 = vrot.slane %v136_v26, 1  ;;  %v148_v36 = vsel %vm26_vm0, %v68_v47, 0.0 }
  0x21   :  { %v159_v14 = vsel %vm26_vm0, %v110_v62, 0.0  ;;  %v131_v39 = vadd.f32 %v130_v30, %v129_v20  ;;  %v150_v40 = vsel %vm26_vm0, %v75_v28, 0.0  ;;  %v161_v41 = vsel %vm26_vm0, %v117_v29, 0.0 }
  0x22   :  { %v147_v37 = vadd.f32 %v146_v32, %v145_v63  ;;  %v158_v38 = vadd.f32 %v157_v60, %v156_v33  ;;  %v138_v52 = vadd.f32 %v137_v35, %v136_v26  ;;  %v152_v15 = vsel %vm26_vm0, %v82_v49, 0.0 }
  0x23   :  { %v163_v53 = vsel %vm26_vm0, %v124_v34, 0.0  ;;  %v165_v58 = vsel %vm26_vm0, %v131_v39, 0.0 }
  0x24   :  { %v149_v42 = vadd.f32 %v148_v36, %v147_v37  ;;  %v160_v46 = vadd.f32 %v159_v14, %v158_v38  ;;  %v167_v12 = vsel %vm26_vm0, %v138_v52, 0.0 }
  0x26   :  { %v151_v56 = vadd.f32 %v150_v40, %v149_v42  ;;  %v162_v57 = vadd.f32 %v161_v41, %v160_v46 }
  0x28   :  { %v153_v8 = vadd.f32 %v152_v15, %v151_v56  ;;  %v164_v11 = vadd.f32 %v163_v53, %v162_v57 }
  0x2a   :  { %v166_v13 = vadd.f32 %v165_v58, %v164_v11  ;;  %v170_v16 = vmul.f32 0.015625, %v153_v8 }
  0x2c   :  { %v168_v17 = vadd.f32 %v167_v12, %v166_v13  ;;  %v172_v18 = vsub.f32 %v400_v0, %v170_v16  ;;  %v173_v19 = vsub.f32 %v405_v1, %v170_v16  ;;  %350 = vst.msk [vmem:[%s605_s1] sm:$0x1] %vm349_vm1, %v170_v16  ;;  %v174_v20 = vsub.f32 %v410_v2, %v170_v16 }
  0x2d   :  { %v175_v21 = vsub.f32 %v415_v3, %v170_v16  ;;  %v176_v22 = vsub.f32 %v420_v4, %v170_v16  ;;  %v177_v24 = vsub.f32 %v425_v5, %v170_v16  ;;  %v178_v47 = vsub.f32 %v436_v9, %v170_v16 }
  0x2e   :  { %v171_v23 = vmul.f32 0.015625, %v168_v17  ;;  %v179_v0 = vsub.f32 %v441_v10, %v170_v16  ;;  %v188_v48 = vmul.f32 %v172_v18, %v172_v18  ;;  %v189_v1 = vmul.f32 %v173_v19, %v173_v19 }
  0x2f   :  { %v190_v61 = vmul.f32 %v174_v20, %v174_v20  ;;  %v191_v2 = vmul.f32 %v175_v21, %v175_v21  ;;  %v192_v62 = vmul.f32 %v176_v22, %v176_v22  ;;  %v193_v25 = vmul.f32 %v177_v24, %v177_v24 }
  0x30   :  { %351 = vst.msk [vmem:[%s605_s1 + $0x1] sm:$0x1] %vm349_vm1, %v171_v23  ;;  %v180_v3 = vsub.f32 %v456_v43, %v171_v23  ;;  %v181_v4 = vsub.f32 %v461_v44, %v171_v23  ;;  %v182_v5 = vsub.f32 %v466_v45, %v171_v23  ;;  %v183_v9 = vsub.f32 %v473_v50, %v171_v23 }
  0x31   :  { %v184_v10 = vsub.f32 %v480_v54, %v171_v23  ;;  %v185_v26 = vsub.f32 %v491_v59, %v171_v23  ;;  %v186_v27 = vsub.f32 %v497_v6, %v171_v23  ;;  %v194_v28 = vmul.f32 %v178_v47, %v178_v47 }
  0x32   :  { %v195_v29 = vmul.f32 %v179_v0, %v179_v0  ;;  %v204_v30 = vsel %vm26_vm0, %v188_v48, 0.0  ;;  %v211_v31 = vsel %vm26_vm0, %v189_v1, 0.0  ;;  %v218_v44 = vsel %vm26_vm0, %v190_v61, 0.0 }
  0x33   :  { %v205_v43 = vrot.slane %v204_v30, 4  ;;  %v212_v32 = vrot.slane %v211_v31, 4  ;;  %v225_v45 = vsel %vm26_vm0, %v191_v2, 0.0  ;;  %v219_v51 = vrot.slane %v218_v44, 4 }
  0x34   :  { %v226_v50 = vrot.slane %v225_v45, 4  ;;  %v232_v54 = vsel %vm26_vm0, %v192_v62, 0.0  ;;  %v239_v59 = vsel %vm26_vm0, %v193_v25, 0.0  ;;  %v246_v34 = vsel %vm26_vm0, %v194_v28, 0.0 }
  0x35   :  { %v206_v55 = vadd.f32 %v205_v43, %v204_v30  ;;  %v213_v6 = vadd.f32 %v212_v32, %v211_v31  ;;  %v233_v60 = vrot.slane %v232_v54, 4  ;;  %v240_v49 = vrot.slane %v239_v59, 4 }
  0x36   :  { %v220_v63 = vadd.f32 %v219_v51, %v218_v44  ;;  %v227_v33 = vadd.f32 %v226_v50, %v225_v45  ;;  %v253_v35 = vsel %vm26_vm0, %v195_v29, 0.0  ;;  %v247_v41 = vrot.slane %v246_v34, 4 }
  0x37   :  { %v207_v36 = vrot.slane %v206_v55, 2  ;;  %v214_v14 = vrot.slane %v213_v6, 2  ;;  %v234_v37 = vadd.f32 %v233_v60, %v232_v54  ;;  %v241_v38 = vadd.f32 %v240_v49, %v239_v59 }
  0x38   :  { %v221_v39 = vrot.slane %v220_v63, 2  ;;  %v228_v40 = vrot.slane %v227_v33, 2  ;;  %v254_v42 = vrot.slane %v253_v35, 4  ;;  %v187_v46 = vsub.f32 %v502_v7, %v171_v23 }
  0x39   :  { %v208_v52 = vadd.f32 %v207_v36, %v206_v55  ;;  %v215_v15 = vadd.f32 %v214_v14, %v213_v6  ;;  %v235_v53 = vrot.slane %v234_v37, 2  ;;  %v242_v58 = vrot.slane %v241_v38, 2 }
  0x3a   :  { %v222_v56 = vadd.f32 %v221_v39, %v220_v63  ;;  %v564_v57 = vadd.f32 %v228_v40, %v227_v33  ;;  %v248_v8 = vadd.f32 %v247_v41, %v246_v34  ;;  %v196_v11 = vmul.f32 %v180_v3, %v180_v3 }
  0x3b   :  { %v197_v12 = vmul.f32 %v181_v4, %v181_v4  ;;  %v209_v13 = vrot.slane %v208_v52, 1  ;;  %v255_v16 = vadd.f32 %v254_v42, %v253_v35  ;;  %v198_v17 = vmul.f32 %v182_v5, %v182_v5 }
  0x3c   :  { %v199_v18 = vmul.f32 %v183_v9, %v183_v9  ;;  %v216_v19 = vrot.slane %v215_v15, 1  ;;  %v566_v20 = vadd.f32 %v235_v53, %v234_v37  ;;  %v200_v21 = vmul.f32 %v184_v10, %v184_v10 }
  0x3d   :  { %v201_v22 = vmul.f32 %v185_v26, %v185_v26  ;;  %v202_v7 = vmul.f32 %v186_v27, %v186_v27  ;;  %v203_v23 = vmul.f32 %v187_v46, %v187_v46  ;;  %v223_v24 = vrot.slane %v222_v56, 1 }
  0x3e   :  { %v230_v47 = vrot.slane %v564_v57, 1  ;;  %v243_v0 = vadd.f32 %v242_v58, %v241_v38  ;;  %v249_v48 = vrot.slane %v248_v8, 2  ;;  %v210_v1 = vadd.f32 %v209_v13, %v208_v52 }
  0x3f   :  { %v256_v61 = vrot.slane %v255_v16, 2  ;;  %v260_v2 = vsel %vm26_vm0, %v196_v11, 0.0  ;;  %v267_v62 = vsel %vm26_vm0, %v197_v12, 0.0  ;;  %v217_v3 = vadd.f32 %v216_v19, %v215_v15 }
  0x40   :  { %v237_v4 = vrot.slane %v566_v20, 1  ;;  %v261_v5 = vrot.slane %v260_v2, 4  ;;  %v268_v25 = vrot.slane %v267_v62, 4  ;;  %v274_v9 = vsel %vm26_vm0, %v198_v17, 0.0 }
  0x41   :  { %v281_v10 = vsel %vm26_vm0, %v199_v18, 0.0  ;;  %v288_v26 = vsel %vm26_vm0, %v200_v21, 0.0  ;;  %v295_v27 = vsel %vm26_vm0, %v201_v22, 0.0  ;;  %v244_v28 = vrot.slane %v243_v0, 1 }
  0x42   :  { %v250_v29 = vadd.f32 %v249_v48, %v248_v8  ;;  %v262_v30 = vadd.f32 %v261_v5, %v260_v2  ;;  %v269_v31 = vadd.f32 %v268_v25, %v267_v62  ;;  %v275_v43 = vrot.slane %v274_v9, 4 }
  0x43   :  { %v282_v32 = vrot.slane %v281_v10, 4  ;;  %v289_v44 = vrot.slane %v288_v26, 4  ;;  %v296_v45 = vrot.slane %v295_v27, 4  ;;  %v302_v54 = vsel %vm26_vm0, %v202_v7, 0.0 }
  0x44   :  { %v263_v51 = vrot.slane %v262_v30, 2  ;;  %v270_v50 = vrot.slane %v269_v31, 2  ;;  %v309_v59 = vsel %vm26_vm0, %v203_v23, 0.0  ;;  %v276_v55 = vadd.f32 %v275_v43, %v274_v9 }
  0x45   :  { %v283_v6 = vadd.f32 %v282_v32, %v281_v10  ;;  %v290_v60 = vadd.f32 %v289_v44, %v288_v26  ;;  %v297_v49 = vadd.f32 %v296_v45, %v295_v27  ;;  %v303_v34 = vrot.slane %v302_v54, 4 }
  0x46   :  { %v264_v63 = vadd.f32 %v263_v51, %v262_v30  ;;  %v271_v33 = vadd.f32 %v270_v50, %v269_v31  ;;  %v310_v35 = vrot.slane %v309_v59, 4  ;;  %v277_v36 = vrot.slane %v276_v55, 2 }
  0x47   :  { %v284_v14 = vrot.slane %v283_v6, 2  ;;  %v291_v37 = vrot.slane %v290_v60, 2  ;;  %v298_v38 = vrot.slane %v297_v49, 2  ;;  %v224_v39 = vadd.f32 %v223_v24, %v222_v56 }
  0x48   :  { %v265_v40 = vrot.slane %v264_v63, 1  ;;  %v304_v41 = vadd.f32 %v303_v34, %v302_v54  ;;  %v311_v42 = vadd.f32 %v310_v35, %v309_v59  ;;  %v272_v46 = vrot.slane %v271_v33, 1 }
  0x49   :  { %v278_v52 = vadd.f32 %v277_v36, %v276_v55  ;;  %v285_v15 = vadd.f32 %v284_v14, %v283_v6  ;;  %v292_v53 = vadd.f32 %v291_v37, %v290_v60  ;;  %v231_v58 = vadd.f32 %v230_v47, %v564_v57 }
  0x4a   :  { %v251_v8 = vrot.slane %v250_v29, 1  ;;  %v257_v11 = vadd.f32 %v256_v61, %v255_v16  ;;  %v305_v12 = vrot.slane %v304_v41, 2  ;;  %v299_v18 = vadd.f32 %v298_v38, %v297_v49 }
  0x4b   :  { %v279_v13 = vrot.slane %v278_v52, 1  ;;  %v286_v17 = vrot.slane %v285_v15, 1  ;;  %v312_v19 = vrot.slane %v311_v42, 2  ;;  %v293_v21 = vrot.slane %v292_v53, 1 }
  0x4c   :  { %v306_v22 = vadd.f32 %v305_v12, %v304_v41  ;;  %v316_v56 = vsel %vm26_vm0, %v210_v1, 0.0  ;;  %v317_v7 = vsel %vm26_vm0, %v217_v3, 0.0  ;;  %v238_v23 = vadd.f32 %v237_v4, %v566_v20 }
  0x4d   :  { %v266_v24 = vadd.f32 %v265_v40, %v264_v63  ;;  %v273_v48 = vadd.f32 %v272_v46, %v271_v33  ;;  %v280_v2 = vadd.f32 %v279_v13, %v278_v52  ;;  %v245_v62 = vadd.f32 %v244_v28, %v243_v0 }
  0x4e   :  { %v258_v57 = vrot.slane %v257_v11, 1  ;;  %v318_v47 = vadd.f32 %v317_v7, %v316_v56  ;;  %v319_v16 = vsel %vm26_vm0, %v224_v39, 0.0  ;;  %v287_v61 = vadd.f32 %v286_v17, %v285_v15 }
  0x4f   :  { %v300_v5 = vrot.slane %v299_v18, 1  ;;  %v313_v25 = vadd.f32 %v312_v19, %v311_v42  ;;  %v321_v9 = vsel %vm26_vm0, %v231_v58, 0.0  ;;  %v252_v10 = vadd.f32 %v251_v8, %v250_v29 }
  0x50   :  { %v294_v26 = vadd.f32 %v293_v21, %v292_v53  ;;  %v307_v1 = vrot.slane %v306_v22, 1  ;;  %v320_v27 = vadd.f32 %v319_v16, %v318_v47  ;;  %v323_v3 = vsel %vm26_vm0, %v238_v23, 0.0 }
  0x51   :  { %v331_v20 = vsel %vm26_vm0, %v266_v24, 0.0  ;;  %v332_v4 = vsel %vm26_vm0, %v273_v48, 0.0  ;;  %v334_v0 = vsel %vm26_vm0, %v280_v2, 0.0  ;;  %v259_v28 = vadd.f32 %v258_v57, %v257_v11 }
  0x52   :  { %v322_v30 = vadd.f32 %v321_v9, %v320_v27  ;;  %v333_v31 = vadd.f32 %v332_v4, %v331_v20  ;;  %v301_v43 = vadd.f32 %v300_v5, %v299_v18  ;;  %v314_v32 = vrot.slane %v313_v25, 1 }
  0x53   :  { %v325_v44 = vsel %vm26_vm0, %v245_v62, 0.0  ;;  %v336_v29 = vsel %vm26_vm0, %v287_v61, 0.0  ;;  %v308_v50 = vadd.f32 %v307_v1, %v306_v22  ;;  %v327_v54 = vsel %vm26_vm0, %v252_v10, 0.0 }
  0x54   :  { %v324_v45 = vadd.f32 %v323_v3, %v322_v30  ;;  %v335_v51 = vadd.f32 %v334_v0, %v333_v31  ;;  %v338_v59 = vsel %vm26_vm0, %v294_v26, 0.0  ;;  %v315_v60 = vadd.f32 %v314_v32, %v313_v25 }
  0x55   :  { %v329_v49 = vsel %vm26_vm0, %v259_v28, 0.0  ;;  %v340_v63 = vsel %vm26_vm0, %v301_v43, 0.0  ;;  %v342_v35 = vsel %vm26_vm0, %v308_v50, 0.0 }
  0x56   :  { %v326_v55 = vadd.f32 %v325_v44, %v324_v45  ;;  %v337_v6 = vadd.f32 %v336_v29, %v335_v51  ;;  %v344_v37 = vsel %vm26_vm0, %v315_v60, 0.0 }
  0x58   :  { %v328_v33 = vadd.f32 %v327_v54, %v326_v55  ;;  %v339_v34 = vadd.f32 %v338_v59, %v337_v6 }
  0x5a   :  { %v330_v36 = vadd.f32 %v329_v49, %v328_v33  ;;  %v341_v14 = vadd.f32 %v340_v63, %v339_v34 }
  0x5c   :  { %v343_v38 = vadd.f32 %v342_v35, %v341_v14  ;;  %v347_v39 = vmul.f32 0.015873017, %v330_v36 }
  0x5e   :  { %v345_v40 = vadd.f32 %v344_v37, %v343_v38  ;;  %v352_v41 = vadd.f32 1e-06, %v347_v39 }
  0x60   :  { %v348_v42 = vmul.f32 0.015873017, %v345_v40  ;;  %378 = vrsqrt.f32 %v352_v41  ;;  %vm356_vm2 = vcmp.eq.f32.partialorder %v352_v41, inf  ;;  %v359_v15 = vand.u32 2147483648, %v352_v41 }
  0x61   :  { %vm358_vm3 = vcmp.eq.f32.partialorder %v352_v41, 0.0 }
  0x62   :  { %v353_v46 = vadd.f32 1e-06, %v348_v42 }
  0x64   :  { %380 = vrsqrt.f32 %v353_v46  ;;  %vm363_vm4 = vcmp.eq.f32.partialorder %v353_v46, inf  ;;  %v366_v12 = vand.u32 2147483648, %v353_v46  ;;  %vm365_vm5 = vcmp.eq.f32.partialorder %v353_v46, 0.0 }
  0x6a   :  { %v379_v52 = vpop.eup %378 }
  0x6b   :  { %v355_v53 = vmul.f32 %v379_v52, %v352_v41 }
  0x6d   :  { %v357_v58 = vsel %vm356_vm2, %v352_v41, %v355_v53 }
  0x6e   :  { %v381_v8 = vpop.eup %380  ;;  %v360_v11 = vsel %vm358_vm3, %v359_v15, %v357_v58 }
  0x6f   :  { %v362_v13 = vmul.f32 %v381_v8, %v353_v46  ;;  %368 = vst.msk [vmem:[%s606_s2] sm:$0x1] %vm349_vm1, %v360_v11 }
  0x71   :  { %v364_v17 = vsel %vm363_vm4, %v353_v46, %v362_v13 }
  0x72   :  { %v367_v18 = vsel %vm365_vm5, %v366_v12, %v364_v17 }
  0x73   :  { %369 = vst.msk [vmem:[%s606_s2 + $0x1] sm:$0x1] %vm349_vm1, %v367_v18 }

// kernel: resnet_itta_forward.15
= control target key start
LH: loop header
LB: loop body
LE: loop exit
PB: predicated region body
PF: predicated region fallthrough
CT: control target
= control target key end

     0   :  { %vm91_vm0 = vcmask 523264   ;;  %s266_s0 = inlined_call_operand.vmem [shape: f32[2,8,8,64], index: 0, kind: input, shape index: {}]   ;;  %s267_s1 = inlined_call_operand.vmem [shape: f32[2,1,1,64], index: 1, kind: input, shape index: {}]   ;;  %s268_s2 = inlined_call_operand.vmem [shape: f32[2,1,1,64], index: 2, kind: input, shape index: {}]   ;;  %s269_s3 = inlined_call_operand.hbm [shape: f32[2,8,8,64], index: 3, kind: output, shape index: {}]  }
   0x1   :  { %v15_v0 = vld [vmem:[%s266_s0] sm:$0xff]  ;;  %v16_v4 = vld [vmem:[%s266_s0 + $0x8] sm:$0xff]  ;;  %v17_v5 = vld [vmem:[%s266_s0 + $0x10] sm:$0xff] }
   0x2   :  { %v124_v1 = vld [vmem:[%s267_s1] ss:$0 sm:$0xff]  ;;  %v18_v6 = vld [vmem:[%s266_s0 + $0x18] sm:$0xff]  ;;  %v20_v11 = vld [vmem:[%s266_s0 + $0x28] sm:$0xff] }
   0x3   :  { %v126_v2 = vld [vmem:[%s268_s2] ss:$0 sm:$0xff]  ;;  %v45_v3 = vmul.f32 %v124_v1, %v15_v0  ;;  %v46_v7 = vmul.f32 %v124_v1, %v16_v4  ;;  %v47_v8 = vmul.f32 %v124_v1, %v17_v5  ;;  %v48_v9 = vmul.f32 %v124_v1, %v18_v6  ;;  %v21_v12 = vld [vmem:[%s266_s0 + $0x30] sm:$0xff]  ;;  %v22_v17 = vld [vmem:[%s266_s0 + $0x38] sm:$0xff] }
   0x4   :  { %v19_v10 = vld [vmem:[%s266_s0 + $0x20] sm:$0xff]  ;;  %v50_v15 = vmul.f32 %v124_v1, %v20_v11  ;;  %v51_v16 = vmul.f32 %v124_v1, %v21_v12  ;;  %v52_v23 = vmul.f32 %v124_v1, %v22_v17  ;;  %v24_v25 = vld [vmem:[%s266_s0 + $0x48] sm:$0xff]  ;;  %v25_v26 = vld [vmem:[%s266_s0 + $0x50] sm:$0xff] }
   0x5   :  { %v75_v13 = vadd.f32 %v126_v2, %v45_v3  ;;  %v49_v14 = vmul.f32 %v124_v1, %v19_v10  ;;  %v23_v18 = vld [vmem:[%s266_s0 + $0x40] sm:$0xff]  ;;  %v76_v20 = vadd.f32 %v126_v2, %v46_v7  ;;  %v77_v21 = vadd.f32 %v126_v2, %v47_v8  ;;  %v26_v31 = vld [vmem:[%s266_s0 + $0x58] sm:$0xff]  ;;  %v28_v33 = vld [vmem:[%s266_s0 + $0x68] sm:$0xff] }
   0x6   :  { %v125_v19 = vld [vmem:[%s267_s1 + $0x1] ss:$0 sm:$0xff]  ;;  %v78_v22 = vadd.f32 %v126_v2, %v48_v9  ;;  %v80_v28 = vadd.f32 %v126_v2, %v50_v15  ;;  %v81_v29 = vadd.f32 %v126_v2, %v51_v16  ;;  %v82_v34 = vadd.f32 %v126_v2, %v52_v23  ;;  %v29_v38 = vld [vmem:[%s266_s0 + $0x70] sm:$0xff]  ;;  %v30_v39 = vld [vmem:[%s266_s0 + $0x78] sm:$0xff] }
   0x7   :  { %v127_v24 = vld [vmem:[%s268_s2 + $0x1] ss:$0 sm:$0xff]  ;;  %92 = vst.msk [vmem:[#allocation2] sm:$0xff] %vm91_vm0, %v75_v13  ;;  %v79_v27 = vadd.f32 %v126_v2, %v49_v14  ;;  %v53_v30 = vmul.f32 %v125_v19, %v23_v18  ;;  %93 = vst.msk [vmem:[#allocation2 + $0x8] sm:$0xff] %vm91_vm0, %v76_v20  ;;  %v54_v35 = vmul.f32 %v125_v19, %v24_v25 }
   0x8   :  { %v27_v32 = vld [vmem:[%s266_s0 + $0x60] sm:$0xff]  ;;  %94 = vst.msk [vmem:[#allocation2 + $0x10] sm:$0xff] %vm91_vm0, %v77_v21  ;;  %95 = vst.msk [vmem:[#allocation2 + $0x18] sm:$0xff] %vm91_vm0, %v78_v22  ;;  %v55_v36 = vmul.f32 %v125_v19, %v25_v26  ;;  %v56_v37 = vmul.f32 %v125_v19, %v26_v31 }
   0x9   :  { %8 = vsyncpa [#allocation3], 0  ;;  %96 = vst.msk [vmem:[#allocation2 + $0x20] sm:$0xff] %vm91_vm0, %v79_v27  ;;  %v83_v40 = vadd.f32 %v127_v24, %v53_v30  ;;  %v57_v41 = vmul.f32 %v125_v19, %v27_v32  ;;  %v58_v42 = vmul.f32 %v125_v19, %v28_v33  ;;  %v59_v43 = vmul.f32 %v125_v19, %v29_v38  ;;  %s155_s23 = smov [#allocation2]  }
   0xa   :  { %97 = vst.msk [vmem:[#allocation2 + $0x28] sm:$0xff] %vm91_vm0, %v80_v28  ;;  %98 = vst.msk [vmem:[#allocation2 + $0x30] sm:$0xff] %vm91_vm0, %v81_v29  ;;  %s113_s24 = sshll.u32 %s155_s23, 4  ;;  %v84_v44 = vadd.f32 %v127_v24, %v54_v35  ;;  %v85_v45 = vadd.f32 %v127_v24, %v55_v36  ;;  %v86_v46 = vadd.f32 %v127_v24, %v56_v37  ;;  %s114_s24 = int_to_ptr.vmem [resolvable:$true] %s113_s24 }
   0xb   :  { %99 = vst.msk [vmem:[#allocation2 + $0x38] sm:$0xff] %vm91_vm0, %v82_v34  ;;  %v60_v47 = vmul.f32 %v125_v19, %v30_v39  ;;  %100 = vst.msk [vmem:[#allocation2 + $0x40] sm:$0xff] %vm91_vm0, %v83_v40  ;;  %v87_v48 = vadd.f32 %v127_v24, %v57_v41  ;;  %v88_v49 = vadd.f32 %v127_v24, %v58_v42  ;;  %s131_s0 = scalar_lea.vmem %s114_s24, 2048  ;;  %p136_p1 = scmp.lt.s32.totalorder %s114_s24, %s114_s24 }
   0xc   :  { %v89_v50 = vadd.f32 %v127_v24, %v59_v43  ;;  %101 = vst.msk [vmem:[#allocation2 + $0x48] sm:$0xff] %vm91_vm0, %v84_v44  ;;  %102 = vst.msk [vmem:[#allocation2 + $0x50] sm:$0xff] %vm91_vm0, %v85_v45  ;;  %p132_p0 = scmp.ne.s32.totalorder %s114_s24, %s131_s0  ;;  %p137_p2 = scmp.lt.s32.totalorder %s131_s0, %s131_s0 }
   0xd   :  { %103 = vst.msk [vmem:[#allocation2 + $0x58] sm:$0xff] %vm91_vm0, %v86_v46  ;;  %v90_v51 = vadd.f32 %v127_v24, %v60_v47  ;;  %104 = vst.msk [vmem:[#allocation2 + $0x60] sm:$0xff] %vm91_vm0, %v87_v48 }
   0xe   :  { %105 = vst.msk [vmem:[#allocation2 + $0x68] sm:$0xff] %vm91_vm0, %v88_v49  ;;  %106 = vst.msk [vmem:[#allocation2 + $0x70] sm:$0xff] %vm91_vm0, %v89_v50  ;;  %p138_p3 = por %p137_p2, %p136_p1 }
   0xf   :  { %107 = vst.msk [vmem:[#allocation2 + $0x78] sm:$0xff] %vm91_vm0, %v90_v51 }
  0x10   :  { %p139_p4 = pnand %p138_p3, %p132_p0 }
  0x12   :  { %142 = shalt.err (!%p139_p4)
}
  0x13   :  { %s143_s27 = scalar_lea.hbm %s269_s3, 2048 }
  0x14   :  { %p144_p5 = scmp.ne.s32.totalorder %s269_s3, %s143_s27  ;;  %p147_p6 = scmp.lt.u32.totalorder %s143_s27, %s269_s3 }
  0x16   :  { %p149_p7 = pnand %p147_p6, %p144_p5 }
  0x18   :  { %152 = shalt.err (!%p149_p7)
}
  0x19   :  { %s156_s5 = smov 128   ;;  %s157_s6 = smov 8  }
  0x1a   :  { %119 = dma.vmem_to_hbm [thread:$0]  %s114_s24, 2048, %s269_s3, [#allocation3], %s156_s5, %s156_s5, %s157_s6  }
  0x1b   :  { %153 = dma.done.wait [#allocation3], 2048  }
  0x1c   :  { %154 = vsyncadd [#allocation3], 4294965248 }
  0x1d   :  { %123 = vsyncpa [#allocation3], 1 }

</bundles_post_ra>
